<compile_context>
chip_gen: v7x
topology: tpu7x:2x2x1
jax: 0.10.0
libtpu: 0.0.40
codegen_flags: <defaults>
</compile_context>

<pallas_src>
import math
import functools

import jax
import jax.numpy as jnp
from jax.experimental import pallas as pl
from jax.experimental.pallas import tpu as pltpu


# ---------------------------------------------------------------------------
# Parameter construction (mirrors Siren.init_ / SirenNet.__init__ exactly)
# ---------------------------------------------------------------------------
def make_siren_params(key, dim_in, dim_hidden, dim_out, num_layers,
                      w0=1.0, w0_initial=30.0, c=6.0):
    """Returns torch-style params: weights[i] (d_out, d_in), biases[i] (d_out,), w0s[i]."""
    weights, biases, w0s = [], [], []
    layer_dims = []
    for ind in range(num_layers):
        is_first = ind == 0
        layer_dims.append((dim_in if is_first else dim_hidden, dim_hidden,
                           w0_initial if is_first else w0, is_first))
    layer_dims.append((dim_hidden, dim_out, w0, False))   # last layer

    for (d_in, d_out, layer_w0, is_first) in layer_dims:
        key, kw, kb = jax.random.split(key, 3)
        w_std = (1.0 / d_in) if is_first else (math.sqrt(c / d_in) / layer_w0)
        w = jax.random.uniform(kw, (d_out, d_in), jnp.float32, -w_std, w_std)
        b = jax.random.uniform(kb, (d_out,), jnp.float32, -w_std, w_std)
        weights.append(w)
        biases.append(b)
        w0s.append(layer_w0)
    return weights, biases, w0s


def fold_w0_params(weights, biases, w0s):
    """Fold sin(w0 * (Wx + b)) -> sin((w0*W)x + w0*b) for hidden layers.

    Returns kernel-ready params: weights (d_out, d_in), biases (d_out, 1)."""
    num_layers = len(weights) - 1
    kw, kb = [], []
    for i, (w, b) in enumerate(zip(weights, biases)):
        if i < num_layers:
            kw.append((w0s[i] * w).astype(jnp.float32))
            kb.append((w0s[i] * b).reshape(-1, 1).astype(jnp.float32))
        else:  # last layer: final_activation = Identity, no w0 applied
            kw.append(w.astype(jnp.float32))
            kb.append(b.reshape(-1, 1).astype(jnp.float32))
    return kw, kb


# ---------------------------------------------------------------------------
# Pallas kernel: entire SirenNet fused per point-tile (feature-major layout)
# ---------------------------------------------------------------------------
def siren_kernel(*refs, num_layers, unroll_first):
    # refs: x_ref (dim_in, tile), then (w_ref (d_out,d_in), b_ref (d_out,1)) per layer,
    # then o_ref (dim_out, tile).
    x_ref = refs[0]
    o_ref = refs[-1]
    wb_refs = refs[1:-1]

    h = x_ref[...].astype(jnp.float32)                      # (dim_in, tile)
    total = num_layers + 1
    for i in range(total):
        w = wb_refs[2 * i][...]                             # (d_out, d_in)
        b = wb_refs[2 * i + 1][...]                         # (d_out, 1)
        if i == 0 and unroll_first:
            # K = dim_in is tiny: outer-product style broadcast MACs on the VPU
            # instead of a K=2 MXU contraction.
            d_in = h.shape[0]
            acc = w[:, 0:1] * h[0:1, :]                     # (d_out, tile)
            for k in range(1, d_in):
                acc = acc + w[:, k:k + 1] * h[k:k + 1, :]
            out = acc + b
        else:
            out = jnp.dot(w, h, preferred_element_type=jnp.float32) + b
        if i < num_layers:
            h = jnp.sin(out)        # w0 already folded into w, b
        else:
            h = out                 # final_activation = Identity
    o_ref[...] = h.astype(o_ref.dtype)


def siren_net_forward(x, weights, biases, w0s, *, tile_n=8192):
    """x: (N, dim_in) float32, torch-style weights/biases/w0s. Returns (N, dim_out)."""
    N, dim_in = x.shape
    dim_out = weights[-1].shape[0]
    num_layers = len(weights) - 1

    kw, kb = fold_w0_params(weights, biases, w0s)

    # ---- choose the point tile (lane axis), multiple of 128 ----------------
    n_pad128 = ((N + 127) // 128) * 128
    tile = min(tile_n, n_pad128)
    tile = max(128, (tile // 128) * 128)
    # Prefer >= 2 grid steps (v7x has 2 TensorCores; the parallel axis shards them).
    if tile >= n_pad128 and n_pad128 >= 256:
        tile = ((n_pad128 // 2 + 127) // 128) * 128
    n_total = pl.cdiv(N, tile) * tile

    # ---- feature-major relayout + zero pad (layout plumbing, done by XLA) ---
    x_fm = jnp.zeros((dim_in, n_total), jnp.float32).at[:, :N].set(x.T)

    kernel = functools.partial(
        siren_kernel, num_layers=num_layers, unroll_first=(dim_in <= 8))

    in_specs = [pl.BlockSpec((dim_in, tile), lambda i: (0, i))]
    flat_params = []
    for w, b in zip(kw, kb):
        in_specs.append(pl.BlockSpec(w.shape, lambda i: (0, 0)))
        in_specs.append(pl.BlockSpec(b.shape, lambda i: (0, 0)))
        flat_params.append(w)
        flat_params.append(b)

    out_spec = pl.BlockSpec((dim_out, tile), lambda i: (0, i))

    out_fm = pl.pallas_call(
        kernel,
        out_shape=jax.ShapeDtypeStruct((dim_out, n_total), jnp.float32),
        grid_spec=pltpu.PrefetchScalarGridSpec(
            num_scalar_prefetch=0,
            grid=(n_total // tile,),
            in_specs=in_specs,
            out_specs=out_spec,
        ),
        compiler_params=pltpu.CompilerParams(
            dimension_semantics=("parallel",)),
    )(x_fm, *flat_params)

    return out_fm[:, :N].T                                   # back to (N, dim_out)


# ---------------------------------------------------------------------------
# Pure-JAX reference (mirrors the PyTorch forward exactly) for verification
# ---------------------------------------------------------------------------
def siren_net_reference(x, weights, biases, w0s):
    h = x
    num_layers = len(weights) - 1
    for i in range(num_layers):
        h = jnp.sin(w0s[i] * (h @ weights[i].T + biases[i]))
    return h @ weights[-1].T + biases[-1]     # final_activation = Identity


if __name__ == "__main__":
    # Small, SIREN-typical shapes: coordinates (N, 2) -> RGB (N, 3).
    # N deliberately NOT a multiple of 128 to exercise the padding path.
    N = 300
    dim_in = 2
    dim_hidden = 32
    dim_out = 3
    num_layers = 3
    w0 = 1.0
    w0_initial = 30.0

    key = jax.random.PRNGKey(0)
    key, kx = jax.random.split(key)
    x = jax.random.uniform(kx, (N, dim_in), jnp.float32, -1.0, 1.0)

    weights, biases, w0s = make_siren_params(
        key, dim_in, dim_hidden, dim_out, num_layers,
        w0=w0, w0_initial=w0_initial)

    out = siren_net_forward(x, weights, biases, w0s)
    out = jax.block_until_ready(out)

    ref = siren_net_reference(x, weights, biases, w0s)
    assert out.shape == (N, dim_out)
    assert jnp.allclose(out, ref, atol=1e-4, rtol=1e-4), "mismatch vs reference"

    print("KERNEL_OK")
</pallas_src>

<mosaic_0001>
module attributes {stable_mosaic.version = 11 : i64} {
  func.func @siren_kernel(%arg0: i32, %arg1: memref<2x256xf32, #tpu.memory_space<vmem>>, %arg2: memref<32x2xf32, #tpu.memory_space<vmem>>, %arg3: memref<32x1xf32, #tpu.memory_space<vmem>>, %arg4: memref<32x32xf32, #tpu.memory_space<vmem>>, %arg5: memref<32x1xf32, #tpu.memory_space<vmem>>, %arg6: memref<32x32xf32, #tpu.memory_space<vmem>>, %arg7: memref<32x1xf32, #tpu.memory_space<vmem>>, %arg8: memref<3x32xf32, #tpu.memory_space<vmem>>, %arg9: memref<3x1xf32, #tpu.memory_space<vmem>>, %arg10: memref<3x256xf32, #tpu.memory_space<vmem>>) attributes {dimension_semantics = [#tpu.dimension_semantics<parallel>], iteration_bounds = array<i64: 2>, scalar_prefetch = 0 : i64, scratch_operands = 0 : i64, tpu.core_type = #tpu.core_type<tc>, window_params = [{transform_indices = @transform_0, window_bounds = array<i64: 2, 256>}, {pipeline_mode = #tpu.pipeline_mode<synchronous>, transform_indices = @transform_1, window_bounds = array<i64: 32, 2>}, {pipeline_mode = #tpu.pipeline_mode<synchronous>, transform_indices = @transform_2, window_bounds = array<i64: 32, 1>}, {pipeline_mode = #tpu.pipeline_mode<synchronous>, transform_indices = @transform_3, window_bounds = array<i64: 32, 32>}, {pipeline_mode = #tpu.pipeline_mode<synchronous>, transform_indices = @transform_4, window_bounds = array<i64: 32, 1>}, {pipeline_mode = #tpu.pipeline_mode<synchronous>, transform_indices = @transform_5, window_bounds = array<i64: 32, 32>}, {pipeline_mode = #tpu.pipeline_mode<synchronous>, transform_indices = @transform_6, window_bounds = array<i64: 32, 1>}, {pipeline_mode = #tpu.pipeline_mode<synchronous>, transform_indices = @transform_7, window_bounds = array<i64: 3, 32>}, {pipeline_mode = #tpu.pipeline_mode<synchronous>, transform_indices = @transform_8, window_bounds = array<i64: 3, 1>}, {transform_indices = @transform_9, window_bounds = array<i64: 3, 256>}]} {
    %c0 = arith.constant 0 : index
    %c0_0 = arith.constant 0 : index
    %0 = vector.load %arg1[%c0, %c0_0] : memref<2x256xf32, #tpu.memory_space<vmem>>, vector<2x256xf32>
    %c0_1 = arith.constant 0 : index
    %c0_2 = arith.constant 0 : index
    %1 = vector.load %arg2[%c0_1, %c0_2] : memref<32x2xf32, #tpu.memory_space<vmem>>, vector<32x2xf32>
    %c0_3 = arith.constant 0 : index
    %c0_4 = arith.constant 0 : index
    %2 = vector.load %arg3[%c0_3, %c0_4] : memref<32x1xf32, #tpu.memory_space<vmem>>, vector<32x1xf32>
    %3 = vector.extract_strided_slice %1 {offsets = [0, 0], sizes = [32, 1], strides = [1, 1]} : vector<32x2xf32> to vector<32x1xf32>
    %4 = vector.extract_strided_slice %0 {offsets = [0, 0], sizes = [1, 256], strides = [1, 1]} : vector<2x256xf32> to vector<1x256xf32>
    %5 = vector.broadcast %3 : vector<32x1xf32> to vector<32x256xf32>
    %6 = vector.broadcast %4 : vector<1x256xf32> to vector<32x256xf32>
    %7 = arith.mulf %5, %6 : vector<32x256xf32>
    %8 = vector.extract_strided_slice %1 {offsets = [0, 1], sizes = [32, 1], strides = [1, 1]} : vector<32x2xf32> to vector<32x1xf32>
    %9 = vector.extract_strided_slice %0 {offsets = [1, 0], sizes = [1, 256], strides = [1, 1]} : vector<2x256xf32> to vector<1x256xf32>
    %10 = vector.broadcast %8 : vector<32x1xf32> to vector<32x256xf32>
    %11 = vector.broadcast %9 : vector<1x256xf32> to vector<32x256xf32>
    %12 = arith.mulf %10, %11 : vector<32x256xf32>
    %13 = arith.addf %7, %12 : vector<32x256xf32>
    %14 = vector.broadcast %2 : vector<32x1xf32> to vector<32x256xf32>
    %15 = arith.addf %13, %14 : vector<32x256xf32>
    %16 = math.sin %15 : vector<32x256xf32>
    %c0_5 = arith.constant 0 : index
    %c0_6 = arith.constant 0 : index
    %17 = vector.load %arg4[%c0_5, %c0_6] : memref<32x32xf32, #tpu.memory_space<vmem>>, vector<32x32xf32>
    %c0_7 = arith.constant 0 : index
    %c0_8 = arith.constant 0 : index
    %18 = vector.load %arg5[%c0_7, %c0_8] : memref<32x1xf32, #tpu.memory_space<vmem>>, vector<32x1xf32>
    %cst = arith.constant dense<0.000000e+00> : vector<32x256xf32>
    %19 = tpu.matmul %17, %16, %cst {dimension_numbers = #tpu.dot_dimension_numbers<[1], [0], [0], [1], [0, 0, 1, 1], [], []>} : vector<32x32xf32>, vector<32x256xf32>, vector<32x256xf32> -> vector<32x256xf32>
    %20 = vector.broadcast %18 : vector<32x1xf32> to vector<32x256xf32>
    %21 = arith.addf %19, %20 : vector<32x256xf32>
    %22 = math.sin %21 : vector<32x256xf32>
    %c0_9 = arith.constant 0 : index
    %c0_10 = arith.constant 0 : index
    %23 = vector.load %arg6[%c0_9, %c0_10] : memref<32x32xf32, #tpu.memory_space<vmem>>, vector<32x32xf32>
    %c0_11 = arith.constant 0 : index
    %c0_12 = arith.constant 0 : index
    %24 = vector.load %arg7[%c0_11, %c0_12] : memref<32x1xf32, #tpu.memory_space<vmem>>, vector<32x1xf32>
    %cst_13 = arith.constant dense<0.000000e+00> : vector<32x256xf32>
    %25 = tpu.matmul %23, %22, %cst_13 {dimension_numbers = #tpu.dot_dimension_numbers<[1], [0], [0], [1], [0, 0, 1, 1], [], []>} : vector<32x32xf32>, vector<32x256xf32>, vector<32x256xf32> -> vector<32x256xf32>
    %26 = vector.broadcast %24 : vector<32x1xf32> to vector<32x256xf32>
    %27 = arith.addf %25, %26 : vector<32x256xf32>
    %28 = math.sin %27 : vector<32x256xf32>
    %c0_14 = arith.constant 0 : index
    %c0_15 = arith.constant 0 : index
    %29 = vector.load %arg8[%c0_14, %c0_15] : memref<3x32xf32, #tpu.memory_space<vmem>>, vector<3x32xf32>
    %c0_16 = arith.constant 0 : index
    %c0_17 = arith.constant 0 : index
    %30 = vector.load %arg9[%c0_16, %c0_17] : memref<3x1xf32, #tpu.memory_space<vmem>>, vector<3x1xf32>
    %cst_18 = arith.constant dense<0.000000e+00> : vector<3x256xf32>
    %31 = tpu.matmul %29, %28, %cst_18 {dimension_numbers = #tpu.dot_dimension_numbers<[1], [0], [0], [1], [0, 0, 1, 1], [], []>} : vector<3x32xf32>, vector<32x256xf32>, vector<3x256xf32> -> vector<3x256xf32>
    %32 = vector.broadcast %30 : vector<3x1xf32> to vector<3x256xf32>
    %33 = arith.addf %31, %32 : vector<3x256xf32>
    %c0_19 = arith.constant 0 : index
    %c0_20 = arith.constant 0 : index
    %34 = vector.load %arg10[%c0_19, %c0_20] : memref<3x256xf32, #tpu.memory_space<vmem>>, vector<3x256xf32>
    tpu.vector_store %arg10[%c0_19, %c0_20], %33 {strides = array<i32>} : memref<3x256xf32, #tpu.memory_space<vmem>>, vector<3x256xf32>,
    return
  }
  func.func @transform_0(%arg0: i32) -> (i32, i32) {
    %c0_i32 = arith.constant 0 : i32
    %c0_i32_0 = arith.constant 0 : i32
    return %c0_i32, %arg0 : i32, i32
  }
  func.func @transform_1(%arg0: i32) -> (i32, i32) {
    %c0_i32 = arith.constant 0 : i32
    %c0_i32_0 = arith.constant 0 : i32
    %c0_i32_1 = arith.constant 0 : i32
    return %c0_i32, %c0_i32_0 : i32, i32
  }
  func.func @transform_2(%arg0: i32) -> (i32, i32) {
    %c0_i32 = arith.constant 0 : i32
    %c0_i32_0 = arith.constant 0 : i32
    %c0_i32_1 = arith.constant 0 : i32
    return %c0_i32, %c0_i32_0 : i32, i32
  }
  func.func @transform_3(%arg0: i32) -> (i32, i32) {
    %c0_i32 = arith.constant 0 : i32
    %c0_i32_0 = arith.constant 0 : i32
    %c0_i32_1 = arith.constant 0 : i32
    return %c0_i32, %c0_i32_0 : i32, i32
  }
  func.func @transform_4(%arg0: i32) -> (i32, i32) {
    %c0_i32 = arith.constant 0 : i32
    %c0_i32_0 = arith.constant 0 : i32
    %c0_i32_1 = arith.constant 0 : i32
    return %c0_i32, %c0_i32_0 : i32, i32
  }
  func.func @transform_5(%arg0: i32) -> (i32, i32) {
    %c0_i32 = arith.constant 0 : i32
    %c0_i32_0 = arith.constant 0 : i32
    %c0_i32_1 = arith.constant 0 : i32
    return %c0_i32, %c0_i32_0 : i32, i32
  }
  func.func @transform_6(%arg0: i32) -> (i32, i32) {
    %c0_i32 = arith.constant 0 : i32
    %c0_i32_0 = arith.constant 0 : i32
    %c0_i32_1 = arith.constant 0 : i32
    return %c0_i32, %c0_i32_0 : i32, i32
  }
  func.func @transform_7(%arg0: i32) -> (i32, i32) {
    %c0_i32 = arith.constant 0 : i32
    %c0_i32_0 = arith.constant 0 : i32
    %c0_i32_1 = arith.constant 0 : i32
    return %c0_i32, %c0_i32_0 : i32, i32
  }
  func.func @transform_8(%arg0: i32) -> (i32, i32) {
    %c0_i32 = arith.constant 0 : i32
    %c0_i32_0 = arith.constant 0 : i32
    %c0_i32_1 = arith.constant 0 : i32
    return %c0_i32, %c0_i32_0 : i32, i32
  }
  func.func @transform_9(%arg0: i32) -> (i32, i32) {
    %c0_i32 = arith.constant 0 : i32
    %c0_i32_0 = arith.constant 0 : i32
    return %c0_i32, %arg0 : i32, i32
  }
}

</mosaic_0001>

<bundles_post_ra>
// kernel: tpu_custom_call.1
= control target key start
LH: loop header
LB: loop body
LE: loop exit
PB: predicated region body
PF: predicated region fallthrough
CT: control target
= control target key end

     0   :  { %14 = vsyncpa [#allocation3], 0  ;;  %s6425_s0 = inlined_call_operand.vmem [shape: f32[2,512], index: 0, kind: input, shape index: {}]   ;;  %s6426_s1 = inlined_call_operand.vmem [shape: f32[32,2], index: 1, kind: input, shape index: {}]   ;;  %s6427_s2 = inlined_call_operand.vmem [shape: f32[32,1], index: 2, kind: input, shape index: {}]   ;;  %s6428_s3 = inlined_call_operand.vmem [shape: f32[32,32], index: 3, kind: input, shape index: {}]   ;;  %s6429_s4 = inlined_call_operand.vmem [shape: f32[32,1], index: 4, kind: input, shape index: {}]   ;;  %s6430_s5 = inlined_call_operand.vmem [shape: f32[32,32], index: 5, kind: input, shape index: {}]   ;;  %s6431_s6 = inlined_call_operand.vmem [shape: f32[32,1], index: 6, kind: input, shape index: {}]   ;;  %s6432_s7 = inlined_call_operand.vmem [shape: f32[3,32], index: 7, kind: input, shape index: {}]   ;;  %s6433_s8 = inlined_call_operand.vmem [shape: f32[3,1], index: 8, kind: input, shape index: {}]   ;;  %s6434_s9 = inlined_call_operand.hbm [shape: f32[3,512], index: 9, kind: output, shape index: {}]  }
   0x1   :  { %16 = vsyncpa [#allocation3 + $0x1], 0  ;;  %s3895_s30 = smov 0   ;;  %s3897_s10 = smov 0  }
   0x2   :  { %s3899_s11 = smov 0   ;;  %s3901_s12 = smov 0  }
   0x3 LB: > { %s3916_s13 = sadd.s32 4294967295, %s3833_s12   ;;  %s3383_s14 = sadd.s32 4294967294, %s3833_s12   ;;  %s3833_s12 = sphi %s3901_s12, %s6669_s12   ;;  %s3829_s11 = sphi %s3899_s11, %s6668_s11   ;;  %s3825_s10 = sphi %s3897_s10, %s6667_s10   ;;  %s3821_s30 = sphi %s3895_s30, %s6666_s30  }
   0x4   : > { %s3920_s15 = sadd.s32 1, %s3833_s12   ;;  %s223_s16 = sadd.s32 1, %s3829_s11 }
   0x5   : > { %s220_s17 = ssub.s32 %s3833_s12, %s3920_s15  ;;  %p233_p0 = scmp.ne.s32.totalorder %s3829_s11, %s3825_s10 }
   0x6   : > { %p221_p1 = scmp.eq.s32.totalorder %s220_s17, 0  ;;  %p234_p2 = scmp.eq.s32.totalorder %s3916_s13, 1 }
   0x7   : > { %p239_p3 = scmp.ne.s32.totalorder %s3825_s10, %s3821_s30  ;;  %p240_p4 = scmp.eq.s32.totalorder %s3383_s14, 1 }
   0x8   : > { %s3931_s18 = scalar_select %p221_p1, %s3829_s11, %s223_s16  }
   0x9   : > { %p3933_p5 = por %p234_p2, %p233_p0  ;;  %p3937_p6 = por %p240_p4, %p239_p3 }
   0xa   : > { %p3386_p7 = scmp.ge.s32.totalorder %s3833_s12, 1  ;;  %p291_p8 = scmp.lt.s32.totalorder %s3833_s12, 3 }
   0xc   : > { %p292_p9 = pnand %p3386_p7, %p291_p8 }
   0xe   : > { %295 = sbr.rel (%p292_p9) target bundleno = 1486 (0x5ce), region = 56 }
  0x15   : > { %v337_v0 = vld [vmem:[%s6426_s1 + $0x10] sm:$0xff]  ;;  %v335_v1 = vld [vmem:[%s6426_s1] sm:$0xff]  ;;  %v3835_v2 = vmov 1   ;;  %v336_v3 = vld [vmem:[%s6426_s1 + $0x8] sm:$0xff]  ;;  %v3836_v4 = vmov 0   ;;  %s3388_s16 = sshll.u32 %s3916_s13, 1  ;;  %v364_v21 = vlaneseq }
  0x16   : > { %3671 = vset.pattern.permute.xlu0 %v3835_v2  ;;  %3669 = vset.pattern.permute.xlu1 %v3835_v2  ;;  %v338_v5 = vld [vmem:[%s6426_s1 + $0x18] sm:$0xff]  ;;  %v340_v6 = vld [vmem:[%s6427_s2 + $0x8] sm:$0xff]  ;;  %v339_v7 = vld [vmem:[%s6427_s2] sm:$0xff]  ;;  %p328_p10 = scmp.lt.s32.totalorder %s3388_s16, 3  ;;  %s324_s14 = sand.u32 1, %s3825_s10  }
  0x17   : > { %399 = vperm.xlu0 %3671, %v337_v0   ;;  %391 = vperm.xlu1 %3669, %v335_v1   ;;  %v1304_v8 = vld [vmem:[%s6429_s4] sm:$0xff]  ;;  %v341_v9 = vld [vmem:[%s6427_s2 + $0x10] sm:$0xff]  ;;  %v342_v11 = vld [vmem:[%s6427_s2 + $0x18] sm:$0xff]  ;;  %v365_v24 = vshrl.u32 %v364_v21, 7  ;;  %s3310_s26 = scalar_lea.sflag [#allocation3], %s324_s14 }
  0x18   : > { %v1306_v10 = vld [vmem:[%s6429_s4 + $0x10] sm:$0xff]  ;;  %v2266_v12 = vld [vmem:[%s6431_s6] sm:$0xff]  ;;  %v1305_v13 = vld [vmem:[%s6429_s4 + $0x8] sm:$0xff]  ;;  %s6671_s16 = smov (!%p328_p10, %s3388_s16), 3 }
  0x19   : > { %v2268_v14 = vld [vmem:[%s6431_s6 + $0x10] sm:$0xff]  ;;  %v1307_v15 = vld [vmem:[%s6429_s4 + $0x18] sm:$0xff]  ;;  %v3224_v16 = vld [vmem:[%s6433_s8] sm:$0x7]  ;;  %s3389_s17 = sshll.u32 %s6671_s16, 1  ;;  %v366_v25 = vsub.s32 0, %v365_v24 }
  0x1a   : > { %v2267_v17 = vld [vmem:[%s6431_s6 + $0x8] sm:$0xff]  ;;  %v2269_v18 = vld [vmem:[%s6431_s6 + $0x18] sm:$0xff]  ;;  %s331_s23 = scalar_lea.vmem %s6425_s0, %s3389_s17  ;;  %v408_v28 = vsub.s32 1, %v365_v24  ;;  %v370_v35 = vsub.s32 2, %v365_v24  ;;  %v412_v39 = vsub.s32 3, %v365_v24  ;;  %s3387_s16 = sshll.u32 %s324_s14, 3 }
  0x1b   : > { %3672 = vset.pattern.permute.xlu0 %v3836_v4  ;;  %395 = vperm.xlu1 %3669, %v336_v3   ;;  %v334_v29 = vld [vmem:[%s331_s23] sm:$0xf]  ;;  %s3500_s17 = sshll.u32 %s3916_s13, 7  ;;  %s326_s21 = scalar_lea.vmem [#allocation2], %s3387_s16 }
  0x1c   : > { %345 = vperm.xlu0 %3672, %v335_v1   ;;  %v367_v30 = vrot.slane %v334_v29, %v366_v25  ;;  %v409_v32 = vrot.slane %v334_v29, %v408_v28  ;;  %v371_v41 = vrot.slane %v334_v29, %v370_v35  ;;  %v413_v44 = vrot.slane %v334_v29, %v412_v39  ;;  %s3324_s22 = sshll.u32 %s326_s21, 4  ;;  %s6383_s25 = scalar_lea.hbm %s6434_s9, %s3500_s17  ;;  %s6385_s22 = int_to_ptr.vmem [resolvable:$true] %s3324_s22 }
  0x1d   : > { %v6470_v39 = vmov 2131351028   ;;  %s3771_s27 = scalar_lea.vmem %s6385_s22, 128  ;;  %s3844_s13 = smov [#allocation2]  }
  0x1e   : > { %v377_v34 = vrot.slane %v367_v30, %v366_v25  ;;  %v419_v36 = vrot.slane %v409_v32, %v408_v28  ;;  %v381_v47 = vrot.slane %v371_v41, %v366_v25  ;;  %v423_v49 = vrot.slane %v413_v44, %v408_v28  ;;  %p3772_p11 = scmp.ne.s32.totalorder %s6385_s22, %s3771_s27  ;;  %s3775_s28 = sshll.u32 %s3844_s13, 4  ;;  %s3776_s28 = int_to_ptr.vmem [resolvable:$false] %s3775_s28 }
  0x1f   : > { %3670 = vset.pattern.permute.xlu1 %v3836_v4  ;;  %s3777_s29 = scalar_lea.vmem %s3776_s28, 256  ;;  %p3778_p0 = scmp.lt.s32.totalorder %s6385_s22, %s3776_s28 }
  0x20   : > { %350 = vperm.xlu0 %3672, %v336_v3   ;;  %360 = vperm.xlu1 %3670, %v338_v5   ;;  %p3773_p12 = pnand %p3772_p11, %p3933_p5  ;;  %p3779_p1 = scmp.lt.s32.totalorder %s3777_s29, %s3771_s27 }
  0x22   : > { %p3774_p13 = pneg %p3773_p12  ;;  %p3780_p2 = por %p3779_p1, %p3778_p0 }
  0x24   : > { %355 = vperm.xlu0 %3672, %v337_v0   ;;  %3673 = vset.pattern.permute.xlu1 %v3835_v2  ;;  %p3781_p3 = pnand %p3780_p2, %p3774_p13 }
  0x25   : > { %403 = vperm.xlu1 %3673, %v338_v5  }
  0x28   : > { %447 = vperm.xlu0 %3672, %v340_v6  }
  0x29   : > { %3674 = vset.pattern.permute.xlu1 %v3836_v4 }
  0x2a   : > { %442 = vperm.xlu1 %3674, %v339_v7  }
  0x2c   : > { %1310 = vperm.xlu0 %3672, %v1304_v8  }
  0x2e   : > { %452 = vperm.xlu1 %3674, %v341_v9  }
  0x30   : > { %1320 = vperm.xlu0 %3672, %v1306_v10  }
  0x32   : > { %457 = vperm.xlu1 %3674, %v342_v11  }
  0x34   : > { %2272 = vperm.xlu0 %3672, %v2266_v12  }
  0x36   : > { %1315 = vperm.xlu1 %3674, %v1305_v13  }
  0x38   : > { %2282 = vperm.xlu0 %3672, %v2268_v14  }
  0x3a   : > { %1325 = vperm.xlu1 %3674, %v1307_v15  }
  0x3c   : > { %3227 = vperm.xlu0 %3672, %v3224_v16  }
  0x3e   : > { %2277 = vperm.xlu1 %3674, %v2267_v17  }
  0x42   : > { %2287 = vperm.xlu1 %3674, %v2269_v18  }
  0x96   : > { %v392_v19 = vpop.permute.xlu1 %391  ;;  %v400_v20 = vpop.permute.xlu0 %399 }
  0x97   : > { %v428_v40 = vmul.f32 %v419_v36, %v400_v20  ;;  %v424_v60 = vmul.f32 %v419_v36, %v392_v19  ;;  %v425_v63 = vmul.f32 %v423_v49, %v392_v19  ;;  %v429_v1 = vmul.f32 %v423_v49, %v400_v20 }
  0x9a   : > { %v396_v22 = vpop.permute.xlu1 %395 }
  0x9b   : > { %v346_v23 = vpop.permute.xlu0 %345  ;;  %v426_v48 = vmul.f32 %v419_v36, %v396_v22  ;;  %v427_v54 = vmul.f32 %v423_v49, %v396_v22 }
  0x9c   : > { %v382_v56 = vmul.f32 %v377_v34, %v346_v23  ;;  %v383_v58 = vmul.f32 %v381_v47, %v346_v23 }
  0x9e   : > { %v432_v2 = vadd.f32 %v424_v60, %v382_v56  ;;  %v433_v3 = vadd.f32 %v425_v63, %v383_v58 }
  0x9f   : > { %v361_v26 = vpop.permute.xlu1 %360  ;;  %v351_v27 = vpop.permute.xlu0 %350 }
  0xa0   : > { %v384_v45 = vmul.f32 %v377_v34, %v351_v27  ;;  %v385_v50 = vmul.f32 %v381_v47, %v351_v27  ;;  %v388_v16 = vmul.f32 %v377_v34, %v361_v26  ;;  %v389_v19 = vmul.f32 %v381_v47, %v361_v26 }
  0xa1   : > { %v6446_v26 = vmov 683565275  }
  0xa2   : > { %v434_v52 = vadd.f32 %v426_v48, %v384_v45  ;;  %v435_v57 = vadd.f32 %v427_v54, %v385_v50  ;;  %v6442_v45 = vmov 920167782  }
  0xa3   : > { %v356_v33 = vpop.permute.xlu0 %355 }
  0xa4   : > { %v404_v31 = vpop.permute.xlu1 %403  ;;  %v386_v37 = vmul.f32 %v377_v34, %v356_v33  ;;  %v387_v61 = vmul.f32 %v381_v47, %v356_v33 }
  0xa5   : > { %v430_v12 = vmul.f32 %v419_v36, %v404_v31  ;;  %v431_v13 = vmul.f32 %v423_v49, %v404_v31  ;;  %v6464_v36 = vmov 2475754826   ;;  %v6440_v49 = vmov 1326507024  }
  0xa6   : > { %v436_v43 = vadd.f32 %v428_v40, %v386_v37  ;;  %v437_v7 = vadd.f32 %v429_v1, %v387_v61 }
  0xa7   : > { %v448_v51 = vpop.permute.xlu0 %447  ;;  %v438_v27 = vadd.f32 %v430_v12, %v388_v16  ;;  %v4017_v28 = vadd.f32 %v431_v13, %v389_v19 }
  0xa8   : > { %v4001_v55 = vadd.f32 %v448_v51, %v434_v52  ;;  %v4003_v62 = vadd.f32 %v448_v51, %v435_v57 }
  0xa9   : > { %v443_v38 = vpop.permute.xlu1 %442 }
  0xaa   : > { %6519 = vst [vmem:[#allocation6_spill] sm:$0xff] %v4001_v55  ;;  %v679_v0 = vand.u32 2139095040, %v4001_v55  ;;  %v783_v5 = vand.u32 2139095040, %v4003_v62  ;;  %v4007_v6 = vadd.f32 %v443_v38, %v432_v2  ;;  %v4009_v9 = vadd.f32 %v443_v38, %v433_v3 }
  0xac   : > { %v680_v8 = vshrl.u32 %v679_v0, 23  ;;  %6520 = vst [vmem:[#allocation7_spill] sm:$0xff] %v4009_v9  ;;  %v784_v14 = vshrl.u32 %v783_v5, 23  ;;  %v471_v15 = vand.u32 2139095040, %v4007_v6  ;;  %v575_v18 = vand.u32 2139095040, %v4009_v9 }
  0xad   : > { %v453_v42 = vpop.permute.xlu1 %452 }
  0xae   : > { %v3998_v46 = vadd.f32 %v453_v42, %v436_v43  ;;  %v4011_v10 = vadd.f32 %v453_v42, %v437_v7  ;;  %v3398_v17 = vadd.s32 4294967169, %v680_v8  ;;  %v3402_v24 = vadd.s32 4294967169, %v784_v14 }
  0xaf   : > { %v472_v25 = vshrl.u32 %v471_v15, 23  ;;  %v576_v30 = vshrl.u32 %v575_v18, 23  ;;  %v6444_v42 = vmov 2102212464  }
  0xb0   : > { %6518 = vst [vmem:[#allocation5_spill] sm:$0xff] %v3998_v46  ;;  %v887_v53 = vand.u32 2139095040, %v3998_v46  ;;  %6521 = vst [vmem:[#allocation8_spill] sm:$0xff] %v4011_v10  ;;  %v6435_v20 = vand.u32 2147483647, %v3998_v46  ;;  %v991_v22 = vand.u32 2139095040, %v4011_v10 }
  0xb1   : > { %v686_v29 = vadd.s32 1, %v3398_v17  ;;  %v6437_v58 = vand.u32 2147483647, %v4011_v10  ;;  %v790_v2 = vadd.s32 1, %v3402_v24  ;;  %v458_v5 = vpop.permute.xlu1 %457  ;;  %v3394_v12 = vadd.s32 4294967169, %v576_v30 }
  0xb2   : > { %v888_v59 = vshrl.u32 %v887_v53, 23  ;;  %v992_v32 = vshrl.u32 %v991_v22, 23  ;;  %v891_v33 = vand.u32 8388607, %v6435_v20  ;;  %v4044_v18 = vadd.f32 %v458_v5, %v438_v27 }
  0xb3   : > { %vm687_vm6 = vcmp.gt.s32.totalorder %v686_v29, 0  ;;  %v995_v16 = vand.u32 8388607, %v6437_v58  ;;  %v3390_v24 = vadd.s32 4294967169, %v472_v25  ;;  %vm791_vm7 = vcmp.gt.s32.totalorder %v790_v2, 0 }
  0xb4   : > { %v3406_v4 = vadd.s32 4294967169, %v888_v59  ;;  %v3410_v54 = vadd.s32 4294967169, %v992_v32  ;;  %v892_v59 = vor.u32 8388608, %v891_v33  ;;  %6522 = vst [vmem:[#allocation9_spill] sm:$0xff] %v4044_v18  ;;  %v6438_v32 = vand.u32 2147483647, %v4009_v9 }
  0xb5   : > { %v688_v33 = vsel %vm687_vm6, %v686_v29, 0  ;;  %v6532_v9 = vmov 1326507024  }
  0xb6   : > { %v894_v11 = vadd.s32 1, %v3406_v4  ;;  %v998_v1 = vadd.s32 1, %v3410_v54  ;;  %v4039_v14 = vshll.u32 %v892_v59, 8 }
  0xb8   : > { %vm895_vm0 = vcmp.gt.s32.totalorder %v894_v11, 0  ;;  %vm999_vm5 = vcmp.gt.s32.totalorder %v998_v1, 0 }
  0xb9   : > { %v896_v21 = vsel %vm895_vm0, %v894_v11, 0  ;;  %v1000_v17 = vsel %vm999_vm5, %v998_v1, 0 }
  0xba   : > { %v898_v23 = vand.u32 31, %v896_v21  ;;  %v897_v34 = vshrl.u32 %v896_v21, 5 }
  0xbc   : > { %v899_v31 = vsub.s32 32, %v898_v23  ;;  %v901_v35 = vshll.u32 %v6446_v26, %v898_v23  ;;  %v904_v37 = vshll.u32 %v6464_v36, %v898_v23  ;;  %v907_v41 = vshll.u32 %v6470_v39, %v898_v23 }
  0xbd   : > { %v910_v44 = vshll.u32 %v6444_v42, %v898_v23  ;;  %v913_v48 = vshll.u32 %v6442_v45, %v898_v23  ;;  %vm916_vm1 = vcmp.lt.s32.totalorder %v897_v34, 1  ;;  %vm918_vm2 = vcmp.lt.s32.totalorder %v897_v34, 3 }
  0xbe   : > { %v902_v38 = vshrl.u32 %v6464_v36, %v899_v31  ;;  %v905_v40 = vshrl.u32 %v6470_v39, %v899_v31  ;;  %v908_v43 = vshrl.u32 %v6444_v42, %v899_v31  ;;  %v911_v47 = vshrl.u32 %v6442_v45, %v899_v31 }
  0xbf   : > { %v914_v50 = vshrl.u32 %v6440_v49, %v899_v31  ;;  %vm919_vm3 = vcmp.lt.s32.totalorder %v897_v34, 4  ;;  %vm917_vm4 = vcmp.lt.s32.totalorder %v897_v34, 2  ;;  %v900_v7 = vshrl.u32 %v6446_v26, %v899_v31 }
  0xc0   : > { %v903_v51 = vor.u32 %v902_v38, %v901_v35  ;;  %v906_v52 = vor.u32 %v905_v40, %v904_v37  ;;  %v909_v53 = vor.u32 %v908_v43, %v907_v41  ;;  %v912_v56 = vor.u32 %v911_v47, %v910_v44 }
  0xc1   : > { %v915_v57 = vor.u32 %v914_v50, %v913_v48  ;;  %v1002_v23 = vand.u32 31, %v1000_v17  ;;  %v4057_v35 = vadd.s32 1, %v3394_v12  ;;  %v996_v38 = vor.u32 8388608, %v995_v16 }
  0xc2   : > { %v924_v60 = vsel %vm916_vm1, %v903_v51, %v906_v52  ;;  %v925_v61 = vsel %vm919_vm3, %v912_v56, 920167782  ;;  %v928_v63 = vsel %vm916_vm1, %v906_v52, %v909_v53  ;;  %v921_v8 = vsel %vm919_vm3, %v909_v53, 2102212464 }
  0xc3   : > { %v929_v0 = vsel %vm919_vm3, %v915_v57, 1326507024  ;;  %v926_v3 = vsel %vm918_vm2, %v909_v53, %v925_v61  ;;  %v920_v15 = vsel %vm916_vm1, %v900_v7, %v903_v51  ;;  %v922_v19 = vsel %vm918_vm2, %v906_v52, %v921_v8 }
  0xc4   : > { %v930_v4 = vsel %vm918_vm2, %v912_v56, %v929_v0  ;;  %v927_v11 = vsel %vm917_vm4, %v924_v60, %v926_v3  ;;  %v1003_v27 = vsub.s32 32, %v1002_v23  ;;  %v923_v37 = vsel %vm917_vm4, %v920_v15, %v922_v19 }
  0xc5   : > { %v931_v13 = vsel %vm917_vm4, %v928_v63, %v930_v4  ;;  %v4048_v21 = vmul.u32.u64.low %v4039_v14, %v927_v11  ;;  %v4049_v22 = vmul.u32.u64.high %v4039_v14, %v927_v11, %v4048_v21  ;;  %v4060_v40 = vshrl.u32 %v1000_v17, 5 }
  0xc6   : > { %v4053_v30 = vmul.u32.u64.low %v4039_v14, %v931_v13  ;;  %v4054_v31 = vmul.u32.u64.high %v4039_v14, %v931_v13, %v4053_v30  ;;  %v1095_v41 = vand.u32 2139095040, %v4044_v18  ;;  %v1005_v25 = vshll.u32 %v6446_v26, %v1002_v23 }
  0xc7   : > { %v1006_v43 = vshrl.u32 %v6464_v36, %v1003_v27  ;;  %v1008_v44 = vshll.u32 %v6464_v36, %v1002_v23  ;;  %v1009_v47 = vshrl.u32 %v6470_v39, %v1003_v27  ;;  %v1011_v29 = vshll.u32 %v6470_v39, %v1002_v23 }
  0xc8   : > { %v1012_v48 = vshrl.u32 %v6444_v42, %v1003_v27  ;;  %v1014_v34 = vshll.u32 %v6444_v42, %v1002_v23  ;;  %v1015_v50 = vshrl.u32 %v6442_v45, %v1003_v27  ;;  %v1017_v53 = vshll.u32 %v6442_v45, %v1002_v23 }
  0xc9   : > { %v1007_v51 = vor.u32 %v1006_v43, %v1005_v25  ;;  %v1010_v52 = vor.u32 %v1009_v47, %v1008_v44  ;;  %v1018_v54 = vshrl.u32 %v6440_v49, %v1003_v27  ;;  %v4073_v59 = vshll.u32 %v996_v38, 8 }
  0xca   : > { %v1013_v56 = vor.u32 %v1012_v48, %v1011_v29  ;;  %v1016_v57 = vor.u32 %v1015_v50, %v1014_v34  ;;  %v1096_v60 = vshrl.u32 %v1095_v41, 23  ;;  %v942_v61 = vadd.s32 1, %v4049_v22 }
  0xcb   : > { %v1019_v63 = vor.u32 %v1018_v54, %v1017_v53  ;;  %vm1020_vm8 = vcmp.lt.s32.totalorder %v4060_v40, 1  ;;  %vm1023_vm9 = vcmp.lt.s32.totalorder %v4060_v40, 4  ;;  %vm941_vm10 = vc.u32 %v4054_v31, %v4048_v21 }
  0xcc   : > { %vm1022_vm11 = vcmp.lt.s32.totalorder %v4060_v40, 3  ;;  %v1028_v0 = vsel %vm1020_vm8, %v1007_v51, %v1010_v52  ;;  %v1029_v1 = vsel %vm1023_vm9, %v1016_v57, 920167782  ;;  %vm1021_vm12 = vcmp.lt.s32.totalorder %v4060_v40, 2 }
  0xcd   : > { %v1030_v3 = vsel %vm1022_vm11, %v1013_v56, %v1029_v1  ;;  %v1032_v4 = vsel %vm1020_vm8, %v1010_v52, %v1013_v56  ;;  %v1033_v7 = vsel %vm1023_vm9, %v1019_v63, 1326507024  ;;  %v792_v8 = vsel %vm791_vm7, %v790_v2, 0 }
  0xce   : > { %v1031_v11 = vsel %vm1021_vm12, %v1028_v0, %v1030_v3  ;;  %v1034_v12 = vsel %vm1022_vm11, %v1016_v57, %v1033_v7  ;;  %v4098_v13 = vadd.f32 %v458_v5, %v4017_v28  ;;  %v943_v15 = vsel %vm941_vm10, %v942_v61, %v4049_v22 }
  0xcf   : > { %v1035_v16 = vsel %vm1021_vm12, %v1032_v4, %v1034_v12  ;;  %v4104_v17 = vmul.u32.u64.low %v4073_v59, %v1031_v11  ;;  %v4105_v19 = vmul.u32.u64.high %v4073_v59, %v1031_v11, %v4104_v17  ;;  %v939_v2 = vmul.u32 %v4039_v14, %v923_v37 }
  0xd0   : > { %6523 = vst [vmem:[#allocation10_spill] sm:$0xff] %v4098_v13  ;;  %v4110_v23 = vmul.u32.u64.low %v4073_v59, %v1035_v16  ;;  %v4111_v30 = vmul.u32.u64.high %v4073_v59, %v1035_v16, %v4110_v23  ;;  %v3414_v38 = vadd.s32 4294967169, %v1096_v60  ;;  %v4113_v41 = vand.u32 31, %v688_v33 }
  0xd1   : > { %v478_v28 = vadd.s32 1, %v3390_v24  ;;  %v1025_v5 = vsel %vm1023_vm9, %v1013_v56, 2102212464  ;;  %v4118_v25 = vadd.s32 %v943_v15, %v939_v2  ;;  %v1004_v43 = vshrl.u32 %v6446_v26, %v1003_v27 }
  0xd2   : > { %6524 = vst [vmem:[#allocation11_spill] sm:$0xff] %v4113_v41  ;;  %v1102_v44 = vadd.s32 1, %v3414_v38  ;;  %v4123_v14 = vand.u32 8388607, %v6438_v32  ;;  %v4125_v37 = vshrl.u32 %v688_v33, 5  ;;  %v4127_v47 = vshrl.u32 %v792_v8, 5 }
  0xd3   : > { %v4129_v29 = vand.u32 31, %v792_v8  ;;  %vm583_vm13 = vcmp.gt.s32.totalorder %v4057_v35, 0  ;;  %v1024_v24 = vsel %vm1020_vm8, %v1004_v43, %v1007_v51  ;;  %v1026_v48 = vsel %vm1022_vm11, %v1010_v52, %v1025_v5 }
  0xd4   : > { %vm1103_vm14 = vcmp.gt.s32.totalorder %v1102_v44, 0  ;;  %v1199_v27 = vand.u32 2139095040, %v4098_v13  ;;  %v4138_v34 = vsub.s32 32, %v4113_v41  ;;  %v4142_v33 = vshll.u32 %v6444_v42, %v4113_v41 }
  0xd5   : > { %vm479_vm15 = vcmp.gt.s32.totalorder %v478_v28, 0  ;;  %v1104_v50 = vsel %vm1103_vm14, %v1102_v44, 0  ;;  %v4145_v53 = vsel %vm583_vm13, %v4057_v35, 0  ;;  %v945_v51 = vadd.s32 536870912, %v4118_v25 }
  0xd6   : > { %6525 = vst [vmem:[#allocation12_spill] sm:$0xff] %v4138_v34  ;;  %v1046_v54 = vadd.s32 1, %v4105_v19  ;;  %v1106_v52 = vand.u32 31, %v1104_v50  ;;  %v4151_v56 = vshll.u32 %v6442_v45, %v4113_v41  ;;  %v4154_v57 = vsub.s32 32, %v4129_v29 }
  0xd7   : > { %v1027_v60 = vsel %vm1021_vm12, %v1024_v24, %v1026_v48  ;;  %vm1045_vm0 = vc.u32 %v4111_v30, %v4104_v17  ;;  %v4162_v35 = vshll.u32 %v6444_v42, %v4129_v29  ;;  %v4166_v61 = vshll.u32 %v6442_v45, %v4129_v29 }
  0xd8   : > { %v4168_v63 = vsub.s32 32, %v1106_v52  ;;  %v1200_v0 = vshrl.u32 %v1199_v27, 23  ;;  %v4172_v1 = vshrl.u32 %v6442_v45, %v4138_v34  ;;  %v4176_v40 = vshrl.u32 %v6440_v49, %v4138_v34 }
  0xd9   : > { %v4179_v3 = vand.u32 31, %v4145_v53  ;;  %v6436_v4 = vand.u32 2147483647, %v4044_v18  ;;  %v4182_v7 = vshrl.u32 %v945_v51, 30  ;;  %v1043_v8 = vmul.u32 %v4073_v59, %v1027_v60 }
  0xda   : > { %v1047_v11 = vsel %vm1045_vm0, %v1046_v54, %v4105_v19  ;;  %v1110_v12 = vshrl.u32 %v6464_v36, %v4168_v63  ;;  %v1113_v15 = vshrl.u32 %v6470_v39, %v4168_v63  ;;  %v1116_v16 = vshrl.u32 %v6444_v42, %v4168_v63 }
  0xdb   : > { %6526 = vst [vmem:[#allocation13_spill] sm:$0xff] %v4182_v7  ;;  %v1118_v2 = vshll.u32 %v6444_v42, %v1106_v52  ;;  %v1119_v23 = vshrl.u32 %v6442_v45, %v4168_v63  ;;  %v4195_v38 = vshrl.u32 %v1104_v50, 5  ;;  %v1109_v59 = vshll.u32 %v6446_v26, %v1106_v52 }
  0xdc   : > { %v1112_v19 = vshll.u32 %v6464_v36, %v1106_v52  ;;  %v3418_v5 = vadd.s32 4294967169, %v1200_v0  ;;  %v4199_v43 = vadd.s32 %v1047_v11, %v1043_v8  ;;  %v1099_v44 = vand.u32 8388607, %v6436_v4 }
  0xdd   : > { %v1115_v24 = vshll.u32 %v6470_v39, %v1106_v52  ;;  %v1120_v48 = vor.u32 %v1119_v23, %v1118_v2  ;;  %v1111_v27 = vor.u32 %v1110_v12, %v1109_v59  ;;  %v1121_v54 = vshll.u32 %v6442_v45, %v1106_v52 }
  0xde   : > { %v1114_v51 = vor.u32 %v1113_v15, %v1112_v19  ;;  %v1122_v50 = vshrl.u32 %v6440_v49, %v4168_v63  ;;  %v480_v60 = vsel %vm479_vm15, %v478_v28, 0  ;;  %v4209_v20 = vsub.s32 32, %v4179_v3 }
  0xdf   : > { %v947_v0 = vshll.u32 %v4182_v7, 30  ;;  %v1117_v8 = vor.u32 %v1116_v16, %v1115_v24  ;;  %v807_v11 = vshrl.u32 %v6442_v45, %v4154_v57  ;;  %vm1127_vm1 = vcmp.lt.s32.totalorder %v4195_v38, 4 }
  0xe0   : > { %v1123_v4 = vor.u32 %v1122_v50, %v1121_v54  ;;  %v1206_v12 = vadd.s32 1, %v3418_v5  ;;  %v4217_v52 = vshrl.u32 %v6440_v49, %v4154_v57  ;;  %vm1124_vm2 = vcmp.lt.s32.totalorder %v4195_v38, 1 }
  0xe1   : > { %v1133_v28 = vsel %vm1127_vm1, %v1120_v48, 920167782  ;;  %v6439_v15 = vand.u32 2147483647, %v4098_v13  ;;  %v1049_v16 = vadd.s32 536870912, %v4199_v43  ;;  %v1100_v2 = vor.u32 8388608, %v1099_v44 }
  0xe2   : > { %vm1126_vm3 = vcmp.lt.s32.totalorder %v4195_v38, 3  ;;  %v1132_v23 = vsel %vm1124_vm2, %v1111_v27, %v1114_v51  ;;  %v599_v59 = vshrl.u32 %v6442_v45, %v4209_v20  ;;  %v4230_v19 = vsub.s32 %v4118_v25, %v947_v0 }
  0xe3   : > { %v1134_v5 = vsel %vm1126_vm3, %v1117_v8, %v1133_v28  ;;  %v1137_v24 = vsel %vm1127_vm1, %v1123_v4, 1326507024  ;;  %vm1125_vm4 = vcmp.lt.s32.totalorder %v4195_v38, 2  ;;  %v1136_v44 = vsel %vm1124_vm2, %v1114_v51, %v1117_v8 }
  0xe4   : > { %v1138_v54 = vsel %vm1126_vm3, %v1120_v48, %v1137_v24  ;;  %vm1207_vm5 = vcmp.gt.s32.totalorder %v1206_v12, 0  ;;  %v4241_v50 = vshrl.u32 %v480_v60, 5  ;;  %v598_v25 = vshll.u32 %v6444_v42, %v4179_v3 }
  0xe5   : > { %v1135_v0 = vsel %vm1125_vm4, %v1132_v23, %v1134_v5  ;;  %v1203_v4 = vand.u32 8388607, %v6439_v15  ;;  %v4249_v28 = vand.u32 31, %v480_v60  ;;  %v4252_v58 = vshrl.u32 %v4145_v53, 5 }
  0xe6   : > { %v4254_v32 = vshrl.u32 %v1049_v16, 30  ;;  %v4256_v48 = vshll.u32 %v1100_v2, 8  ;;  %v4258_v24 = vor.u32 %v599_v59, %v598_v25  ;;  %v4262_v22 = vshrl.u32 %v6440_v49, %v4209_v20 }
  0xe7   : > { %v1139_v23 = vsel %vm1125_vm4, %v1136_v44, %v1138_v54  ;;  %v1208_v5 = vsel %vm1207_vm5, %v1206_v12, 0  ;;  %v950_v60 = vsub.s32 0, %v4230_v19  ;;  %v4274_v2 = vor.u32 %v4172_v1, %v4142_v33 }
  0xe8   : > { %6527 = vst [vmem:[#allocation14_spill] sm:$0xff] %v4254_v32  ;;  %v4268_v15 = vmul.u32.u64.low %v4256_v48, %v1135_v0  ;;  %v4269_v53 = vmul.u32.u64.high %v4256_v48, %v1135_v0, %v4268_v15  ;;  %v1210_v16 = vand.u32 31, %v1208_v5  ;;  %v4280_v25 = vshll.u32 %v6442_v45, %v4179_v3 }
  0xe9   : > { %v1204_v12 = vor.u32 8388608, %v1203_v4  ;;  %v1051_v44 = vshll.u32 %v4254_v32, 30  ;;  %v1129_v54 = vsel %vm1127_vm1, %v1117_v8, 2102212464  ;;  %v4290_v33 = vor.u32 %v807_v11, %v4162_v35 }
  0xea   : > { %6528 = vst [vmem:[#allocation15_spill] sm:$0xff] %v4268_v15  ;;  %v4286_v0 = vmul.u32.u64.low %v4256_v48, %v1139_v23  ;;  %v4287_v49 = vmul.u32.u64.high %v4256_v48, %v1139_v23, %v4286_v0  ;;  %vm607_vm6 = vcmp.lt.s32.totalorder %v4252_v58, 4  ;;  %v1108_v1 = vshrl.u32 %v6446_v26, %v4168_v63 }
  0xeb   : > { %v1211_v59 = vsub.s32 32, %v1210_v16  ;;  %v4300_v8 = vsel %vm607_vm6, %v4258_v24, 920167782  ;;  %v4303_v23 = vmin.u32 %v950_v60, %v4230_v19  ;;  %v589_v35 = vshll.u32 %v6446_v26, %v4179_v3 }
  0xec   : > { %v1128_v11 = vsel %vm1124_vm2, %v1108_v1, %v1111_v27  ;;  %v1130_v63 = vsel %vm1126_vm3, %v1114_v51, %v1129_v54  ;;  %v4311_v0 = vshll.u32 %v1204_v12, 8  ;;  %v590_v4 = vshrl.u32 %v6464_v36, %v4209_v20 }
  0xed   : > { %v4316_v45 = vsub.s32 %v4199_v43, %v1051_v44  ;;  %v1214_v60 = vshrl.u32 %v6464_v36, %v1211_v59  ;;  %v592_v42 = vshll.u32 %v6464_v36, %v4179_v3  ;;  %v593_v26 = vshrl.u32 %v6470_v39, %v4209_v20 }
  0xee   : > { %v6529_v27 = vmov 683565275   ;;  %v1216_v51 = vshll.u32 %v6464_v36, %v1210_v16  ;;  %v1217_v12 = vshrl.u32 %v6470_v39, %v1211_v59  ;;  %v6530_v54 = vmov 2102212464  }
  0xef   : > { %v1213_v1 = vshll.u32 %v6529_v27, %v1210_v16  ;;  %v1220_v7 = vshrl.u32 %v6530_v54, %v1211_v59  ;;  %v1131_v43 = vsel %vm1125_vm4, %v1128_v11, %v1130_v63  ;;  %v1150_v44 = vadd.s32 1, %v4269_v53 }
  0xf0   : > { %v1209_v32 = vshrl.u32 %v1208_v5, 5  ;;  %v1219_v13 = vshll.u32 %v6470_v39, %v1210_v16  ;;  %v1218_v46 = vor.u32 %v1217_v12, %v1216_v51  ;;  %v1222_v10 = vshll.u32 %v6530_v54, %v1210_v16 }
  0xf1   : > { %v1215_v18 = vor.u32 %v1214_v60, %v1213_v1  ;;  %v6531_v34 = vmov 920167782   ;;  %vm1149_vm7 = vc.u32 %v4287_v49, %v4268_v15  ;;  %v1226_v38 = vshrl.u32 %v6532_v9, %v1211_v59 }
  0xf2   : > { %v1223_v41 = vshrl.u32 %v6531_v34, %v1211_v59  ;;  %v1221_v36 = vor.u32 %v1220_v7, %v1219_v13  ;;  %v1225_v55 = vshll.u32 %v6531_v34, %v1210_v16  ;;  %v1054_v11 = vsub.s32 0, %v4316_v45 }
  0xf3   : > { %v1147_v5 = vmul.u32 %v4256_v48, %v1131_v43  ;;  %v591_v39 = vor.u32 %v590_v4, %v589_v35  ;;  %vm1228_vm8 = vcmp.lt.s32.totalorder %v1209_v32, 1  ;;  %vm1231_vm9 = vcmp.lt.s32.totalorder %v1209_v32, 4 }
  0xf4   : > { %v1224_v63 = vor.u32 %v1223_v41, %v1222_v10  ;;  %v1227_v60 = vor.u32 %v1226_v38, %v1225_v55  ;;  %v596_v1 = vshrl.u32 %v6530_v54, %v4209_v20  ;;  %v1151_v51 = vsel %vm1149_vm7, %v1150_v44, %v4269_v53 }
  0xf5   : > { %vm1230_vm10 = vcmp.lt.s32.totalorder %v1209_v32, 3  ;;  %v1236_v13 = vsel %vm1228_vm8, %v1215_v18, %v1218_v46  ;;  %vm1229_vm11 = vcmp.lt.s32.totalorder %v1209_v32, 2  ;;  %v1233_v16 = vsel %vm1231_vm9, %v1221_v36, 2102212464 }
  0xf6   : > { %v1237_v7 = vsel %vm1231_vm9, %v1224_v63, 920167782  ;;  %v1240_v15 = vsel %vm1228_vm8, %v1218_v46, %v1221_v36  ;;  %v1212_v10 = vshrl.u32 %v6529_v27, %v1211_v59  ;;  %v1241_v41 = vsel %vm1231_vm9, %v1227_v60, 1326507024 }
  0xf7   : > { %v1238_v12 = vsel %vm1230_vm10, %v1221_v36, %v1237_v7  ;;  %v6533_v48 = vmov 2131351028   ;;  %v4348_v35 = vadd.s32 %v1151_v51, %v1147_v5  ;;  %v1242_v53 = vsel %vm1230_vm10, %v1224_v63, %v1241_v41 }
  0xf8   : > { %v1239_v55 = vsel %vm1229_vm11, %v1236_v13, %v1238_v12  ;;  %v595_v4 = vshll.u32 %v6533_v48, %v4179_v3  ;;  %v1232_v38 = vsel %vm1228_vm8, %v1212_v10, %v1215_v18  ;;  %v1234_v7 = vsel %vm1230_vm10, %v1218_v46, %v1233_v16 }
  0xf9   : > { %v4351_v43 = vmul.u32.u64.low %v4311_v0, %v1239_v55  ;;  %v4352_v44 = vmul.u32.u64.high %v4311_v0, %v1239_v55, %v4351_v43  ;;  %v1243_v36 = vsel %vm1229_vm11, %v1240_v15, %v1242_v53  ;;  %v594_v59 = vor.u32 %v593_v26, %v592_v42 }
  0xfa   : > { %vm711_vm12 = vcmp.lt.s32.totalorder %v4125_v37, 4  ;;  %v3411_v60 = vmin.u32 %v1054_v11, %v4316_v45  ;;  %v4360_v3 = vmul.u32.u64.low %v4311_v0, %v1243_v36  ;;  %v4361_v5 = vmul.u32.u64.high %v4311_v0, %v1243_v36, %v4360_v3 }
  0xfb   : > { %v597_v63 = vor.u32 %v596_v1, %v595_v4  ;;  %v811_v51 = vor.u32 %v4217_v52, %v4166_v61  ;;  %v6534_v13 = vor.u32 %v4262_v22, %v4280_v25  ;;  %v580_v26 = vor.u32 8388608, %v4123_v14 }
  0xfc   : > { %vm604_vm13 = vcmp.lt.s32.totalorder %v4252_v58, 1  ;;  %v1153_v42 = vadd.s32 536870912, %v4348_v35  ;;  %v1235_v18 = vsel %vm1229_vm11, %v1232_v38, %v1234_v7  ;;  %v1254_v15 = vadd.s32 1, %v4352_v44 }
  0xfd   : > { %v617_v46 = vsel %vm607_vm6, %v6534_v13, 1326507024  ;;  %vm606_vm14 = vcmp.lt.s32.totalorder %v4252_v58, 3  ;;  %vm815_vm15 = vcmp.lt.s32.totalorder %v4127_v47, 4  ;;  %v588_v22 = vshrl.u32 %v6529_v27, %v4209_v20 }
  0xfe   : > { %v612_v61 = vsel %vm604_vm13, %v591_v39, %v594_v59  ;;  %v614_v14 = vsel %vm606_vm14, %v597_v63, %v4300_v8  ;;  %v616_v32 = vsel %vm604_vm13, %v594_v59, %v597_v63  ;;  %v952_v52 = vclz %v4303_v23 }
  0xff   : > { %v1056_v25 = vclz %v3411_v60  ;;  %vm1253_vm0 = vc.u32 %v4361_v5, %v4351_v43  ;;  %v609_v11 = vsel %vm607_vm6, %v597_v63, 2102212464  ;;  %v1251_v20 = vmul.u32 %v4311_v0, %v1235_v18 }
 0x100   : > { %v1255_v1 = vsel %vm1253_vm0, %v1254_v15, %v4352_v44  ;;  %vm605_vm1 = vcmp.lt.s32.totalorder %v4252_v58, 2  ;;  %v618_v8 = vsel %vm606_vm14, %v4258_v24, %v617_v46  ;;  %v4397_v16 = vshrl.u32 %v1153_v42, 30 }
 0x101   : > { %v615_v23 = vsel %vm605_vm1, %v612_v61, %v614_v14  ;;  %v619_v12 = vsel %vm605_vm1, %v616_v32, %v618_v8  ;;  %v620_v10 = vshll.u32 %v580_v26, 8  ;;  %v4404_v55 = vsub.s32 32, %v4249_v28 }
 0x102   : > { %v4406_v0 = vadd.s32 %v1255_v1, %v1251_v20  ;;  %v608_v41 = vsel %vm604_vm13, %v588_v22, %v591_v39  ;;  %v610_v24 = vsel %vm606_vm14, %v594_v59, %v609_v11  ;;  %v4414_v4 = vshll.u32 %v6530_v54, %v4249_v28 }
 0x103   : > { %v3408_v53 = vadd.s32 4294967294, %v952_v52  ;;  %v4416_v44 = vmul.u32.u64.low %v620_v10, %v619_v12  ;;  %v4417_v38 = vmul.u32.u64.high %v620_v10, %v619_v12, %v4416_v44  ;;  %v4422_v7 = vsel %vm711_vm12, %v4274_v2, 920167782 }
 0x104   : > { %v3412_v36 = vadd.s32 4294967294, %v1056_v25  ;;  %v4424_v60 = vmul.u32.u64.low %v620_v10, %v615_v23  ;;  %v4425_v3 = vmul.u32.u64.high %v620_v10, %v615_v23, %v4424_v60  ;;  %v1155_v39 = vshll.u32 %v4397_v16, 30 }
 0x105   : > { %v611_v59 = vsel %vm605_vm1, %v608_v41, %v610_v24  ;;  %v6535_v63 = vand.u32 2147483647, %v4003_v62  ;;  %v6536_v46 = vmov 2475754826   ;;  %v1257_v42 = vadd.s32 536870912, %v4406_v0 }
 0x106   : > { %v798_v26 = vshrl.u32 %v6536_v46, %v4154_v57  ;;  %v797_v18 = vshll.u32 %v6529_v27, %v4129_v29  ;;  %v800_v15 = vshll.u32 %v6536_v46, %v4129_v29  ;;  %v801_v22 = vshrl.u32 %v6533_v48, %v4154_v57 }
 0x107   : > { %v787_v13 = vand.u32 8388607, %v6535_v63  ;;  %v825_v58 = vsel %vm815_vm15, %v811_v51, 1326507024  ;;  %v4446_v61 = vshll.u32 %v6531_v34, %v4249_v28  ;;  %vm3409_vm2 = vcmp.lt.s32.totalorder %v3408_v53, 0 }
 0x108   : > { %vm629_vm3 = vc.u32 %v4417_v38, %v4424_v60  ;;  %vm3413_vm4 = vcmp.lt.s32.totalorder %v3412_v36, 0  ;;  %v630_v14 = vadd.s32 1, %v4425_v3  ;;  %v799_v32 = vor.u32 %v798_v26, %v797_v18 }
 0x109   : > { %v802_v52 = vor.u32 %v801_v22, %v800_v15  ;;  %v4452_v25 = vsub.s32 %v4348_v35, %v1155_v39  ;;  %v627_v11 = vmul.u32 %v620_v10, %v611_v59  ;;  %v803_v51 = vshll.u32 %v6533_v48, %v4129_v29 }
 0x10a   : > { %v804_v20 = vshrl.u32 %v6530_v54, %v4154_v57  ;;  %v821_v1 = vsel %vm815_vm15, %v4290_v33, 920167782  ;;  %v4461_v8 = vshrl.u32 %v1257_v42, 30  ;;  %v631_v23 = vsel %vm629_vm3, %v630_v14, %v4425_v3 }
 0x10b   : > { %v788_v12 = vor.u32 8388608, %v787_v13  ;;  %v632_v41 = vadd.s32 %v631_v23, %v627_v11  ;;  %vm812_vm5 = vcmp.lt.s32.totalorder %v4127_v47, 1  ;;  %vm814_vm6 = vcmp.lt.s32.totalorder %v4127_v47, 3 }
 0x10c   : > { %v805_v24 = vor.u32 %v804_v20, %v803_v51  ;;  %v955_v29 = vsel %vm3409_vm2, 0, %v3408_v53  ;;  %v4468_v35 = vsel %vm3413_vm4, 0, %v3412_v36  ;;  %v820_v10 = vsel %vm812_vm5, %v799_v32, %v802_v52 }
 0x10d   : > { %v826_v44 = vsel %vm814_vm6, %v4290_v33, %v825_v58  ;;  %v1158_v3 = vsub.s32 0, %v4452_v25  ;;  %v633_v39 = vadd.s32 536870912, %v632_v41  ;;  %v796_v59 = vshrl.u32 %v6529_v27, %v4154_v57 }
 0x10e   : > { %v822_v63 = vsel %vm814_vm6, %v805_v24, %v821_v1  ;;  %vm813_vm7 = vcmp.lt.s32.totalorder %v4127_v47, 2  ;;  %v817_v53 = vsel %vm815_vm15, %v805_v24, 2102212464  ;;  %v824_v36 = vsel %vm812_vm5, %v802_v52, %v805_v24 }
 0x10f   : > { %v828_v13 = vshll.u32 %v788_v12, 8  ;;  %v1259_v33 = vshll.u32 %v4461_v8, 30  ;;  %v4486_v26 = vshrl.u32 %v633_v39, 30  ;;  %v823_v42 = vsel %vm813_vm7, %v820_v10, %v822_v63 }
 0x110   : > { %v827_v57 = vsel %vm813_vm7, %v824_v36, %v826_v44  ;;  %v960_v18 = vsub.s32 4294967266, %v955_v29  ;;  %v1064_v15 = vsub.s32 4294967266, %v4468_v35  ;;  %v3415_v14 = vmin.u32 %v1158_v3, %v4452_v25 }
 0x111   : > { %v4493_v22 = vmul.u32.u64.low %v828_v13, %v827_v57  ;;  %v4494_v58 = vmul.u32.u64.high %v828_v13, %v827_v57, %v4493_v22  ;;  %v635_v11 = vshll.u32 %v4486_v26, 30  ;;  %v816_v51 = vsel %vm812_vm5, %v796_v59, %v799_v32 }
 0x112   : > { %v818_v20 = vsel %vm814_vm6, %v802_v52, %v817_v53  ;;  %v495_v1 = vshrl.u32 %v6531_v34, %v4404_v55  ;;  %v498_v23 = vshrl.u32 %v6532_v9, %v4404_v55  ;;  %vm503_vm8 = vcmp.lt.s32.totalorder %v4241_v50, 4 }
 0x113   : > { %v4506_v12 = vmul.u32.u64.low %v828_v13, %v823_v42  ;;  %v4507_v24 = vmul.u32.u64.high %v828_v13, %v823_v42, %v4506_v12  ;;  %v956_v10 = vsub.s32 32, %v955_v29  ;;  %v4512_v44 = vsub.s32 %v4406_v0, %v1259_v33 }
 0x114   : > { %v4514_v32 = vsub.s32 %v632_v41, %v635_v11  ;;  %v961_v3 = vadd.s32 127, %v960_v18  ;;  %v1060_v52 = vsub.s32 32, %v4468_v35  ;;  %v1065_v39 = vadd.s32 127, %v1064_v15 }
 0x115   : > { %v819_v59 = vsel %vm813_vm7, %v816_v51, %v818_v20  ;;  %v940_v63 = vadd.s32 %v4048_v21, %v4054_v31  ;;  %v1160_v53 = vclz %v3415_v14  ;;  %vm837_vm9 = vc.u32 %v4494_v58, %v4506_v12 }
 0x116   : > { %v638_v36 = vsub.s32 0, %v4514_v32  ;;  %v4525_v0 = vor.u32 %v495_v1, %v4414_v4  ;;  %v499_v41 = vor.u32 %v498_v23, %v4446_v61  ;;  %v1044_v33 = vadd.s32 %v4104_v17, %v4111_v30 }
 0x117   : > { %v838_v47 = vadd.s32 1, %v4507_v24  ;;  %v958_v42 = vshrl.u32 %v940_v63, %v956_v10  ;;  %v1262_v57 = vsub.s32 0, %v4512_v44  ;;  %v835_v31 = vmul.u32 %v828_v13, %v819_v59 }
 0x118   : > { %v3395_v21 = vmin.u32 %v638_v36, %v4514_v32  ;;  %v962_v18 = vshll.u32 %v961_v3, 23  ;;  %v1062_v15 = vshrl.u32 %v1044_v33, %v1060_v52  ;;  %v1066_v22 = vshll.u32 %v1065_v39, 23 }
 0x119   : > { %v839_v14 = vsel %vm837_vm9, %v838_v47, %v4507_v24  ;;  %v957_v4 = vshll.u32 %v4230_v19, %v955_v29  ;;  %v3416_v11 = vadd.s32 4294967294, %v1160_v53  ;;  %v6537_v17 = vor.u32 %v4176_v40, %v4151_v56 }
 0x11a   : > { %v640_v61 = vclz %v3395_v21  ;;  %v840_v51 = vadd.s32 %v839_v14, %v835_v31  ;;  %v509_v13 = vsel %vm503_vm8, %v4525_v0, 920167782  ;;  %v513_v20 = vsel %vm503_vm8, %v499_v41, 1326507024 }
 0x11b   : > { %v4540_v30 = vsel %vm711_vm12, %v6537_v17, 1326507024  ;;  %v1061_v19 = vshll.u32 %v4316_v45, %v4468_v35  ;;  %v4549_v29 = vor.u32 %v958_v42, %v957_v4  ;;  %v3419_v1 = vmin.u32 %v1262_v57, %v4512_v44 }
 0x11c   : > { %v3396_v23 = vadd.s32 4294967294, %v640_v61  ;;  %v841_v56 = vadd.s32 536870912, %v840_v51  ;;  %v4552_v40 = vor.u32 4788187, %v962_v18  ;;  %v1067_v10 = vor.u32 4788187, %v1066_v22 }
 0x11d   : > { %v1063_v24 = vor.u32 %v1062_v15, %v1061_v19  ;;  %v468_v3 = vand.u32 2147483647, %v4007_v6  ;;  %vm3417_vm10 = vcmp.lt.s32.totalorder %v3416_v11, 0  ;;  %v492_v39 = vshrl.u32 %v6530_v54, %v4404_v55 }
 0x11e   : > { %vm3397_vm11 = vcmp.lt.s32.totalorder %v3396_v23, 0  ;;  %v4555_v52 = vshrl.u32 %v841_v56, 30  ;;  %v628_v45 = vadd.s32 %v4424_v60, %v4417_v38  ;;  %v486_v59 = vshrl.u32 %v6536_v46, %v4404_v55  ;;  %v6538_v56 = vld [vmem:[#allocation7_spill] sm:$0xff] }
 0x11f   : > { %v643_v35 = vsel %vm3397_vm11, 0, %v3396_v23  ;;  %v489_v63 = vshrl.u32 %v6533_v48, %v4404_v55  ;;  %v1264_v53 = vclz %v3419_v1  ;;  %v491_v33 = vshll.u32 %v6533_v48, %v4249_v28 }
 0x120   : > { %v644_v36 = vsub.s32 32, %v643_v35  ;;  %v648_v41 = vsub.s32 4294967266, %v643_v35  ;;  %v843_v47 = vshll.u32 %v4555_v52, 30  ;;  %v475_v42 = vand.u32 8388607, %v468_v3 }
 0x121   : > { %v485_v38 = vshll.u32 %v6529_v27, %v4249_v28  ;;  %v488_v60 = vshll.u32 %v6536_v46, %v4249_v28  ;;  %v645_v57 = vshll.u32 %v4514_v32, %v643_v35  ;;  %v493_v18 = vor.u32 %v492_v39, %v491_v33 }
 0x122   : > { %v646_v21 = vshrl.u32 %v628_v45, %v644_v36  ;;  %v649_v31 = vadd.s32 127, %v648_v41  ;;  %v1070_v15 = vcvt.s32.f32 %v1063_v24  ;;  %v4575_v22 = vsub.s32 %v840_v51, %v843_v47 }
 0x123   : > { %v487_v14 = vor.u32 %v486_v59, %v485_v38  ;;  %v490_v4 = vor.u32 %v489_v63, %v488_v60  ;;  %v1068_v61 = vand.u32 2147483647, %v1067_v10  ;;  %v4578_v17 = vsel %vm3417_vm10, 0, %v3416_v11 }
 0x124   : > { %v647_v19 = vor.u32 %v646_v21, %v645_v57  ;;  %v650_v1 = vshll.u32 %v649_v31, 23  ;;  %v4580_v23 = vadd.s32 4294967294, %v1264_v53  ;;  %vm574_vm13 = vcmp.lt.s32.totalorder %v6538_v56, 0 }
 0x125   : > { %v658_v28 = vsub.s32 4, %v4486_v26  ;;  %v846_v32 = vsub.s32 0, %v4575_v22  ;;  %v484_v51 = vshrl.u32 %v6529_v27, %v4404_v55  ;;  %v6539_v24 = vand.u32 2147483647, %v6538_v56 }
 0x126   : > { %v651_v11 = vor.u32 4788187, %v650_v1  ;;  %v476_v39 = vor.u32 8388608, %v475_v42  ;;  %vm500_vm15 = vcmp.lt.s32.totalorder %v4241_v50, 1  ;;  %v505_v45 = vsel %vm503_vm8, %v493_v18, 2102212464 }
 0x127   : > { %vm4589_vm14 = vcmp.le.f32.partialorder %v6539_v24, 0.7853982  ;;  %v654_v35 = vcvt.s32.f32 %v647_v19  ;;  %v3403_v59 = vmin.u32 %v846_v32, %v4575_v22  ;;  %vm502_vm0 = vcmp.lt.s32.totalorder %v4241_v50, 3  ;;  %v6542_v19 = vld [vmem:[#allocation15_spill] sm:$0xff] }
 0x128   : > { %v508_v63 = vsel %vm500_vm15, %v487_v14, %v490_v4  ;;  %v652_v55 = vand.u32 2147483647, %v651_v11  ;;  %v510_v53 = vsel %vm502_vm0, %v493_v18, %v509_v13  ;;  %v512_v36 = vsel %vm500_vm15, %v490_v4, %v493_v18 }
 0x129   : > { %v514_v41 = vsel %vm502_vm0, %v4525_v0, %v513_v20  ;;  %v848_v33 = vclz %v3403_v59  ;;  %vm501_vm1 = vcmp.lt.s32.totalorder %v4241_v50, 2  ;;  %v504_v47 = vsel %vm500_vm15, %v484_v51, %v487_v14  ;;  %v6543_v50 = vld [vmem:[#allocation6_spill] sm:$0xff] }
 0x12a   : > { %v506_v42 = vsel %vm502_vm0, %v490_v4, %v505_v45  ;;  %v655_v38 = vmul.f32 %v654_v35, %v652_v55  ;;  %v511_v60 = vsel %vm501_vm1, %v508_v63, %v510_v53  ;;  %v515_v57 = vsel %vm501_vm1, %v512_v36, %v514_v41  ;;  %v6544_v36 = vld [vmem:[#allocation11_spill] sm:$0xff] }
 0x12b   : > { %v516_v21 = vshll.u32 %v476_v39, 8  ;;  %v4600_v31 = vmul.f32 %v1070_v15, %v1068_v61  ;;  %v4604_v1 = vadd.s32 %v6542_v19, %v4287_v49  ;;  %v1164_v13 = vsub.s32 32, %v4578_v17 }
 0x12c   : > { %v3404_v18 = vadd.s32 4294967294, %v848_v33  ;;  %v656_v32 = vxor.u32 2147483648, %v655_v38  ;;  %v676_v14 = vand.u32 2147483647, %v6543_v50  ;;  %v507_v4 = vsel %vm501_vm1, %v504_v47, %v506_v42 }
 0x12d   : > { %v4607_v0 = vmul.u32.u64.low %v516_v21, %v515_v57  ;;  %v4608_v20 = vmul.u32.u64.high %v516_v21, %v515_v57, %v4607_v0  ;;  %v4611_v51 = vmul.u32.u64.low %v516_v21, %v511_v60  ;;  %v4612_v24 = vmul.u32.u64.high %v516_v21, %v511_v60, %v4611_v51 }
 0x12e   : > { %vm3405_vm2 = vcmp.lt.s32.totalorder %v3404_v18, 0  ;;  %vm3421_vm3 = vcmp.lt.s32.totalorder %v4580_v23, 0  ;;  %v657_v49 = vsel %vm574_vm13, %v656_v32, %v655_v38  ;;  %v4621_v15 = vsel %vm574_vm13, %v658_v28, %v4486_v26 }
 0x12f   : > { %v851_v61 = vsel %vm3405_vm2, 0, %v3404_v18  ;;  %v660_v11 = vsel %vm4589_vm14, %v6538_v56, %v657_v49  ;;  %v836_v39 = vadd.s32 %v4506_v12, %v4494_v58  ;;  %v523_v63 = vmul.u32 %v516_v21, %v507_v4  ;;  %v6545_v58 = vld [vmem:[#allocation12_spill] sm:$0xff] }
 0x130   : > { %v852_v45 = vsub.s32 32, %v851_v61  ;;  %v856_v35 = vsub.s32 4294967266, %v851_v61  ;;  %v853_v59 = vshll.u32 %v4575_v22, %v851_v61  ;;  %vm525_vm4 = vc.u32 %v4608_v20, %v4611_v51 }
 0x131   : > { %v683_v26 = vand.u32 8388607, %v676_v14  ;;  %3675 = vcosq.f32 %v660_v11  ;;  %v526_v53 = vadd.s32 1, %v4612_v24  ;;  %v693_v41 = vshll.u32 %v6529_v27, %v6544_v36 }
 0x132   : > { %v854_v28 = vshrl.u32 %v836_v39, %v852_v45  ;;  %v857_v55 = vadd.s32 127, %v856_v35  ;;  %v694_v12 = vshrl.u32 %v6536_v46, %v6545_v58  ;;  %v696_v22 = vshll.u32 %v6536_v46, %v6544_v36 }
 0x133   : > { %v697_v33 = vshrl.u32 %v6533_v48, %v6545_v58  ;;  %v527_v38 = vsel %vm525_vm4, %v526_v53, %v4612_v24  ;;  %v699_v60 = vshll.u32 %v6533_v48, %v6544_v36  ;;  %vm782_vm5 = vcmp.lt.s32.totalorder %v4003_v62, 0 }
 0x134   : > { %v855_v47 = vor.u32 %v854_v28, %v853_v59  ;;  %v858_v42 = vshll.u32 %v857_v55, 23  ;;  %v528_v57 = vadd.s32 %v527_v38, %v523_v63  ;;  %v695_v21 = vor.u32 %v694_v12, %v693_v41 }
 0x135   : > { %v698_v19 = vor.u32 %v697_v33, %v696_v22  ;;  %v700_v18 = vshrl.u32 %v6530_v54, %v6545_v58  ;;  %v4651_v32 = vsel %vm3421_vm3, 0, %v4580_v23  ;;  %3677 = vsinq.f32 %v660_v11 }
 0x136   : > { %v6546_v0 = vand.u32 2147483647, %v4003_v62  ;;  %v859_v24 = vor.u32 4788187, %v858_v42  ;;  %v684_v49 = vor.u32 8388608, %v683_v26  ;;  %v866_v61 = vsub.s32 4, %v4555_v52 }
 0x137   : > { %v529_v39 = vadd.s32 536870912, %v528_v57  ;;  %v701_v45 = vor.u32 %v700_v18, %v699_v60  ;;  %vm710_vm7 = vcmp.lt.s32.totalorder %v4125_v37, 3  ;;  %v862_v59 = vcvt.s32.f32 %v855_v47 }
 0x138   : > { %vm4655_vm6 = vcmp.le.f32.partialorder %v6546_v0, 0.7853982  ;;  %v860_v35 = vand.u32 2147483647, %v859_v24  ;;  %vm708_vm8 = vcmp.lt.s32.totalorder %v4125_v37, 1  ;;  %v722_v23 = vsel %vm710_vm7, %v4274_v2, %v4540_v30 }
 0x139   : > { %v4666_v11 = vshrl.u32 %v529_v39, 30  ;;  %vm709_vm9 = vcmp.lt.s32.totalorder %v4125_v37, 2  ;;  %v716_v63 = vsel %vm708_vm8, %v695_v21, %v698_v19  ;;  %v720_v26 = vsel %vm708_vm8, %v698_v19, %v701_v45 }
 0x13a   : > { %v863_v28 = vmul.f32 %v862_v59, %v860_v35  ;;  %v718_v55 = vsel %vm710_vm7, %v701_v45, %v4422_v7  ;;  %v723_v53 = vsel %vm709_vm9, %v720_v26, %v722_v23  ;;  %v724_v36 = vshll.u32 %v684_v49, 8 }
 0x13b   : > { %v1252_v2 = vadd.s32 %v4351_v43, %v4361_v5  ;;  %v1272_v30 = vsub.s32 4294967266, %v4651_v32  ;;  %v661_v41 = vsel %vm4589_vm14, 0, %v4621_v15  ;;  %v531_v12 = vshll.u32 %v4666_v11, 30  ;;  %v3676_v22 = vpop.eup %3675 }
 0x13c   : > { %v864_v33 = vxor.u32 2147483648, %v863_v28  ;;  %v713_v7 = vsel %vm711_vm12, %v701_v45, 2102212464  ;;  %v4687_v47 = vmul.u32.u64.low %v724_v36, %v723_v53  ;;  %v4688_v42 = vmul.u32.u64.high %v724_v36, %v723_v53, %v4687_v47 }
 0x13d   : > { %v1168_v38 = vsub.s32 4294967266, %v4578_v17  ;;  %v4691_v60 = vsub.s32 %v528_v57, %v531_v12  ;;  %v692_v43 = vshrl.u32 %v6529_v27, %v6545_v58  ;;  %v719_v5 = vsel %vm709_vm9, %v716_v63, %v718_v55 }
 0x13e   : > { %v1166_v10 = vshrl.u32 %v4604_v1, %v1164_v13  ;;  %v665_v15 = vadd.s32 3, %v661_v41  ;;  %v865_v18 = vsel %vm782_vm5, %v864_v33, %v863_v28  ;;  %v867_v0 = vsel %vm782_vm5, %v866_v61, %v4555_v52 }
 0x13f   : > { %v868_v57 = vsel %vm4655_vm6, %v4003_v62, %v865_v18  ;;  %v534_v58 = vsub.s32 0, %v4691_v60  ;;  %v712_v24 = vsel %vm708_vm8, %v692_v43, %v695_v21  ;;  %v714_v1 = vsel %vm710_vm7, %v698_v19, %v713_v7  ;;  %v3678_v13 = vpop.eup %3677 }
 0x140   : > { %v1273_v49 = vadd.s32 127, %v1272_v30  ;;  %3679 = vcosq.f32 %v868_v57  ;;  %v4713_v39 = vmul.u32.u64.low %v724_v36, %v719_v5  ;;  %v4714_v45 = vmul.u32.u64.high %v724_v36, %v719_v5, %v4713_v39 }
 0x141   : > { %v1169_v52 = vadd.s32 127, %v1168_v38  ;;  %v869_v61 = vsel %vm4655_vm6, 0, %v867_v0  ;;  %3681 = vsinq.f32 %v868_v57  ;;  %v3391_v35 = vmin.u32 %v534_v58, %v4691_v60 }
 0x142   : > { %v1165_v21 = vshll.u32 %v4452_v25, %v4578_v17  ;;  %v1268_v59 = vsub.s32 32, %v4651_v32  ;;  %v666_v19 = vand.u32 3, %v665_v15  ;;  %v715_v23 = vsel %vm709_vm9, %v712_v24, %v714_v1 }
 0x143   : > { %v669_v63 = vxor.u32 2147483648, %v3678_v13  ;;  %v672_v26 = vxor.u32 2147483648, %v3676_v22  ;;  %v536_v28 = vclz %v3391_v35  ;;  %vm733_vm12 = vc.u32 %v4688_v42, %v4713_v39 }
 0x144   : > { %v4727_v4 = vor.u32 %v1166_v10, %v1165_v21  ;;  %v1274_v55 = vshll.u32 %v1273_v49, 23  ;;  %v873_v53 = vadd.s32 3, %v869_v61  ;;  %v734_v30 = vadd.s32 1, %v4714_v45 }
 0x145   : > { %v1170_v41 = vshll.u32 %v1169_v52, 23  ;;  %v1269_v25 = vshll.u32 %v4512_v44, %v4651_v32  ;;  %vm664_vm10 = vweird.f32 %v6538_v56  ;;  %v3392_v37 = vadd.s32 4294967294, %v536_v28 }
 0x146   : > { %v731_v17 = vmul.u32 %v724_v36, %v715_v23  ;;  %v1270_v12 = vshrl.u32 %v1252_v2, %v1268_v59  ;;  %vm668_vm11 = vcmp.eq.s32.totalorder %v666_v19, 0  ;;  %vm671_vm13 = vcmp.eq.s32.totalorder %v666_v19, 2 }
 0x147   : > { %v735_v33 = vsel %vm733_vm12, %v734_v30, %v4714_v45  ;;  %v670_v7 = vsel %vm668_vm11, %v3676_v22, %v669_v63  ;;  %v673_v47 = vsel %vm671_vm13, %v672_v26, %v3678_v13  ;;  %vm872_vm14 = vweird.f32 %v4003_v62 }
 0x148   : > { %vm3393_vm15 = vcmp.lt.s32.totalorder %v3392_v37, 0  ;;  %v736_v38 = vadd.s32 %v735_v33, %v731_v17  ;;  %v1275_v43 = vor.u32 4788187, %v1274_v55  ;;  %vm667_vm0 = vcmp.lt.s32.totalorder %v666_v19, 2  ;;  %v6549_v33 = vld [vmem:[#allocation8_spill] sm:$0xff] }
 0x149   : > { %v874_v5 = vand.u32 3, %v873_v53  ;;  %v539_v10 = vsel %vm3393_vm15, 0, %v3392_v37  ;;  %v524_v44 = vadd.s32 %v4611_v51, %v4608_v20  ;;  %v1171_v18 = vor.u32 4788187, %v1170_v41 }
 0x14a   : > { %v540_v32 = vsub.s32 32, %v539_v10  ;;  %v544_v36 = vsub.s32 4294967266, %v539_v10  ;;  %v737_v2 = vadd.s32 536870912, %v736_v38  ;;  %v3680_v15 = vpop.eup %3679  ;;  %v1271_v0 = vor.u32 %v1270_v12, %v1269_v25 }
 0x14b   : > { %v674_v57 = vsel %vm667_vm0, %v670_v7, %v673_v47  ;;  %v541_v22 = vshll.u32 %v4691_v60, %v539_v10  ;;  %v3682_v58 = vpop.eup %3681  ;;  %v880_v24 = vxor.u32 2147483648, %v3680_v15  ;;  %v1276_v45 = vand.u32 2147483647, %v1275_v43 }
 0x14c   : > { %v542_v1 = vshrl.u32 %v524_v44, %v540_v32  ;;  %v545_v13 = vadd.s32 127, %v544_v36  ;;  %v4738_v49 = vshrl.u32 %v737_v2, 30  ;;  %vm876_vm1 = vcmp.eq.s32.totalorder %v874_v5, 0  ;;  %v6554_v2 = vld [vmem:[#allocation9_spill] sm:$0xff] }
 0x14d   : > { %v877_v52 = vxor.u32 2147483648, %v3682_v58  ;;  %vm879_vm2 = vcmp.eq.s32.totalorder %v874_v5, 2  ;;  %v1278_v21 = vcvt.s32.f32 %v1271_v0  ;;  %v675_v59 = vsel %vm664_vm10, nan, %v674_v57  ;;  %v6558_v0 = vld [vmem:[#allocation10_spill] sm:$0xff] }
 0x14e   : > { %v881_v20 = vsel %vm879_vm2, %v880_v24, %v3682_v58  ;;  %v543_v51 = vor.u32 %v542_v1, %v541_v22  ;;  %v546_v61 = vshll.u32 %v545_v13, 23  ;;  %v739_v35 = vshll.u32 %v4738_v49, 30 }
 0x14f   : > { %vm875_vm3 = vcmp.lt.s32.totalorder %v874_v5, 2  ;;  %v878_v60 = vsel %vm876_vm1, %v3680_v15, %v877_v52  ;;  %v964_v19 = vand.u32 2147483647, %v4552_v40  ;;  %v1072_v28 = vxor.u32 2147483648, %v4600_v31 }
 0x150   : > { %v882_v23 = vsel %vm875_vm3, %v878_v60, %v881_v20  ;;  %v547_v63 = vor.u32 4788187, %v546_v61  ;;  %v740_v26 = vsub.s32 %v736_v38, %v739_v35  ;;  %v1172_v55 = vand.u32 2147483647, %v1171_v18 }
 0x151   : > { %v1279_v53 = vmul.f32 %v1278_v21, %v1276_v45  ;;  %v883_v30 = vsel %vm872_vm14, nan, %v882_v23  ;;  %v550_v37 = vcvt.s32.f32 %v543_v51  ;;  %v1174_v56 = vcvt.s32.f32 %v4727_v4  ;;  %v6564_v23 = vld [vmem:[#allocation14_spill] sm:$0xff] }
 0x152   : > { %v3501_v41 = vpack.c.bf16 %v883_v30, %v675_v59  ;;  %v548_v25 = vand.u32 2147483647, %v547_v63  ;;  %v742_v17 = vsub.s32 0, %v740_v26  ;;  %v966_v12 = vcvt.s32.f32 %v4549_v29  ;;  %v6553_v29 = vld [vmem:[#allocation5_spill] sm:$0xff] }
 0x153   : > { %vm990_vm4 = vcmp.lt.s32.totalorder %v6549_v33, 0  ;;  %v1175_v38 = vmul.f32 %v1174_v56, %v1172_v55  ;;  %v1280_v43 = vxor.u32 2147483648, %v1279_v53  ;;  %v6550_v10 = vand.u32 2147483647, %v6549_v33 }
 0x154   : > { %3502 = vmatprep.subr.bf16.mxu0 %v3501_v41  ;;  %v551_v40 = vmul.f32 %v550_v37, %v548_v25  ;;  %v3399_v7 = vmin.u32 %v742_v17, %v740_v26  ;;  %v1073_v47 = vsel %vm990_vm4, %v1072_v28, %v4600_v31  ;;  %v967_v62 = vmul.f32 %v966_v12, %v964_v19 }
 0x155   : > { %vm4755_vm5 = vcmp.le.f32.partialorder %v6550_v10, 0.7853982  ;;  %vm886_vm6 = vcmp.lt.s32.totalorder %v6553_v29, 0  ;;  %v6555_v31 = vand.u32 2147483647, %v6554_v2  ;;  %vm1094_vm8 = vcmp.lt.s32.totalorder %v6554_v2, 0 }
 0x156   : > { %v744_v5 = vclz %v3399_v7  ;;  %v1076_v4 = vsel %vm4755_vm5, %v6549_v33, %v1073_v47  ;;  %v552_v32 = vxor.u32 2147483648, %v551_v40  ;;  %v1176_v18 = vxor.u32 2147483648, %v1175_v38 }
 0x157   : > { %vm4765_vm7 = vcmp.le.f32.partialorder %v6555_v31, 0.7853982  ;;  %vm1198_vm9 = vcmp.lt.s32.totalorder %v6558_v0, 0  ;;  %v968_v57 = vxor.u32 2147483648, %v967_v62  ;;  %v6559_v22 = vand.u32 2147483647, %v6558_v0 }
 0x158   : > { %v3400_v36 = vadd.s32 4294967294, %v744_v5  ;;  %v1281_v24 = vsel %vm1198_vm9, %v1280_v43, %v1279_v53  ;;  %3683 = vcosq.f32 %v1076_v4  ;;  %vm470_vm11 = vcmp.lt.s32.totalorder %v4007_v6, 0  ;;  %v6568_v5 = vld [vmem:[#allocation13_spill] sm:$0xff] }
 0x159   : > { %vm4773_vm12 = vcmp.le.f32.partialorder %v6559_v22, 0.7853982  ;;  %v554_v1 = vsub.s32 4, %v4666_v11  ;;  %v553_v45 = vsel %vm470_vm11, %v552_v32, %v551_v40  ;;  %v732_v52 = vadd.s32 %v4713_v39, %v4688_v42 }
 0x15a   : > { %vm3401_vm10 = vcmp.lt.s32.totalorder %v3400_v36, 0  ;;  %v1177_v61 = vsel %vm1094_vm8, %v1176_v18, %v1175_v38  ;;  %v1284_v35 = vsel %vm4773_vm12, %v6558_v0, %v1281_v24  ;;  %vm4792_vm13 = vcmp.le.f32.partialorder %v468_v3, 0.7853982 }
 0x15b   : > { %v747_v13 = vsel %vm3401_vm10, 0, %v3400_v36  ;;  %v1074_v42 = vsub.s32 4, %v6564_v23  ;;  %v6473_v39 = vmov 0.0   ;;  %v969_v63 = vsel %vm886_vm6, %v968_v57, %v967_v62 }
 0x15c   : > { %v748_v20 = vsub.s32 32, %v747_v13  ;;  %v752_v51 = vsub.s32 4294967266, %v747_v13  ;;  %v749_v59 = vshll.u32 %v740_v26, %v747_v13  ;;  %1405 = vmatprep.mubr.f32.mxu0 %v6473_v39  ;;  %2366 = vmatprep.mubr.f32.mxu1 %v6473_v39  ;;  %3685 = vsinq.f32 %v1076_v4 }
 0x15d   : > { %v556_v3 = vsel %vm4792_vm13, %v4007_v6, %v553_v45  ;;  %v1282_v28 = vsub.s32 4, %v4461_v8  ;;  %3687 = vcosq.f32 %v1284_v35  ;;  %v555_v26 = vsel %vm470_vm11, %v554_v1, %v4666_v11 }
 0x15e   : > { %v750_v60 = vshrl.u32 %v732_v52, %v748_v20  ;;  %v753_v19 = vadd.s32 127, %v752_v51  ;;  %v6565_v30 = vand.u32 2147483647, %v6553_v29  ;;  %v1180_v25 = vsel %vm4765_vm7, %v6554_v2, %v1177_v61 }
 0x15f   : > { %3689 = vsinq.f32 %v1284_v35  ;;  %v1075_v11 = vsel %vm990_vm4, %v1074_v42, %v6564_v23  ;;  %v557_v56 = vsel %vm4792_vm13, 0, %v555_v26  ;;  %v1283_v12 = vsel %vm1198_vm9, %v1282_v28, %v4461_v8 }
 0x160   : > { %v751_v55 = vor.u32 %v750_v60, %v749_v59  ;;  %v754_v53 = vshll.u32 %v753_v19, 23  ;;  %vm4810_vm14 = vcmp.le.f32.partialorder %v6565_v30, 0.7853982  ;;  %3691 = vcosq.f32 %v556_v3 }
 0x161   : > { %v972_v37 = vsel %vm4810_vm14, %v6553_v29, %v969_v63  ;;  %3693 = vsinq.f32 %v556_v3  ;;  %v1178_v40 = vsub.s32 4, %v4397_v16  ;;  %v762_v38 = vsub.s32 4, %v4738_v49 }
 0x162   : > { %v755_v17 = vor.u32 4788187, %v754_v53  ;;  %3695 = vcosq.f32 %v1180_v25  ;;  %v758_v47 = vcvt.s32.f32 %v751_v55  ;;  %v3684_v62 = vpop.eup %3683  ;;  %v1077_v43 = vsel %vm4755_vm5, 0, %v1075_v11 }
 0x163   : > { %3697 = vsinq.f32 %v1180_v25  ;;  %v970_v10 = vsub.s32 4, %v6568_v5  ;;  %v561_v4 = vadd.s32 3, %v557_v56  ;;  %v1285_v8 = vsel %vm4773_vm12, 0, %v1283_v12 }
 0x164   : > { %v756_v7 = vand.u32 2147483647, %v755_v17  ;;  %3699 = vcosq.f32 %v972_v37  ;;  %vm678_vm15 = vcmp.lt.s32.totalorder %v6543_v50, 0  ;;  %v1179_v36 = vsel %vm1094_vm8, %v1178_v40, %v4397_v16 }
 0x165   : > { %3701 = vsinq.f32 %v972_v37  ;;  %v763_v18 = vsel %vm678_vm15, %v762_v38, %v4738_v49  ;;  %v1081_v44 = vadd.s32 3, %v1077_v43  ;;  %v1289_v22 = vadd.s32 3, %v1285_v8 }
 0x166   : > { %v759_v32 = vmul.f32 %v758_v47, %v756_v7  ;;  %v3686_v57 = vpop.eup %3685  ;;  %v971_v24 = vsel %vm886_vm6, %v970_v10, %v6568_v5  ;;  %v4843_v58 = vand.u32 3, %v561_v4  ;;  %vm4847_vm0 = vcmp.le.f32.partialorder %v676_v14, 0.7853982 }
 0x167   : > { %v3688_v1 = vpop.eup %3687  ;;  %v1181_v49 = vsel %vm4765_vm7, 0, %v1179_v36  ;;  %v765_v20 = vsel %vm4847_vm0, 0, %v763_v18  ;;  %v1082_v61 = vand.u32 3, %v1081_v44  ;;  %v1085_v35 = vxor.u32 2147483648, %v3686_v57 }
 0x168   : > { %v760_v31 = vxor.u32 2147483648, %v759_v32  ;;  %v973_v14 = vsel %vm4810_vm14, 0, %v971_v24  ;;  %v1088_v59 = vxor.u32 2147483648, %v3684_v62  ;;  %v1290_v15 = vand.u32 3, %v1289_v22 }
 0x169   : > { %v3690_v45 = vpop.eup %3689  ;;  %v1185_v60 = vadd.s32 3, %v1181_v49  ;;  %vm563_vm1 = vcmp.lt.s32.totalorder %v4843_v58, 2  ;;  %vm564_vm2 = vcmp.eq.s32.totalorder %v4843_v58, 0  ;;  %v769_v23 = vadd.s32 3, %v765_v20 }
 0x16a   : > { %v761_v16 = vsel %vm678_vm15, %v760_v31, %v759_v32  ;;  %v3692_v51 = vpop.eup %3691  ;;  %vm567_vm3 = vcmp.eq.s32.totalorder %v4843_v58, 2  ;;  %v1293_v63 = vxor.u32 2147483648, %v3690_v45  ;;  %v1296_v3 = vxor.u32 2147483648, %v3688_v1 }
 0x16b   : > { %v764_v52 = vsel %vm4847_vm0, %v6543_v50, %v761_v16  ;;  %v3694_v21 = vpop.eup %3693  ;;  %v977_v28 = vadd.s32 3, %v973_v14  ;;  %v568_v53 = vxor.u32 2147483648, %v3692_v51  ;;  %vm1084_vm4 = vcmp.eq.s32.totalorder %v1082_v61, 0  ;;  %v1311_v14 = vpop.permute.xlu0 %1310 }
 0x16c   : > { %3703 = vcosq.f32 %v764_v52  ;;  %v3696_v19 = vpop.eup %3695  ;;  %v565_v55 = vxor.u32 2147483648, %v3694_v21  ;;  %vm1087_vm5 = vcmp.eq.s32.totalorder %v1082_v61, 2  ;;  %vm1288_vm6 = vweird.f32 %v6558_v0 }
 0x16d   : > { %3705 = vsinq.f32 %v764_v52  ;;  %v3698_v42 = vpop.eup %3697  ;;  %vm560_vm7 = vweird.f32 %v4007_v6  ;;  %v1086_v41 = vsel %vm1084_vm4, %v3684_v62, %v1085_v35  ;;  %v1089_v25 = vsel %vm1087_vm5, %v1088_v59, %v3686_v57 }
 0x16e   : > { %v3700_v26 = vpop.eup %3699  ;;  %vm1292_vm8 = vcmp.eq.s32.totalorder %v1290_v15, 0  ;;  %v1186_v37 = vand.u32 3, %v1185_v60  ;;  %v770_v17 = vand.u32 3, %v769_v23  ;;  %vm1080_vm9 = vweird.f32 %v6549_v33  ;;  %v1300_v33 = vld [vmem:[%s6428_s3] sm:$0xff] }
 0x16f   : > { %v3702_v30 = vpop.eup %3701  ;;  %vm1295_vm12 = vcmp.eq.s32.totalorder %v1290_v15, 2  ;;  %v1189_v11 = vxor.u32 2147483648, %v3698_v42  ;;  %v1192_v56 = vxor.u32 2147483648, %v3696_v19  ;;  %vm768_vm10 = vweird.f32 %v6543_v50  ;;  %v1301_v50 = vld [vmem:[%s6428_s3 + $0x8] sm:$0xff] }
 0x170   : > { %vm1083_vm11 = vcmp.lt.s32.totalorder %v1082_v61, 2  ;;  %v1294_v12 = vsel %vm1292_vm8, %v3688_v1, %v1293_v63  ;;  %v1297_v40 = vsel %vm1295_vm12, %v1296_v3, %v3690_v45  ;;  %v978_v7 = vand.u32 3, %v977_v28 }
 0x171   : > { %v566_v47 = vsel %vm564_vm2, %v3692_v51, %v565_v55  ;;  %v569_v38 = vsel %vm567_vm3, %v568_v53, %v3694_v21  ;;  %v981_v62 = vxor.u32 2147483648, %v3702_v30  ;;  %v984_v43 = vxor.u32 2147483648, %v3700_v26 }
 0x172   : > { %v1090_v5 = vsel %vm1083_vm11, %v1086_v41, %v1089_v25  ;;  %vm1291_vm13 = vcmp.lt.s32.totalorder %v1290_v15, 2  ;;  %vm1188_vm14 = vcmp.eq.s32.totalorder %v1186_v37, 0  ;;  %vm1191_vm15 = vcmp.eq.s32.totalorder %v1186_v37, 2 }
 0x173   : > { %vm775_vm0 = vcmp.eq.s32.totalorder %v770_v17, 2  ;;  %v1298_v4 = vsel %vm1291_vm13, %v1294_v12, %v1297_v40  ;;  %v1190_v32 = vsel %vm1188_vm14, %v3696_v19, %v1189_v11  ;;  %v1193_v8 = vsel %vm1191_vm15, %v1192_v56, %v3698_v42  ;;  %v1316_v19 = vpop.permute.xlu1 %1315 }
 0x174   : > { %v570_v31 = vsel %vm563_vm1, %v566_v47, %v569_v38  ;;  %vm980_vm2 = vcmp.eq.s32.totalorder %v978_v7, 0  ;;  %vm983_vm4 = vcmp.eq.s32.totalorder %v978_v7, 2  ;;  %vm1187_vm3 = vcmp.lt.s32.totalorder %v1186_v37, 2 }
 0x175   : > { %v982_v57 = vsel %vm980_vm2, %v3700_v26, %v981_v62  ;;  %v985_v22 = vsel %vm983_vm4, %v984_v43, %v3702_v30  ;;  %vm772_vm5 = vcmp.eq.s32.totalorder %v770_v17, 0  ;;  %v1299_v1 = vsel %vm1288_vm6, nan, %v1298_v4 }
 0x176   : > { %v3704_v10 = vpop.eup %3703  ;;  %v1194_v13 = vsel %vm1187_vm3, %v1190_v32, %v1193_v8  ;;  %v571_v16 = vsel %vm560_vm7, nan, %v570_v31  ;;  %vm771_vm8 = vcmp.lt.s32.totalorder %v770_v17, 2  ;;  %vm979_vm12 = vcmp.lt.s32.totalorder %v978_v7, 2 }
 0x177   : > { %v3706_v36 = vpop.eup %3705  ;;  %v776_v18 = vxor.u32 2147483648, %v3704_v10  ;;  %v1091_v45 = vsel %vm1080_vm9, nan, %v1090_v5  ;;  %v986_v52 = vsel %vm979_vm12, %v982_v57, %v985_v22  ;;  %vm1184_vm1 = vweird.f32 %v6554_v2  ;;  %v1303_v2 = vld [vmem:[%s6428_s3 + $0x18] sm:$0xff] }
 0x178   : > { %v773_v44 = vxor.u32 2147483648, %v3706_v36  ;;  %v3505_v51 = vpack.c.bf16 %v1299_v1, %v1091_v45  ;;  %v1195_v0 = vsel %vm1184_vm1, nan, %v1194_v13  ;;  %vm976_vm6 = vweird.f32 %v6553_v29  ;;  %v1302_v29 = vld [vmem:[%s6428_s3 + $0x10] sm:$0xff] }
 0x179   : > { %v777_v24 = vsel %vm775_vm0, %v776_v18, %v3706_v36  ;;  %v987_v6 = vsel %vm976_vm6, nan, %v986_v52  ;;  %vm6511_vm7 = vcmask 261120  }
 0x17a   : > { %v774_v49 = vsel %vm772_vm5, %v3704_v10, %v773_v44  ;;  %v3507_v35 = vpack.c.bf16 %v1195_v0, %v987_v6 }
 0x17b   : > { %v778_v58 = vsel %vm771_vm8, %v774_v49, %v777_v24 }
 0x17c   : > { %v779_v20 = vsel %vm768_vm10, nan, %v778_v58 }
 0x17d   : > { %v3503_v61 = vpack.c.bf16 %v779_v20, %v571_v16 }
 0x17f   : > { %3504 = vmatpush1.bf16.msra.mxu0 %v3503_v61 }
 0x180   : > { %3506 = vmatprep.subr.bf16.mxu0 %v3505_v51 }
 0x183   : > { %3508 = vmatpush1.bf16.msra.mxu0 %v3507_v35 }
 0x186   : > { %3422 = vmatmul.mubr.msk.f32.vlgmr.msra.gmra.mrb[0].mxu0 %vm6511_vm7, %v1300_v33 }
 0x187   : > { %1411 = vmatprep.mubr.f32.mxu0 %v6473_v39 }
 0x18a   : > { %3423 = vmatmul.mubr.msk.f32.gmra.mrb[2].mxu0 %vm6511_vm7, %v1301_v50 }
 0x18b   : > { %1417 = vmatprep.mubr.f32.mxu0 %v6473_v39 }
 0x18e   : > { %3424 = vmatmul.mubr.msk.f32.gmra.mrb[4].mxu0 %vm6511_vm7, %v1302_v29 }
 0x18f   : > { %1423 = vmatprep.mubr.f32.mxu0 %v6473_v39 }
 0x192   : > { %3425 = vmatmul.mubr.msk.f32.gmra.mrb[6].mxu0 %vm6511_vm7, %v1303_v2 }
 0x193   : > { %3297 = vmatprep.mubr.f32.mxu0 %v6473_v39 }
 0x259   : > { %v1407_v21 = vpop.f32.mrb[0].mxu0 }
 0x25a   : > { %v4903_v59 = vadd.f32 %v1407_v21, %v1311_v14  ;;  %v1409_v15 = vpop.f32.mrb[1].mxu0 }
 0x25b   : > { %v4914_v25 = vadd.f32 %v1409_v15, %v1311_v14 }
 0x25c   : > { %6571 = vst [vmem:[#allocation7_spill] sm:$0xff] %v4903_v59  ;;  %v1433_v60 = vand.u32 2139095040, %v4903_v59  ;;  %v6477_v41 = vand.u32 2147483647, %v4903_v59 }
 0x25d   : > { %v1413_v23 = vpop.f32.mrb[2].mxu0  ;;  %6573 = vst [vmem:[#allocation6_spill] sm:$0xff] %v4914_v25  ;;  %v1537_v47 = vand.u32 2139095040, %v4914_v25 }
 0x25e   : > { %v1434_v42 = vshrl.u32 %v1433_v60, 23  ;;  %v4906_v63 = vadd.f32 %v1413_v23, %v1316_v19  ;;  %v1415_v3 = vpop.f32.mrb[3].mxu0  ;;  %v1437_v40 = vand.u32 8388607, %v6477_v41 }
 0x25f   : > { %v1538_v45 = vshrl.u32 %v1537_v47, 23  ;;  %v4948_v23 = vadd.f32 %v1415_v3, %v1316_v19 }
 0x260   : > { %6572 = vst [vmem:[#allocation15_spill] sm:$0xff] %v4906_v63  ;;  %v3426_v28 = vadd.s32 4294967169, %v1434_v42  ;;  %v1641_v26 = vand.u32 2139095040, %v4906_v63  ;;  %v1438_v57 = vor.u32 8388608, %v1437_v40  ;;  %v6475_v60 = vand.u32 2147483647, %v4906_v63 }
 0x261   : > { %v4909_v55 = vpop.f32.mrb[4].mxu0  ;;  %v1745_v19 = vand.u32 2139095040, %v4948_v23 }
 0x262   : > { %v1440_v53 = vadd.s32 1, %v3426_v28  ;;  %v4911_v30 = vpop.f32.mrb[5].mxu0  ;;  %v1642_v17 = vshrl.u32 %v1641_v26, 23  ;;  %v1478_v6 = vshll.u32 %v1438_v57, 8  ;;  %v1645_v40 = vand.u32 8388607, %v6475_v60 }
 0x264   : > { %vm1441_vm9 = vcmp.gt.s32.totalorder %v1440_v53, 0  ;;  %v3434_v5 = vadd.s32 4294967169, %v1642_v17  ;;  %v3430_v17 = vadd.s32 4294967169, %v1538_v45 }
 0x265   : > { %v1442_v37 = vsel %vm1441_vm9, %v1440_v53, 0  ;;  %v4916_v11 = vpop.f32.mrb[6].mxu0 }
 0x266   : > { %v1444_v56 = vand.u32 31, %v1442_v37  ;;  %v4918_v12 = vpop.f32.mrb[7].mxu0  ;;  %v1443_v38 = vshrl.u32 %v1442_v37, 5  ;;  %v1648_v51 = vadd.s32 1, %v3434_v5 }
 0x268   : > { %v1445_v7 = vsub.s32 32, %v1444_v56  ;;  %v1447_v62 = vshll.u32 %v6529_v27, %v1444_v56  ;;  %v1450_v43 = vshll.u32 %v6536_v46, %v1444_v56  ;;  %v1453_v32 = vshll.u32 %v6533_v48, %v1444_v56 }
 0x269   : > { %v1456_v36 = vshll.u32 %v6530_v54, %v1444_v56  ;;  %v1459_v18 = vshll.u32 %v6531_v34, %v1444_v56  ;;  %vm1462_vm10 = vcmp.lt.s32.totalorder %v1443_v38, 1  ;;  %vm1465_vm11 = vcmp.lt.s32.totalorder %v1443_v38, 4 }
 0x26a   : > { %v1448_v10 = vshrl.u32 %v6536_v46, %v1445_v7  ;;  %v1451_v4 = vshrl.u32 %v6533_v48, %v1445_v7  ;;  %v1454_v8 = vshrl.u32 %v6530_v54, %v1445_v7  ;;  %v1457_v31 = vshrl.u32 %v6531_v34, %v1445_v7 }
 0x26b   : > { %v1460_v44 = vshrl.u32 %v6532_v9, %v1445_v7  ;;  %vm1464_vm13 = vcmp.lt.s32.totalorder %v1443_v38, 3  ;;  %vm1463_vm14 = vcmp.lt.s32.totalorder %v1443_v38, 2  ;;  %v1446_v35 = vshrl.u32 %v6529_v27, %v1445_v7 }
 0x26c   : > { %v1449_v22 = vor.u32 %v1448_v10, %v1447_v62  ;;  %v1452_v24 = vor.u32 %v1451_v4, %v1450_v43  ;;  %v1455_v1 = vor.u32 %v1454_v8, %v1453_v32  ;;  %v1458_v13 = vor.u32 %v1457_v31, %v1456_v36 }
 0x26d   : > { %v1461_v16 = vor.u32 %v1460_v44, %v1459_v18  ;;  %vm1649_vm15 = vcmp.gt.s32.totalorder %v1648_v51, 0  ;;  %v1646_v44 = vor.u32 8388608, %v1645_v40 }
 0x26e   : > { %v1470_v49 = vsel %vm1462_vm10, %v1449_v22, %v1452_v24  ;;  %v1474_v58 = vsel %vm1462_vm10, %v1452_v24, %v1455_v1  ;;  %v1471_v52 = vsel %vm1465_vm11, %v1458_v13, 920167782  ;;  %v1467_v33 = vsel %vm1465_vm11, %v1455_v1, 2102212464 }
 0x26f   : > { %v1475_v20 = vsel %vm1465_vm11, %v1461_v16, 1326507024  ;;  %v1472_v0 = vsel %vm1464_vm13, %v1455_v1, %v1471_v52  ;;  %v1466_v42 = vsel %vm1462_vm10, %v1446_v35, %v1449_v22  ;;  %v1468_v28 = vsel %vm1464_vm13, %v1452_v24, %v1467_v33  ;;  %v1321_v24 = vpop.permute.xlu0 %1320 }
 0x270   : > { %v1476_v61 = vsel %vm1464_vm13, %v1458_v13, %v1475_v20  ;;  %v1473_v50 = vsel %vm1463_vm14, %v1470_v49, %v1472_v0  ;;  %v1650_v26 = vsel %vm1649_vm15, %v1648_v51, 0  ;;  %v1469_v56 = vsel %vm1463_vm14, %v1466_v42, %v1468_v28 }
 0x271   : > { %v1477_v29 = vsel %vm1463_vm14, %v1474_v58, %v1476_v61  ;;  %v4943_v21 = vmul.u32.u64.low %v1478_v6, %v1473_v50  ;;  %v4944_v15 = vmul.u32.u64.high %v1478_v6, %v1473_v50, %v4943_v21  ;;  %v1652_v53 = vand.u32 31, %v1650_v26 }
 0x272   : > { %v4940_v2 = vmul.u32.u64.low %v1478_v6, %v1477_v29  ;;  %v4941_v14 = vmul.u32.u64.high %v1478_v6, %v1477_v29, %v4940_v2  ;;  %v4959_v3 = vshrl.u32 %v1650_v26, 5  ;;  %v1485_v18 = vmul.u32 %v1478_v6, %v1469_v56 }
 0x273   : > { %v1488_v37 = vadd.s32 1, %v4944_v15  ;;  %v1653_v7 = vsub.s32 32, %v1652_v53  ;;  %v1655_v47 = vshll.u32 %v6529_v27, %v1652_v53  ;;  %v1658_v62 = vshll.u32 %v6536_v46, %v1652_v53 }
 0x274   : > { %vm1487_vm0 = vc.u32 %v4941_v14, %v4943_v21  ;;  %v1661_v43 = vshll.u32 %v6533_v48, %v1652_v53  ;;  %v1664_v4 = vshll.u32 %v6530_v54, %v1652_v53  ;;  %v1667_v36 = vshll.u32 %v6531_v34, %v1652_v53 }
 0x275   : > { %v1489_v5 = vsel %vm1487_vm0, %v1488_v37, %v4944_v15  ;;  %v1656_v10 = vshrl.u32 %v6536_v46, %v1653_v7  ;;  %v1659_v38 = vshrl.u32 %v6533_v48, %v1653_v7  ;;  %v1662_v32 = vshrl.u32 %v6530_v54, %v1653_v7 }
 0x276   : > { %v1665_v8 = vshrl.u32 %v6531_v34, %v1653_v7  ;;  %v1668_v31 = vshrl.u32 %v6532_v9, %v1653_v7  ;;  %vm1670_vm2 = vcmp.lt.s32.totalorder %v4959_v3, 1  ;;  %v1490_v49 = vadd.s32 %v1489_v5, %v1485_v18 }
 0x277   : > { %v1657_v57 = vor.u32 %v1656_v10, %v1655_v47  ;;  %v1660_v22 = vor.u32 %v1659_v38, %v1658_v62  ;;  %v1663_v1 = vor.u32 %v1662_v32, %v1661_v43  ;;  %vm1673_vm4 = vcmp.lt.s32.totalorder %v4959_v3, 4 }
 0x278   : > { %v1666_v13 = vor.u32 %v1665_v8, %v1664_v4  ;;  %v1669_v16 = vor.u32 %v1668_v31, %v1667_v36  ;;  %v4977_v45 = vadd.f32 %v4909_v55, %v1321_v24  ;;  %vm1672_vm3 = vcmp.lt.s32.totalorder %v4959_v3, 3 }
 0x279   : > { %v1678_v58 = vsel %vm1670_vm2, %v1657_v57, %v1660_v22  ;;  %v1682_v20 = vsel %vm1670_vm2, %v1660_v22, %v1663_v1  ;;  %v1544_v0 = vadd.s32 1, %v3430_v17  ;;  %vm1671_vm5 = vcmp.lt.s32.totalorder %v4959_v3, 2 }
 0x27a   : > { %6574 = vst [vmem:[#allocation11_spill] sm:$0xff] %v4977_v45  ;;  %v1679_v52 = vsel %vm1673_vm4, %v1666_v13, 920167782  ;;  %v1683_v51 = vsel %vm1673_vm4, %v1669_v16, 1326507024  ;;  %v1686_v33 = vshll.u32 %v1646_v44, 8  ;;  %v1654_v40 = vshrl.u32 %v6529_v27, %v1653_v7 }
 0x27b   : > { %v1680_v61 = vsel %vm1672_vm3, %v1663_v1, %v1679_v52  ;;  %v1684_v55 = vsel %vm1672_vm3, %v1666_v13, %v1683_v51  ;;  %v1491_v50 = vadd.s32 536870912, %v1490_v49  ;;  %v1746_v15 = vshrl.u32 %v1745_v19, 23 }
 0x27c   : > { %v1681_v6 = vsel %vm1671_vm5, %v1678_v58, %v1680_v61  ;;  %v1685_v35 = vsel %vm1671_vm5, %v1682_v20, %v1684_v55  ;;  %vm1545_vm8 = vcmp.gt.s32.totalorder %v1544_v0, 0  ;;  %v1849_v26 = vand.u32 2139095040, %v4977_v45 }
 0x27d   : > { %v4995_v29 = vmul.u32.u64.low %v1686_v33, %v1681_v6  ;;  %v4996_v2 = vmul.u32.u64.high %v1686_v33, %v1681_v6, %v4995_v29  ;;  %v4999_v42 = vmul.u32.u64.low %v1686_v33, %v1685_v35  ;;  %v5000_v28 = vmul.u32.u64.high %v1686_v33, %v1685_v35, %v4999_v42 }
 0x27e   : > { %v5003_v53 = vshrl.u32 %v1491_v50, 30  ;;  %v5005_v37 = vsel %vm1545_vm8, %v1544_v0, 0  ;;  %v1675_v17 = vsel %vm1673_vm4, %v1663_v1, 2102212464  ;;  %v1850_v56 = vshrl.u32 %v1849_v26, 23 }
 0x27f   : > { %v3438_v47 = vadd.s32 4294967169, %v1746_v15  ;;  %v5011_v62 = vadd.f32 %v4911_v30, %v1321_v24  ;;  %v5014_v43 = vand.u32 31, %v5005_v37  ;;  %v1674_v5 = vsel %vm1670_vm2, %v1654_v40, %v1657_v57  ;;  %v5064_v40 = vpop.permute.xlu1 %1325 }
 0x280   : > { %6575 = vst [vmem:[#allocation12_spill] sm:$0xff] %v5003_v53  ;;  %v3442_v19 = vadd.s32 4294967169, %v1850_v56  ;;  %v1676_v10 = vsel %vm1672_vm3, %v1660_v22, %v1675_v17  ;;  %v1493_v38 = vshll.u32 %v5003_v53, 30  ;;  %v1696_v4 = vadd.s32 1, %v4996_v2 }
 0x281   : > { %6576 = vst [vmem:[#allocation8_spill] sm:$0xff] %v5011_v62  ;;  %vm1695_vm12 = vc.u32 %v5000_v28, %v4995_v29  ;;  %v1752_v30 = vadd.s32 1, %v3438_v47  ;;  %v1953_v7 = vand.u32 2139095040, %v5011_v62  ;;  %v1677_v8 = vsel %vm1671_vm5, %v1674_v5, %v1676_v10 }
 0x282   : > { %v1856_v32 = vadd.s32 1, %v3442_v19  ;;  %v5028_v36 = vsub.s32 32, %v5014_v43  ;;  %v5030_v31 = vsub.s32 %v1490_v49, %v1493_v38  ;;  %v1697_v18 = vsel %vm1695_vm12, %v1696_v4, %v4996_v2 }
 0x283   : > { %v6479_v44 = vand.u32 2147483647, %v4977_v45  ;;  %v1693_v22 = vmul.u32 %v1686_v33, %v1677_v8  ;;  %vm1753_vm6 = vcmp.gt.s32.totalorder %v1752_v30, 0  ;;  %v1954_v24 = vshrl.u32 %v1953_v7, 23 }
 0x284   : > { %vm1857_vm1 = vcmp.gt.s32.totalorder %v1856_v32, 0  ;;  %6577 = vst [vmem:[#allocation5_spill] sm:$0xff] %v5030_v31  ;;  %v6476_v13 = vand.u32 2147483647, %v4914_v25  ;;  %v5037_v3 = vshll.u32 %v6530_v54, %v5014_v43  ;;  %v5041_v16 = vshrl.u32 %v6531_v34, %v5028_v36 }
 0x285   : > { %v1858_v57 = vsel %vm1857_vm1, %v1856_v32, 0  ;;  %v5045_v49 = vshrl.u32 %v6532_v9, %v5028_v36  ;;  %v5047_v58 = vadd.s32 %v1697_v18, %v1693_v22  ;;  %v1496_v52 = vsub.s32 0, %v5030_v31 }
 0x286   : > { %v1860_v1 = vand.u32 31, %v1858_v57  ;;  %v5050_v20 = vsel %vm1753_vm6, %v1752_v30, 0  ;;  %v1853_v51 = vand.u32 8388607, %v6479_v44  ;;  %v1859_v61 = vshrl.u32 %v1858_v57, 5 }
 0x287   : > { %v3446_v35 = vadd.s32 4294967169, %v1954_v24  ;;  %v1699_v42 = vadd.s32 536870912, %v5047_v58  ;;  %v5068_v38 = vmin.u32 %v1496_v52, %v5030_v31  ;;  %v6478_v32 = vand.u32 2147483647, %v5011_v62 }
 0x288   : > { %v1861_v0 = vsub.s32 32, %v1860_v1  ;;  %v1863_v55 = vshll.u32 %v6529_v27, %v1860_v1  ;;  %v1866_v6 = vshll.u32 %v6536_v46, %v1860_v1  ;;  %v1869_v2 = vshll.u32 %v6533_v48, %v1860_v1 }
 0x289   : > { %v1872_v26 = vshll.u32 %v6530_v54, %v1860_v1  ;;  %v1875_v56 = vshll.u32 %v6531_v34, %v1860_v1  ;;  %v5073_v30 = vadd.f32 %v4916_v11, %v5064_v40  ;;  %v1854_v7 = vor.u32 8388608, %v1853_v51 }
 0x28a   : > { %v1864_v33 = vshrl.u32 %v6536_v46, %v1861_v0  ;;  %v1867_v50 = vshrl.u32 %v6533_v48, %v1861_v0  ;;  %v1870_v15 = vshrl.u32 %v6530_v54, %v1861_v0  ;;  %v1873_v17 = vshrl.u32 %v6531_v34, %v1861_v0 }
 0x28b   : > { %v1876_v10 = vshrl.u32 %v6532_v9, %v1861_v0  ;;  %6578 = vst [vmem:[#allocation9_spill] sm:$0xff] %v5073_v30  ;;  %vm1878_vm9 = vcmp.lt.s32.totalorder %v1859_v61, 1  ;;  %v1960_v18 = vadd.s32 1, %v3446_v35  ;;  %v5075_v57 = vshrl.u32 %v1699_v42, 30 }
 0x28c   : > { %v1865_v47 = vor.u32 %v1864_v33, %v1863_v55  ;;  %v1868_v19 = vor.u32 %v1867_v50, %v1866_v6  ;;  %v1871_v5 = vor.u32 %v1870_v15, %v1869_v2  ;;  %v1874_v4 = vor.u32 %v1873_v17, %v1872_v26 }
 0x28d   : > { %v1877_v8 = vor.u32 %v1876_v10, %v1875_v56  ;;  %6579 = vst [vmem:[#allocation10_spill] sm:$0xff] %v5075_v57  ;;  %vm1880_vm10 = vcmp.lt.s32.totalorder %v1859_v61, 3  ;;  %vm1881_vm11 = vcmp.lt.s32.totalorder %v1859_v61, 4  ;;  %v1862_v6 = vshrl.u32 %v6529_v27, %v1861_v0 }
 0x28e   : > { %v1886_v22 = vsel %vm1878_vm9, %v1865_v47, %v1868_v19  ;;  %v1883_v24 = vsel %vm1881_vm11, %v1871_v5, 2102212464  ;;  %v1887_v1 = vsel %vm1881_vm11, %v1874_v4, 920167782  ;;  %v1890_v52 = vsel %vm1878_vm9, %v1868_v19, %v1871_v5 }
 0x28f   : > { %v1891_v55 = vsel %vm1881_vm11, %v1877_v8, 1326507024  ;;  %vm1879_vm13 = vcmp.lt.s32.totalorder %v1859_v61, 2  ;;  %v1888_v11 = vsel %vm1880_vm10, %v1871_v5, %v1887_v1  ;;  %v2057_v51 = vand.u32 2139095040, %v5073_v30 }
 0x290   : > { %v1889_v35 = vsel %vm1879_vm13, %v1886_v22, %v1888_v11  ;;  %v1892_v33 = vsel %vm1880_vm10, %v1874_v4, %v1891_v55  ;;  %v1894_v50 = vshll.u32 %v1854_v7, 8  ;;  %vm1961_vm14 = vcmp.gt.s32.totalorder %v1960_v18, 0 }
 0x291   : > { %v1882_v2 = vsel %vm1878_vm9, %v1862_v6, %v1865_v47  ;;  %v1884_v15 = vsel %vm1880_vm10, %v1868_v19, %v1883_v24  ;;  %v1893_v42 = vsel %vm1879_vm13, %v1890_v52, %v1892_v33  ;;  %v1957_v0 = vand.u32 8388607, %v6478_v32 }
 0x292   : > { %v5089_v26 = vmul.u32.u64.low %v1894_v50, %v1893_v42  ;;  %v5090_v17 = vmul.u32.u64.high %v1894_v50, %v1893_v42, %v5089_v26  ;;  %v5092_v56 = vmul.u32.u64.low %v1894_v50, %v1889_v35  ;;  %v5093_v5 = vmul.u32.u64.high %v1894_v50, %v1889_v35, %v5092_v56 }
 0x293   : > { %v5098_v10 = vshll.u32 %v6531_v34, %v5014_v43  ;;  %v1701_v47 = vshll.u32 %v5075_v57, 30  ;;  %v1962_v4 = vsel %vm1961_vm14, %v1960_v18, 0  ;;  %v2058_v19 = vshrl.u32 %v2057_v51, 23 }
 0x294   : > { %v5102_v7 = vshrl.u32 %v5005_v37, 5  ;;  %v1885_v8 = vsel %vm1879_vm13, %v1882_v2, %v1884_v15  ;;  %v1964_v22 = vand.u32 31, %v1962_v4  ;;  %v5107_v24 = vand.u32 8388607, %v6476_v13 }
 0x295   : > { %v5112_v52 = vor.u32 %v5041_v16, %v5037_v3  ;;  %v1565_v18 = vor.u32 %v5045_v49, %v5098_v10  ;;  %v5117_v55 = vand.u32 31, %v5050_v20  ;;  %vm1903_vm15 = vc.u32 %v5090_v17, %v5092_v56 }
 0x296   : > { %v1904_v37 = vadd.s32 1, %v5093_v5  ;;  %v1958_v61 = vor.u32 8388608, %v1957_v0  ;;  %v1965_v6 = vsub.s32 32, %v1964_v22  ;;  %v5123_v11 = vsub.s32 %v5047_v58, %v1701_v47 }
 0x297   : > { %v1901_v51 = vmul.u32 %v1894_v50, %v1885_v8  ;;  %v1967_v3 = vshll.u32 %v6529_v27, %v1964_v22  ;;  %v3450_v16 = vadd.s32 4294967169, %v2058_v19  ;;  %v1970_v33 = vshll.u32 %v6536_v46, %v1964_v22 }
 0x298   : > { %6580 = vst [vmem:[#allocation14_spill] sm:$0xff] %v5123_v11  ;;  %v1905_v35 = vsel %vm1903_vm15, %v1904_v37, %v5093_v5  ;;  %v1968_v49 = vshrl.u32 %v6536_v46, %v1965_v6  ;;  %v1971_v2 = vshrl.u32 %v6533_v48, %v1965_v6  ;;  %v1963_v42 = vshrl.u32 %v1962_v4, 5 }
 0x299   : > { %v1906_v15 = vadd.s32 %v1905_v35, %v1901_v51  ;;  %v1973_v0 = vshll.u32 %v6533_v48, %v1964_v22  ;;  %v1974_v26 = vshrl.u32 %v6530_v54, %v1965_v6  ;;  %v1976_v50 = vshll.u32 %v6530_v54, %v1964_v22 }
 0x29a   : > { %v1969_v58 = vor.u32 %v1968_v49, %v1967_v3  ;;  %v1972_v10 = vor.u32 %v1971_v2, %v1970_v33  ;;  %v1977_v47 = vshrl.u32 %v6531_v34, %v1965_v6  ;;  %v1998_v8 = vshll.u32 %v1958_v61, 8 }
 0x29b   : > { %v1907_v19 = vadd.s32 536870912, %v1906_v15  ;;  %v1975_v5 = vor.u32 %v1974_v26, %v1973_v0  ;;  %v6480_v37 = vand.u32 2147483647, %v5073_v30  ;;  %v1704_v39 = vsub.s32 0, %v5123_v11 }
 0x29c   : > { %v1978_v60 = vor.u32 %v1977_v47, %v1976_v50  ;;  %v1979_v4 = vshll.u32 %v6531_v34, %v1964_v22  ;;  %v1980_v51 = vshrl.u32 %v6532_v9, %v1965_v6  ;;  %vm1982_vm0 = vcmp.lt.s32.totalorder %v1963_v42, 1 }
 0x29d   : > { %v5138_v35 = vshrl.u32 %v1907_v19, 30  ;;  %vm1985_vm2 = vcmp.lt.s32.totalorder %v1963_v42, 4  ;;  %v2064_v3 = vadd.s32 1, %v3450_v16  ;;  %v1966_v49 = vshrl.u32 %v6529_v27, %v1965_v6 }
 0x29e   : > { %v1981_v33 = vor.u32 %v1980_v51, %v1979_v4  ;;  %v1987_v2 = vsel %vm1985_vm2, %v1975_v5, 2102212464  ;;  %v1990_v0 = vsel %vm1982_vm0, %v1969_v58, %v1972_v10  ;;  %vm1983_vm4 = vcmp.lt.s32.totalorder %v1963_v42, 2 }
 0x29f   : > { %6581 = vst [vmem:[#allocation13_spill] sm:$0xff] %v5138_v35  ;;  %v1909_v61 = vshll.u32 %v5138_v35, 30  ;;  %vm1984_vm3 = vcmp.lt.s32.totalorder %v1963_v42, 3  ;;  %v1991_v26 = vsel %vm1985_vm2, %v1978_v60, 920167782  ;;  %v1986_v50 = vsel %vm1982_vm0, %v1966_v49, %v1969_v58 }
 0x2a0   : > { %v1992_v47 = vsel %vm1984_vm3, %v1975_v5, %v1991_v26  ;;  %v1994_v22 = vsel %vm1982_vm0, %v1972_v10, %v1975_v5  ;;  %v1995_v13 = vsel %vm1985_vm2, %v1981_v33, 1326507024  ;;  %v1988_v19 = vsel %vm1984_vm3, %v1972_v10, %v1987_v2 }
 0x2a1   : > { %v5142_v41 = vsub.s32 %v1906_v15, %v1909_v61  ;;  %v1993_v32 = vsel %vm1983_vm4, %v1990_v0, %v1992_v47  ;;  %v1996_v16 = vsel %vm1984_vm3, %v1978_v60, %v1995_v13  ;;  %vm2065_vm5 = vcmp.gt.s32.totalorder %v2064_v3, 0 }
 0x2a2   : > { %v1997_v6 = vsel %vm1983_vm4, %v1994_v22, %v1996_v16  ;;  %v5146_v4 = vmul.u32.u64.low %v1998_v8, %v1993_v32  ;;  %v5147_v51 = vmul.u32.u64.high %v1998_v8, %v1993_v32, %v5146_v4  ;;  %v3435_v44 = vmin.u32 %v1704_v39, %v5123_v11 }
 0x2a3   : > { %v5151_v1 = vmul.u32.u64.low %v1998_v8, %v1997_v6  ;;  %v5152_v58 = vmul.u32.u64.high %v1998_v8, %v1997_v6, %v5151_v1  ;;  %v2066_v5 = vsel %vm2065_vm5, %v2064_v3, 0  ;;  %vm1569_vm8 = vcmp.lt.s32.totalorder %v5102_v7, 4 }
 0x2a4   : > { %v1989_v15 = vsel %vm1983_vm4, %v1986_v50, %v1988_v19  ;;  %v2061_v60 = vand.u32 8388607, %v6480_v37  ;;  %v2068_v13 = vand.u32 31, %v2066_v5  ;;  %v5161_v32 = vsel %vm1569_vm8, %v5112_v52, 920167782 }
 0x2a5   : > { %v5165_v39 = vsel %vm1569_vm8, %v1565_v18, 1326507024  ;;  %v1912_v1 = vsub.s32 0, %v5142_v41  ;;  %v6582_v42 = vclz %v5068_v38  ;;  %v5174_v49 = vsub.s32 32, %v5117_v55 }
 0x2a6   : > { %v2008_v33 = vadd.s32 1, %v5147_v51  ;;  %v2069_v2 = vsub.s32 32, %v2068_v13  ;;  %v1706_v0 = vclz %v3435_v44  ;;  %v2005_v61 = vmul.u32 %v1998_v8, %v1989_v15 }
 0x2a7   : > { %v5171_v3 = vadd.s32 4294967294, %v6582_v42  ;;  %vm2007_vm12 = vc.u32 %v5152_v58, %v5146_v4  ;;  %v5181_v18 = vadd.f32 %v4918_v12, %v5064_v40  ;;  %v2062_v38 = vor.u32 8388608, %v2061_v60 }
 0x2a8   : > { %v2009_v26 = vsel %vm2007_vm12, %v2008_v33, %v5147_v51  ;;  %v2072_v50 = vshrl.u32 %v6536_v46, %v2069_v2  ;;  %v2075_v47 = vshrl.u32 %v6533_v48, %v2069_v2  ;;  %v3443_v22 = vmin.u32 %v1912_v1, %v5142_v41 }
 0x2a9   : > { %6583 = vst [vmem:[#allocation16_spill] sm:$0xff] %v5181_v18  ;;  %v2010_v19 = vadd.s32 %v2009_v26, %v2005_v61  ;;  %v2071_v44 = vshll.u32 %v6529_v27, %v2068_v13  ;;  %v2078_v8 = vshrl.u32 %v6530_v54, %v2069_v2  ;;  %v2074_v16 = vshll.u32 %v6536_v46, %v2068_v13 }
 0x2aa   : > { %v2077_v6 = vshll.u32 %v6533_v48, %v2068_v13  ;;  %v2080_v12 = vshll.u32 %v6530_v54, %v2068_v13  ;;  %v2081_v40 = vshrl.u32 %v6531_v34, %v2069_v2  ;;  %v2067_v15 = vshrl.u32 %v2066_v5, 5 }
 0x2ab   : > { %v2011_v51 = vadd.s32 536870912, %v2010_v19  ;;  %v2073_v60 = vor.u32 %v2072_v50, %v2071_v44  ;;  %v2084_v42 = vshrl.u32 %v6532_v9, %v2069_v2  ;;  %v2076_v33 = vor.u32 %v2075_v47, %v2074_v16 }
 0x2ac   : > { %v2079_v1 = vor.u32 %v2078_v8, %v2077_v6  ;;  %v2082_v61 = vor.u32 %v2081_v40, %v2080_v12  ;;  %v2083_v26 = vshll.u32 %v6531_v34, %v2068_v13  ;;  %v5197_v37 = vadd.s32 %v4943_v21, %v4941_v14 }
 0x2ad   : > { %v5200_v10 = vshrl.u32 %v5050_v20, 5  ;;  %v1769_v35 = vshrl.u32 %v6531_v34, %v5174_v49  ;;  %v1914_v57 = vclz %v3443_v22  ;;  %vm3429_vm1 = vcmp.lt.s32.totalorder %v5171_v3, 0 }
 0x2ae   : > { %v1772_v5 = vshrl.u32 %v6532_v9, %v5174_v49  ;;  %v2085_v50 = vor.u32 %v2084_v42, %v2083_v26  ;;  %v2161_v47 = vand.u32 2139095040, %v5181_v18  ;;  %v3436_v13 = vadd.s32 4294967294, %v1706_v0 }
 0x2af   : > { %v5208_v44 = vshrl.u32 %v2011_v51, 30  ;;  %vm2086_vm6 = vcmp.lt.s32.totalorder %v2067_v15, 1  ;;  %vm2089_vm9 = vcmp.lt.s32.totalorder %v2067_v15, 4  ;;  %v2102_v8 = vshll.u32 %v2062_v38, 8 }
 0x2b0   : > { %v2091_v14 = vsel %vm2089_vm9, %v2079_v1, 2102212464  ;;  %v2094_v21 = vsel %vm2086_vm6, %v2073_v60, %v2076_v33  ;;  %v2095_v20 = vsel %vm2089_vm9, %v2082_v61, 920167782  ;;  %v3444_v16 = vadd.s32 4294967294, %v1914_v57 }
 0x2b1   : > { %6584 = vst [vmem:[#allocation17_spill] sm:$0xff] %v5208_v44  ;;  %v2070_v22 = vshrl.u32 %v6529_v27, %v2069_v2  ;;  %vm2087_vm10 = vcmp.lt.s32.totalorder %v2067_v15, 2  ;;  %vm2088_vm11 = vcmp.lt.s32.totalorder %v2067_v15, 3  ;;  %v2098_v12 = vsel %vm2086_vm6, %v2076_v33, %v2079_v1 }
 0x2b2   : > { %v2096_v6 = vsel %vm2088_vm11, %v2079_v1, %v2095_v20  ;;  %v2099_v40 = vsel %vm2089_vm9, %v2085_v50, 1326507024  ;;  %v2162_v42 = vshrl.u32 %v2161_v47, 23  ;;  %v2013_v26 = vshll.u32 %v5208_v44, 30 }
 0x2b3   : > { %v2090_v0 = vsel %vm2086_vm6, %v2070_v22, %v2073_v60  ;;  %v2092_v51 = vsel %vm2088_vm11, %v2076_v33, %v2091_v14  ;;  %v2097_v25 = vsel %vm2087_vm10, %v2094_v21, %v2096_v6  ;;  %v2100_v30 = vsel %vm2088_vm11, %v2082_v61, %v2099_v40 }
 0x2b4   : > { %v5213_v53 = vmul.u32.u64.low %v2102_v8, %v2097_v25  ;;  %v5214_v63 = vmul.u32.u64.high %v2102_v8, %v2097_v25, %v5213_v53  ;;  %v3454_v57 = vadd.s32 4294967169, %v2162_v42  ;;  %v1768_v2 = vshll.u32 %v6530_v54, %v5117_v55 }
 0x2b5   : > { %v1771_v38 = vshll.u32 %v6531_v34, %v5117_v55  ;;  %vm1777_vm13 = vcmp.lt.s32.totalorder %v5200_v10, 4  ;;  %v2101_v1 = vsel %vm2087_vm10, %v2098_v12, %v2100_v30  ;;  %v5226_v60 = vsel %vm3429_vm1, 0, %v5171_v3 }
 0x2b6   : > { %6585 = vst [vmem:[#allocation18_spill] sm:$0xff] %v5213_v53  ;;  %6586 = vst [vmem:[#allocation19_spill] sm:$0xff] %v5226_v60  ;;  %v5228_v33 = vmul.u32.u64.low %v2102_v8, %v2101_v1  ;;  %v5229_v25 = vmul.u32.u64.high %v2102_v8, %v2101_v1, %v5228_v33  ;;  %v2168_v61 = vadd.s32 1, %v3454_v57  ;;  %v5231_v50 = vor.u32 %v1769_v35, %v1768_v2 }
 0x2b7   : > { %v1773_v47 = vor.u32 %v1772_v5, %v1771_v38  ;;  %v5233_v14 = vsub.s32 %v2010_v19, %v2013_v26  ;;  %v2093_v21 = vsel %vm2087_vm10, %v2090_v0, %v2092_v51  ;;  %vm3437_vm14 = vcmp.lt.s32.totalorder %v3436_v13, 0 }
 0x2b8   : > { %6587 = vst [vmem:[#allocation20_spill] sm:$0xff] %v5229_v25  ;;  %vm3445_vm15 = vcmp.lt.s32.totalorder %v3444_v16, 0  ;;  %v2112_v30 = vadd.s32 1, %v5214_v63  ;;  %vm2169_vm0 = vcmp.gt.s32.totalorder %v2168_v61, 0  ;;  %v1502_v20 = vsub.s32 32, %v5226_v60 }
 0x2b9   : > { %v5240_v3 = vadd.s32 %v4995_v29, %v5000_v28  ;;  %v6493_v22 = vand.u32 2147483647, %v5181_v18  ;;  %v2170_v35 = vsel %vm2169_vm0, %v2168_v61, 0  ;;  %v1506_v5 = vsub.s32 4294967266, %v5226_v60 }
 0x2ba   : > { %v2109_v19 = vmul.u32 %v2102_v8, %v2093_v21  ;;  %vm2111_vm2 = vc.u32 %v5229_v25, %v5213_v53  ;;  %v2172_v15 = vand.u32 31, %v2170_v35  ;;  %v5246_v6 = vsel %vm3437_vm14, 0, %v3436_v13 }
 0x2bb   : > { %v5248_v12 = vsel %vm3445_vm15, 0, %v3444_v16  ;;  %v2016_v40 = vsub.s32 0, %v5233_v14  ;;  %v2113_v42 = vsel %vm2111_vm2, %v2112_v30, %v5214_v63  ;;  %v5255_v29 = vsel %vm1777_vm13, %v5231_v50, 920167782 }
 0x2bc   : > { %v5259_v28 = vsel %vm1777_vm13, %v1773_v47, 1326507024  ;;  %v2114_v8 = vadd.s32 %v2113_v42, %v2109_v19  ;;  %v2173_v26 = vsub.s32 32, %v2172_v15  ;;  %v5264_v16 = vshrl.u32 %v5197_v37, %v1502_v20 }
 0x2bd   : > { %v2165_v63 = vand.u32 8388607, %v6493_v22  ;;  %v5270_v0 = vshrl.u32 %v6529_v27, %v5028_v36  ;;  %v5272_v51 = vadd.s32 127, %v1506_v5  ;;  %v1714_v57 = vsub.s32 4294967266, %v5246_v6 }
 0x2be   : > { %6588 = vst [vmem:[#allocation21_spill] sm:$0xff] %v5264_v16  ;;  %v5277_v2 = vadd.s32 %v5092_v56, %v5090_v17  ;;  %v1922_v38 = vsub.s32 4294967266, %v5248_v12  ;;  %v3447_v37 = vmin.u32 %v2016_v40, %v5233_v14  ;;  %v2115_v1 = vadd.s32 536870912, %v2114_v8 }
 0x2bf   : > { %v2175_v33 = vshll.u32 %v6529_v27, %v2172_v15  ;;  %v2176_v61 = vshrl.u32 %v6536_v46, %v2173_v26  ;;  %v2178_v47 = vshll.u32 %v6536_v46, %v2172_v15  ;;  %v2179_v21 = vshrl.u32 %v6533_v48, %v2173_v26 }
 0x2c0   : > { %v2181_v30 = vshll.u32 %v6533_v48, %v2172_v15  ;;  %v2182_v20 = vshrl.u32 %v6530_v54, %v2173_v26  ;;  %v2166_v5 = vor.u32 8388608, %v2165_v63  ;;  %v2171_v17 = vshrl.u32 %v2170_v35, 5 }
 0x2c1   : > { %v2177_v56 = vor.u32 %v2176_v61, %v2175_v33  ;;  %v1551_v19 = vshll.u32 %v6529_v27, %v5014_v43  ;;  %v2180_v40 = vor.u32 %v2179_v21, %v2178_v47  ;;  %v2184_v22 = vshll.u32 %v6530_v54, %v2172_v15 }
 0x2c2   : > { %v2183_v42 = vor.u32 %v2182_v20, %v2181_v30  ;;  %v2185_v13 = vshrl.u32 %v6531_v34, %v2173_v26  ;;  %v1918_v44 = vsub.s32 32, %v5248_v12  ;;  %v1923_v18 = vadd.s32 127, %v1922_v38 }
 0x2c3   : > { %v2187_v59 = vshll.u32 %v6531_v34, %v2172_v15  ;;  %v2188_v53 = vshrl.u32 %v6532_v9, %v2173_v26  ;;  %v2018_v25 = vclz %v3447_v37  ;;  %v5294_v63 = vshrl.u32 %v2115_v1, 30 }
 0x2c4   : > { %v2186_v35 = vor.u32 %v2185_v13, %v2184_v22  ;;  %v1552_v33 = vshrl.u32 %v6536_v46, %v5028_v36  ;;  %vm2190_vm4 = vcmp.lt.s32.totalorder %v2171_v17, 1  ;;  %vm2193_vm3 = vcmp.lt.s32.totalorder %v2171_v17, 4 }
 0x2c5   : > { %v2189_v61 = vor.u32 %v2188_v53, %v2187_v59  ;;  %v2206_v47 = vshll.u32 %v2166_v5, 8  ;;  %v2195_v21 = vsel %vm2193_vm3, %v2183_v42, 2102212464  ;;  %v2198_v30 = vsel %vm2190_vm4, %v2177_v56, %v2180_v40 }
 0x2c6   : > { %v1554_v38 = vshll.u32 %v6536_v46, %v5014_v43  ;;  %v1555_v15 = vshrl.u32 %v6533_v48, %v5028_v36  ;;  %v2174_v37 = vshrl.u32 %v6529_v27, %v2173_v26  ;;  %vm2192_vm5 = vcmp.lt.s32.totalorder %v2171_v17, 3 }
 0x2c7   : > { %v2199_v1 = vsel %vm2193_vm3, %v2186_v35, 920167782  ;;  %v2202_v22 = vsel %vm2190_vm4, %v2180_v40, %v2183_v42  ;;  %v2117_v13 = vshll.u32 %v5294_v63, 30  ;;  %vm2191_vm12 = vcmp.lt.s32.totalorder %v2171_v17, 2 }
 0x2c8   : > { %v2200_v59 = vsel %vm2192_vm5, %v2183_v42, %v2199_v1  ;;  %v2203_v53 = vsel %vm2193_vm3, %v2189_v61, 1326507024  ;;  %v2194_v20 = vsel %vm2190_vm4, %v2174_v37, %v2177_v56  ;;  %v2196_v5 = vsel %vm2192_vm5, %v2180_v40, %v2195_v21 }
 0x2c9   : > { %v2201_v9 = vsel %vm2191_vm12, %v2198_v30, %v2200_v59  ;;  %v2204_v34 = vsel %vm2192_vm5, %v2186_v35, %v2203_v53  ;;  %v3448_v62 = vadd.s32 4294967294, %v2018_v25  ;;  %v1557_v31 = vshll.u32 %v6533_v48, %v5014_v43 }
 0x2ca   : > { %v2205_v45 = vsel %vm2191_vm12, %v2202_v22, %v2204_v34  ;;  %v5304_v11 = vmul.u32.u64.low %v2206_v47, %v2201_v9  ;;  %v5305_v16 = vmul.u32.u64.high %v2206_v47, %v2201_v9, %v5304_v11  ;;  %v1558_v17 = vshrl.u32 %v6530_v54, %v5028_v36 }
 0x2cb   : > { %v5308_v60 = vmul.u32.u64.low %v2206_v47, %v2205_v45  ;;  %v5309_v26 = vmul.u32.u64.high %v2206_v47, %v2205_v45, %v5308_v60  ;;  %v5315_v42 = vsub.s32 %v2114_v8, %v2117_v13  ;;  %v2197_v56 = vsel %vm2191_vm12, %v2194_v20, %v2196_v5 }
 0x2cc   : > { %v1553_v40 = vor.u32 %v1552_v33, %v1551_v19  ;;  %v1556_v35 = vor.u32 %v1555_v15, %v1554_v38  ;;  %v1508_v34 = vshll.u32 %v5272_v51, 23  ;;  %v1710_v9 = vsub.s32 32, %v5246_v6 }
 0x2cd   : > { %v5319_v25 = vadd.s32 127, %v1714_v57  ;;  %v1559_v61 = vor.u32 %v1558_v17, %v1557_v31  ;;  %v1919_v45 = vshll.u32 %v5142_v41, %v5248_v12  ;;  %v1920_v43 = vshrl.u32 %v5277_v2, %v1918_v44 }
 0x2ce   : > { %v1924_v60 = vshll.u32 %v1923_v18, 23  ;;  %v2216_v36 = vadd.s32 1, %v5305_v16  ;;  %vm3449_vm1 = vcmp.lt.s32.totalorder %v3448_v62, 0  ;;  %v2213_v8 = vmul.u32 %v2206_v47, %v2197_v56 }
 0x2cf   : > { %vm2215_vm6 = vc.u32 %v5309_v26, %v5304_v11  ;;  %vm1566_vm9 = vcmp.lt.s32.totalorder %v5102_v7, 1  ;;  %v2120_v51 = vsub.s32 0, %v5315_v42  ;;  %vm1568_vm10 = vcmp.lt.s32.totalorder %v5102_v7, 3 }
 0x2d0   : > { %v2217_v57 = vsel %vm2215_vm6, %v2216_v36, %v5305_v16  ;;  %v1574_v41 = vsel %vm1566_vm9, %v1553_v40, %v1556_v35  ;;  %v1571_v18 = vsel %vm1569_vm8, %v1559_v61, 2102212464  ;;  %v1576_v44 = vsel %vm1568_vm10, %v1559_v61, %v5161_v32 }
 0x2d1   : > { %v2218_v31 = vadd.s32 %v2217_v57, %v2213_v8  ;;  %v1578_v12 = vsel %vm1566_vm9, %v1556_v35, %v1559_v61  ;;  %v5340_v2 = vor.u32 %v1920_v43, %v1919_v45  ;;  %v5342_v19 = vor.u32 4788187, %v1924_v60 }
 0x2d2   : > { %v5344_v16 = vsel %vm3449_vm1, 0, %v3448_v62  ;;  %vm1567_vm11 = vcmp.lt.s32.totalorder %v5102_v7, 2  ;;  %v1580_v32 = vsel %vm1568_vm10, %v5112_v52, %v5165_v39  ;;  %v6589_v21 = vor.u32 8388608, %v5107_v24 }
 0x2d3   : > { %v2219_v33 = vadd.s32 536870912, %v2218_v31  ;;  %v1577_v47 = vsel %vm1567_vm11, %v1574_v41, %v1576_v44  ;;  %v3451_v38 = vmin.u32 %v2120_v51, %v5315_v42  ;;  %v1570_v62 = vsel %vm1566_vm9, %v5270_v0, %v1553_v40 }
 0x2d4   : > { %v1582_v30 = vshll.u32 %v6589_v21, 8  ;;  %v1572_v15 = vsel %vm1568_vm10, %v1556_v35, %v1571_v18  ;;  %v1581_v37 = vsel %vm1567_vm11, %v1578_v12, %v1580_v32  ;;  %v1742_v24 = vand.u32 2147483647, %v4948_v23 }
 0x2d5   : > { %v5363_v1 = vshrl.u32 %v2219_v33, 30  ;;  %v5369_v52 = vor.u32 4788187, %v1508_v34  ;;  %v5372_v39 = vshrl.u32 %v5240_v3, %v1710_v9  ;;  %v1716_v53 = vshll.u32 %v5319_v25, 23 }
 0x2d6   : > { %v5365_v22 = vmul.u32.u64.low %v1582_v30, %v1581_v37  ;;  %v5366_v13 = vmul.u32.u64.high %v1582_v30, %v1581_v37, %v5365_v22  ;;  %v5374_v59 = vmul.u32.u64.low %v1582_v30, %v1577_v47  ;;  %v5375_v0 = vmul.u32.u64.high %v1582_v30, %v1577_v47, %v5374_v59 }
 0x2d7   : > { %v1928_v20 = vcvt.s32.f32 %v5340_v2  ;;  %v2006_v5 = vadd.s32 %v5146_v4, %v5152_v58  ;;  %v2221_v17 = vshll.u32 %v5363_v1, 30  ;;  %v1926_v56 = vand.u32 2147483647, %v5342_v19 }
 0x2d8   : > { %v2026_v40 = vsub.s32 4294967266, %v5344_v16  ;;  %v1573_v3 = vsel %vm1567_vm11, %v1570_v62, %v1572_v15  ;;  %v1760_v35 = vshrl.u32 %v6536_v46, %v5174_v49  ;;  %v2122_v34 = vclz %v3451_v38 }
 0x2d9   : > { %v5389_v9 = vsub.s32 %v2218_v31, %v2221_v17  ;;  %vm1591_vm8 = vc.u32 %v5366_v13, %v5374_v59  ;;  %v1749_v4 = vand.u32 8388607, %v1742_v24  ;;  %v1592_v58 = vadd.s32 1, %v5375_v0 }
 0x2da   : > { %v1759_v61 = vshll.u32 %v6529_v27, %v5117_v55  ;;  %v1762_v7 = vshll.u32 %v6536_v46, %v5117_v55  ;;  %v1763_v45 = vshrl.u32 %v6533_v48, %v5174_v49  ;;  %v1589_v60 = vmul.u32 %v1582_v30, %v1573_v3 }
 0x2db   : > { %v2224_v43 = vsub.s32 0, %v5389_v9  ;;  %v1765_v36 = vshll.u32 %v6533_v48, %v5117_v55  ;;  %v1766_v8 = vshrl.u32 %v6530_v54, %v5174_v49  ;;  %v2027_v51 = vadd.s32 127, %v2026_v40 }
 0x2dc   : > { %v1593_v57 = vsel %vm1591_vm8, %v1592_v58, %v5375_v0  ;;  %v1761_v41 = vor.u32 %v1760_v35, %v1759_v61  ;;  %v1764_v31 = vor.u32 %v1763_v45, %v1762_v7  ;;  %v2022_v18 = vsub.s32 32, %v5344_v16 }
 0x2dd   : > { %v3455_v44 = vmin.u32 %v2224_v43, %v5389_v9  ;;  %v1594_v12 = vadd.s32 %v1593_v57, %v1589_v60  ;;  %v1767_v19 = vor.u32 %v1766_v8, %v1765_v36  ;;  %v2023_v33 = vshll.u32 %v5233_v14, %v5344_v16  ;;  %v6590_v36 = vld [vmem:[#allocation5_spill] sm:$0xff]  ;;  %v6591_v8 = vld [vmem:[#allocation19_spill] sm:$0xff] }
 0x2de   : > { %v3452_v47 = vadd.s32 4294967294, %v2122_v34  ;;  %v1750_v32 = vor.u32 8388608, %v1749_v4  ;;  %vm1776_vm14 = vcmp.lt.s32.totalorder %v5200_v10, 3  ;;  %vm1774_vm15 = vcmp.lt.s32.totalorder %v5200_v10, 1  ;;  %v6593_v57 = vld [vmem:[#allocation21_spill] sm:$0xff] }
 0x2df   : > { %v2226_v55 = vclz %v3455_v44  ;;  %v1595_v21 = vadd.s32 536870912, %v1594_v12  ;;  %v1788_v30 = vsel %vm1776_vm14, %v5231_v50, %v5259_v28  ;;  %v2028_v38 = vshll.u32 %v2027_v51, 23  ;;  %v6594_v44 = vld [vmem:[#allocation14_spill] sm:$0xff] }
 0x2e0   : > { %v1782_v62 = vsel %vm1774_vm15, %v1761_v41, %v1764_v31  ;;  %v1784_v14 = vsel %vm1776_vm14, %v1767_v19, %v5255_v29  ;;  %v1786_v16 = vsel %vm1774_vm15, %v1764_v31, %v1767_v19  ;;  %v2024_v15 = vshrl.u32 %v2006_v5, %v2022_v18 }
 0x2e1   : > { %v3456_v37 = vadd.s32 4294967294, %v2226_v55  ;;  %v5425_v22 = vshrl.u32 %v1595_v21, 30  ;;  %vm1775_vm0 = vcmp.lt.s32.totalorder %v5200_v10, 2  ;;  %vm3453_vm2 = vcmp.lt.s32.totalorder %v3452_v47, 0 }
 0x2e2   : > { %v1779_v50 = vsel %vm1777_vm13, %v1767_v19, 2102212464  ;;  %v1789_v28 = vsel %vm1775_vm0, %v1786_v16, %v1788_v30  ;;  %v1790_v0 = vshll.u32 %v1750_v32, 8  ;;  %v1758_v17 = vshrl.u32 %v6529_v27, %v5174_v49  ;;  %v6595_v19 = vld [vmem:[#allocation11_spill] sm:$0xff]  ;;  %v6599_v16 = vld [vmem:[#allocation8_spill] sm:$0xff] }
 0x2e3   : > { %vm3457_vm4 = vcmp.lt.s32.totalorder %v3456_v37, 0  ;;  %v1597_v29 = vshll.u32 %v5425_v22, 30  ;;  %v1785_v5 = vsel %vm1775_vm0, %v1782_v62, %v1784_v14  ;;  %v2029_v40 = vor.u32 4788187, %v2028_v38 }
 0x2e4   : > { %v5437_v3 = vsel %vm3457_vm4, 0, %v3456_v37  ;;  %v5439_v35 = vmul.u32.u64.low %v1790_v0, %v1789_v28  ;;  %v5440_v34 = vmul.u32.u64.high %v1790_v0, %v1789_v28, %v5439_v35  ;;  %v5442_v4 = vsel %vm3453_vm2, 0, %v3452_v47 }
 0x2e5   : > { %v5444_v58 = vsub.s32 %v1594_v12, %v1597_v29  ;;  %v1778_v61 = vsel %vm1774_vm15, %v1758_v17, %v1761_v41  ;;  %v1780_v7 = vsel %vm1776_vm14, %v1764_v31, %v1779_v50  ;;  %v2025_v49 = vor.u32 %v2024_v15, %v2023_v33 }
 0x2e6   : > { %v2234_v45 = vsub.s32 4294967266, %v5437_v3  ;;  %v5451_v43 = vmul.u32.u64.low %v1790_v0, %v1785_v5  ;;  %v5452_v60 = vmul.u32.u64.high %v1790_v0, %v1785_v5, %v5451_v43  ;;  %v6592_v51 = vshll.u32 %v6590_v36, %v6591_v8 }
 0x2e7   : > { %v1711_v12 = vshll.u32 %v6594_v44, %v5246_v6  ;;  %v1929_v41 = vmul.f32 %v1928_v20, %v1926_v56  ;;  %v1600_v31 = vsub.s32 0, %v5444_v58  ;;  %vm1848_vm13 = vcmp.lt.s32.totalorder %v6595_v19, 0 }
 0x2e8   : > { %v1505_v18 = vor.u32 %v6593_v57, %v6592_v51  ;;  %v2030_v33 = vand.u32 2147483647, %v2029_v40  ;;  %v2130_v47 = vsub.s32 4294967266, %v5442_v4  ;;  %v1781_v32 = vsel %vm1775_vm0, %v1778_v61, %v1780_v7  ;;  %v6600_v7 = vld [vmem:[#allocation20_spill] sm:$0xff] }
 0x2e9   : > { %v1510_v55 = vand.u32 2147483647, %v5369_v52  ;;  %v1713_v21 = vor.u32 %v5372_v39, %v1711_v12  ;;  %v3431_v30 = vmin.u32 %v1600_v31, %v5444_v58  ;;  %vm1799_vm3 = vc.u32 %v5440_v34, %v5451_v43 }
 0x2ea   : > { %v1717_v6 = vor.u32 4788187, %v1716_v53  ;;  %v6596_v2 = vand.u32 2147483647, %v6595_v19  ;;  %v2032_v10 = vcvt.s32.f32 %v2025_v49  ;;  %v2235_v56 = vadd.s32 127, %v2234_v45  ;;  %v6601_v49 = vld [vmem:[#allocation18_spill] sm:$0xff] }
 0x2eb   : > { %v1800_v52 = vadd.s32 1, %v5452_v60  ;;  %v1512_v38 = vcvt.s32.f32 %v1505_v18  ;;  %v1930_v39 = vxor.u32 2147483648, %v1929_v41  ;;  %v1602_v62 = vclz %v3431_v30 }
 0x2ec   : > { %vm5477_vm5 = vcmp.le.f32.partialorder %v6596_v2, 0.7853982  ;;  %v1797_v14 = vmul.u32 %v1790_v0, %v1781_v32  ;;  %vm1952_vm12 = vcmp.lt.s32.totalorder %v6599_v16, 0  ;;  %v2033_v15 = vmul.f32 %v2032_v10, %v2030_v33 }
 0x2ed   : > { %v2131_v37 = vadd.s32 127, %v2130_v47  ;;  %v2230_v25 = vsub.s32 32, %v5437_v3  ;;  %v1801_v53 = vsel %vm1799_vm3, %v1800_v52, %v5452_v60  ;;  %v1513_v50 = vmul.f32 %v1512_v38, %v1510_v55  ;;  %v6602_v60 = vld [vmem:[#allocation7_spill] sm:$0xff] }
 0x2ee   : > { %v2126_v28 = vsub.s32 32, %v5442_v4  ;;  %v3432_v29 = vadd.s32 4294967294, %v1602_v62  ;;  %v1802_v17 = vadd.s32 %v1801_v53, %v1797_v14  ;;  %v1718_v5 = vand.u32 2147483647, %v1717_v6  ;;  %v6603_v52 = vld [vmem:[#allocation15_spill] sm:$0xff] }
 0x2ef   : > { %v1720_v40 = vcvt.s32.f32 %v1713_v21  ;;  %v2214_v35 = vadd.s32 %v5304_v11, %v5309_v26  ;;  %v2236_v61 = vshll.u32 %v2235_v56, 23  ;;  %v1931_v0 = vsel %vm1848_vm13, %v1930_v39, %v1929_v41 }
 0x2f0   : > { %v2110_v45 = vadd.s32 %v6601_v49, %v6600_v7  ;;  %vm3433_vm1 = vcmp.lt.s32.totalorder %v3432_v29, 0  ;;  %v1803_v36 = vadd.s32 536870912, %v1802_v17  ;;  %vm1432_vm6 = vcmp.lt.s32.totalorder %v6602_v60, 0 }
 0x2f1   : > { %v2034_v8 = vxor.u32 2147483648, %v2033_v15  ;;  %v2132_v51 = vshll.u32 %v2131_v37, 23  ;;  %v2232_v57 = vshrl.u32 %v2214_v35, %v2230_v25  ;;  %v1605_v18 = vsel %vm3433_vm1, 0, %v3432_v29 }
 0x2f2   : > { %v2128_v44 = vshrl.u32 %v2110_v45, %v2126_v28  ;;  %v1590_v12 = vadd.s32 %v5374_v59, %v5366_v13  ;;  %v1606_v11 = vsub.s32 32, %v1605_v18  ;;  %v1610_v26 = vsub.s32 4294967266, %v1605_v18 }
 0x2f3   : > { %v1721_v31 = vmul.f32 %v1720_v40, %v1718_v5  ;;  %v2231_v41 = vshll.u32 %v5389_v9, %v5437_v3  ;;  %v2237_v33 = vor.u32 4788187, %v2236_v61  ;;  %v5497_v47 = vshrl.u32 %v1803_v36, 30  ;;  %v6607_v61 = vld [vmem:[#allocation12_spill] sm:$0xff] }
 0x2f4   : > { %v1934_v32 = vsel %vm5477_vm5, %v6595_v19, %v1931_v0  ;;  %v2127_v55 = vshll.u32 %v5315_v42, %v5442_v4  ;;  %v1608_v21 = vshrl.u32 %v1590_v12, %v1606_v11  ;;  %v1611_v30 = vadd.s32 127, %v1610_v26 }
 0x2f5   : > { %v2133_v6 = vor.u32 4788187, %v2132_v51  ;;  %v2233_v13 = vor.u32 %v2232_v57, %v2231_v41  ;;  %v1607_v59 = vshll.u32 %v5444_v58, %v1605_v18  ;;  %v1805_v2 = vshll.u32 %v5497_v47, 30  ;;  %v6611_v57 = vld [vmem:[#allocation9_spill] sm:$0xff]  ;;  %v6612_v18 = vld [vmem:[#allocation6_spill] sm:$0xff] }
 0x2f6   : > { %v1514_v10 = vxor.u32 2147483648, %v1513_v50  ;;  %v2035_v9 = vsel %vm1952_vm12, %v2034_v8, %v2033_v15  ;;  %v2129_v3 = vor.u32 %v2128_v44, %v2127_v55  ;;  %v1612_v56 = vshll.u32 %v1611_v30, 23 }
 0x2f7   : > { %vm1640_vm9 = vcmp.lt.s32.totalorder %v6603_v52, 0  ;;  %v2238_v38 = vand.u32 2147483647, %v2237_v33  ;;  %v1609_v39 = vor.u32 %v1608_v21, %v1607_v59  ;;  %v5509_v62 = vsub.s32 %v1802_v17, %v1805_v2 }
 0x2f8   : > { %v1722_v42 = vxor.u32 2147483648, %v1721_v31  ;;  %3707 = vcosq.f32 %v1934_v32  ;;  %v6604_v4 = vand.u32 2147483647, %v6599_v16  ;;  %v1613_v14 = vor.u32 4788187, %v1612_v56  ;;  %v6623_v56 = vld [vmem:[#allocation10_spill] sm:$0xff] }
 0x2f9   : > { %v2134_v37 = vand.u32 2147483647, %v2133_v6  ;;  %v2240_v25 = vcvt.s32.f32 %v2233_v13  ;;  %v1808_v53 = vsub.s32 0, %v5509_v62  ;;  %v1515_v28 = vsel %vm1432_vm6, %v1514_v10, %v1513_v50 }
 0x2fa   : > { %vm5513_vm10 = vcmp.le.f32.partialorder %v6604_v4, 0.7853982  ;;  %3709 = vsinq.f32 %v1934_v32  ;;  %v2136_v29 = vcvt.s32.f32 %v2129_v3  ;;  %v1614_v17 = vand.u32 2147483647, %v1613_v14  ;;  %v6619_v32 = vld [vmem:[#allocation16_spill] sm:$0xff] }
 0x2fb   : > { %v2038_v15 = vsel %vm5513_vm10, %v6599_v16, %v2035_v9  ;;  %v2241_v5 = vmul.f32 %v2240_v25, %v2238_v38  ;;  %v1616_v40 = vcvt.s32.f32 %v1609_v39  ;;  %v3439_v35 = vmin.u32 %v1808_v53, %v5509_v62 }
 0x2fc   : > { %v1516_v0 = vsub.s32 4, %v6607_v61  ;;  %v1723_v7 = vsel %vm1640_vm9, %v1722_v42, %v1721_v31  ;;  %3711 = vcosq.f32 %v2038_v15  ;;  %v6608_v49 = vand.u32 2147483647, %v6602_v60 }
 0x2fd   : > { %v2137_v50 = vmul.f32 %v2136_v29, %v2134_v37  ;;  %v1617_v36 = vmul.f32 %v1616_v40, %v1614_v17  ;;  %v1810_v8 = vclz %v3439_v35  ;;  %3713 = vsinq.f32 %v2038_v15 }
 0x2fe   : > { %vm5529_vm11 = vcmp.le.f32.partialorder %v6608_v49, 0.7853982  ;;  %vm2056_vm8 = vcmp.lt.s32.totalorder %v6611_v57, 0  ;;  %v6613_v44 = vand.u32 2147483647, %v6612_v18  ;;  %vm1536_vm15 = vcmp.lt.s32.totalorder %v6612_v18, 0 }
 0x2ff   : > { %v1518_v51 = vsel %vm5529_vm11, %v6602_v60, %v1515_v28  ;;  %v2242_v11 = vxor.u32 2147483648, %v2241_v5  ;;  %v3440_v26 = vadd.s32 4294967294, %v1810_v8  ;;  %v1517_v31 = vsel %vm1432_vm6, %v1516_v0, %v6607_v61 }
 0x300   : > { %vm5539_vm14 = vcmp.le.f32.partialorder %v6613_v44, 0.7853982  ;;  %v6616_v41 = vand.u32 2147483647, %v6603_v52  ;;  %vm2160_vm2 = vcmp.lt.s32.totalorder %v6619_v32, 0  ;;  %v1620_v55 = vsub.s32 4, %v5425_v22 }
 0x301   : > { %3715 = vcosq.f32 %v1518_v51  ;;  %v6620_v30 = vand.u32 2147483647, %v6611_v57  ;;  %v2138_v13 = vxor.u32 2147483648, %v2137_v50  ;;  %v1618_v59 = vxor.u32 2147483648, %v1617_v36 }
 0x302   : > { %vm5549_vm0 = vcmp.le.f32.partialorder %v6616_v41, 0.7853982  ;;  %vm3441_vm3 = vcmp.lt.s32.totalorder %v3440_v26, 0  ;;  %3717 = vsinq.f32 %v1518_v51  ;;  %v5564_v2 = vpop.eup %3707  ;;  %v1798_v10 = vadd.s32 %v5451_v43, %v5440_v34 }
 0x303   : > { %v1726_v21 = vsel %vm5549_vm0, %v6603_v52, %v1723_v7  ;;  %vm5560_vm4 = vcmp.le.f32.partialorder %v6620_v30, 0.7853982  ;;  %v1813_v9 = vsel %vm3441_vm3, 0, %v3440_v26  ;;  %v1519_v3 = vsel %vm5529_vm11, 0, %v1517_v31  ;;  %v6627_v7 = vld [vmem:[#allocation17_spill] sm:$0xff] }
 0x304   : > { %v1724_v38 = vsub.s32 4, %v6623_v56  ;;  %v2243_v39 = vsel %vm2160_vm2, %v2242_v11, %v2241_v5  ;;  %v1814_v42 = vsub.s32 32, %v1813_v9  ;;  %v1818_v4 = vsub.s32 4294967266, %v1813_v9  ;;  %v5573_v14 = vpop.eup %3709 }
 0x305   : > { %3719 = vcosq.f32 %v1726_v21  ;;  %v6624_v15 = vand.u32 2147483647, %v6619_v32  ;;  %v1621_v34 = vsel %vm1536_vm15, %v1620_v55, %v5425_v22  ;;  %v1828_v43 = vsub.s32 4, %v5497_v47 }
 0x306   : > { %3721 = vsinq.f32 %v1726_v21  ;;  %v1619_v25 = vsel %vm1536_vm15, %v1618_v59, %v1617_v36  ;;  %v1815_v53 = vshll.u32 %v5509_v62, %v1813_v9  ;;  %v1816_v28 = vshrl.u32 %v1798_v10, %v1814_v42  ;;  %v5588_v17 = vpop.eup %3711 }
 0x307   : > { %vm5577_vm1 = vcmp.le.f32.partialorder %v6624_v15, 0.7853982  ;;  %v1819_v29 = vadd.s32 127, %v1818_v4  ;;  %v2139_v5 = vsel %vm2056_vm8, %v2138_v13, %v2137_v50  ;;  %v1523_v22 = vadd.s32 3, %v1519_v3  ;;  %v5601_v45 = vpop.eup %3713 }
 0x308   : > { %v2246_v40 = vsel %vm5577_vm1, %v6619_v32, %v2243_v39  ;;  %v1725_v35 = vsel %vm1640_vm9, %v1724_v38, %v6623_v56  ;;  %v1623_v61 = vsel %vm5539_vm14, 0, %v1621_v34  ;;  %v1817_v62 = vor.u32 %v1816_v28, %v1815_v53  ;;  %v6630_v34 = vld [vmem:[#allocation13_spill] sm:$0xff] }
 0x309   : > { %v1820_v0 = vshll.u32 %v1819_v29, 23  ;;  %v2036_v49 = vsub.s32 4, %v6627_v7  ;;  %v1622_v50 = vsel %vm5539_vm14, %v6612_v18, %v1619_v25  ;;  %vm5608_vm6 = vcmp.le.f32.partialorder %v1742_v24, 0.7853982 }
 0x30a   : > { %vm1744_vm9 = vcmp.lt.s32.totalorder %v4948_v23, 0  ;;  %v2244_v8 = vsub.s32 4, %v5363_v1  ;;  %3723 = vcosq.f32 %v2246_v40  ;;  %v1727_v12 = vsel %vm5549_vm0, 0, %v1725_v35 }
 0x30b   : > { %v1821_v51 = vor.u32 4788187, %v1820_v0  ;;  %v1829_v44 = vsel %vm1744_vm9, %v1828_v43, %v5497_v47  ;;  %v3716_v11 = vpop.eup %3715  ;;  %v2142_v24 = vsel %vm5560_vm4, %v6611_v57, %v2139_v5  ;;  %3725 = vsinq.f32 %v2246_v40 }
 0x30c   : > { %v1627_v26 = vadd.s32 3, %v1623_v61  ;;  %v1524_v31 = vand.u32 3, %v1523_v22  ;;  %v3718_v41 = vpop.eup %3717  ;;  %3727 = vcosq.f32 %v1622_v50  ;;  %v1824_v21 = vcvt.s32.f32 %v1817_v62 }
 0x30d   : > { %v1822_v55 = vand.u32 2147483647, %v1821_v51  ;;  %v2037_v30 = vsel %vm1952_vm12, %v2036_v49, %v6627_v7  ;;  %3729 = vsinq.f32 %v1622_v50  ;;  %v1831_v47 = vsel %vm5608_vm6, 0, %v1829_v44 }
 0x30e   : > { %v1731_v33 = vadd.s32 3, %v1727_v12  ;;  %v2245_v13 = vsel %vm2160_vm2, %v2244_v8, %v5363_v1  ;;  %3731 = vcosq.f32 %v2142_v24  ;;  %v2140_v9 = vsub.s32 4, %v5294_v63 }
 0x30f   : > { %v3720_v59 = vpop.eup %3719  ;;  %v1825_v10 = vmul.f32 %v1824_v21, %v1822_v55  ;;  %3733 = vsinq.f32 %v2142_v24  ;;  %v1527_v56 = vxor.u32 2147483648, %v3718_v41  ;;  %v1530_v38 = vxor.u32 2147483648, %v3716_v11 }
 0x310   : > { %v3722_v3 = vpop.eup %3721  ;;  %v2039_v39 = vsel %vm5513_vm10, 0, %v2037_v30  ;;  %v1835_v4 = vadd.s32 3, %v1831_v47  ;;  %v2247_v15 = vsel %vm5577_vm1, 0, %v2245_v13  ;;  %v1932_v43 = vsub.s32 4, %v6630_v34 }
 0x311   : > { %v1826_v42 = vxor.u32 2147483648, %v1825_v10  ;;  %v5636_v1 = vand.u32 3, %v1627_v26  ;;  %vm1529_vm12 = vcmp.eq.s32.totalorder %v1524_v31, 2  ;;  %v1732_v25 = vand.u32 3, %v1731_v33 }
 0x312   : > { %v1738_v53 = vxor.u32 2147483648, %v3720_v59  ;;  %v1735_v29 = vxor.u32 2147483648, %v3722_v3  ;;  %v2043_v5 = vadd.s32 3, %v2039_v39  ;;  %v2141_v58 = vsel %vm2056_vm8, %v2140_v9, %v5294_v63 }
 0x313   : > { %v1827_v28 = vsel %vm1744_vm9, %v1826_v42, %v1825_v10  ;;  %vm1526_vm10 = vcmp.eq.s32.totalorder %v1524_v31, 0  ;;  %v1531_v40 = vsel %vm1529_vm12, %v1530_v38, %v3718_v41  ;;  %vm1730_vm11 = vweird.f32 %v6603_v52 }
 0x314   : > { %v1830_v37 = vsel %vm5608_vm6, %v4948_v23, %v1827_v28  ;;  %v2251_v22 = vadd.s32 3, %v2247_v15  ;;  %v3724_v35 = vpop.eup %3723  ;;  %v5647_v61 = vand.u32 3, %v1835_v4  ;;  %v1528_v62 = vsel %vm1526_vm10, %v3716_v11, %v1527_v56 }
 0x315   : > { %3735 = vcosq.f32 %v1830_v37  ;;  %v1933_v0 = vsel %vm1848_vm13, %v1932_v43, %v6630_v34  ;;  %v3726_v7 = vpop.eup %3725  ;;  %vm1630_vm8 = vcmp.eq.s32.totalorder %v5636_v1, 0  ;;  %vm1633_vm14 = vcmp.eq.s32.totalorder %v5636_v1, 2 }
 0x316   : > { %3737 = vsinq.f32 %v1830_v37  ;;  %vm1734_vm15 = vcmp.eq.s32.totalorder %v1732_v25, 0  ;;  %vm1737_vm0 = vcmp.eq.s32.totalorder %v1732_v25, 2  ;;  %v2143_v63 = vsel %vm5560_vm4, 0, %v2141_v58  ;;  %v3728_v49 = vpop.eup %3727 }
 0x317   : > { %vm1525_vm2 = vcmp.lt.s32.totalorder %v1524_v31, 2  ;;  %v1736_v50 = vsel %vm1734_vm15, %v3720_v59, %v1735_v29  ;;  %v1739_v36 = vsel %vm1737_vm0, %v1738_v53, %v3722_v3  ;;  %v2044_v8 = vand.u32 3, %v2043_v5  ;;  %v3730_v51 = vpop.eup %3729 }
 0x318   : > { %v5656_v44 = vsel %vm1525_vm2, %v1528_v62, %v1531_v40  ;;  %v2047_v12 = vxor.u32 2147483648, %v5601_v45  ;;  %v2252_v11 = vand.u32 3, %v2251_v22  ;;  %v1935_v24 = vsel %vm5477_vm5, 0, %v1933_v0  ;;  %v3732_v26 = vpop.eup %3731 }
 0x319   : > { %vm1629_vm13 = vcmp.lt.s32.totalorder %v5636_v1, 2  ;;  %vm1733_vm3 = vcmp.lt.s32.totalorder %v1732_v25, 2  ;;  %v2255_v6 = vxor.u32 2147483648, %v3726_v7  ;;  %v2258_v41 = vxor.u32 2147483648, %v3724_v35  ;;  %v3734_v31 = vpop.eup %3733 }
 0x31a   : > { %v2147_v55 = vadd.s32 3, %v2143_v63  ;;  %vm1841_vm1 = vcmp.eq.s32.totalorder %v5647_v61, 2  ;;  %v1740_v21 = vsel %vm1733_vm3, %v1736_v50, %v1739_v36  ;;  %v2050_v30 = vxor.u32 2147483648, %v5588_v17 }
 0x31b   : > { %vm2250_vm6 = vweird.f32 %v6619_v32  ;;  %v1631_v47 = vxor.u32 2147483648, %v3730_v51  ;;  %v1634_v20 = vxor.u32 2147483648, %v3728_v49  ;;  %vm1837_vm5 = vcmp.lt.s32.totalorder %v5647_v61, 2 }
 0x31c   : > { %vm2045_vm9 = vcmp.lt.s32.totalorder %v2044_v8, 2  ;;  %v1939_v33 = vadd.s32 3, %v1935_v24  ;;  %vm1626_vm12 = vweird.f32 %v6612_v18  ;;  %vm1834_vm10 = vweird.f32 %v4948_v23 }
 0x31d   : > { %vm2042_vm15 = vweird.f32 %v6599_v16  ;;  %vm2046_vm0 = vcmp.eq.s32.totalorder %v2044_v8, 0  ;;  %vm2049_vm2 = vcmp.eq.s32.totalorder %v2044_v8, 2  ;;  %vm2254_vm7 = vcmp.eq.s32.totalorder %v2252_v11, 0  ;;  %v2265_v8 = vld [vmem:[%s6430_s5 + $0x18] sm:$0xff] }
 0x31e   : > { %vm2257_vm3 = vcmp.eq.s32.totalorder %v2252_v11, 2  ;;  %v1741_v13 = vsel %vm1730_vm11, nan, %v1740_v21  ;;  %v2256_v59 = vsel %vm2254_vm7, %v3724_v35, %v2255_v6  ;;  %v2148_v9 = vand.u32 3, %v2147_v55 }
 0x31f   : > { %v2259_v10 = vsel %vm2257_vm3, %v2258_v41, %v3726_v7  ;;  %v2048_v3 = vsel %vm2046_vm0, %v5588_v17, %v2047_v12  ;;  %v2051_v56 = vsel %vm2049_vm2, %v2050_v30, %v5601_v45  ;;  %v2151_v38 = vxor.u32 2147483648, %v3734_v31  ;;  %v3736_v42 = vpop.eup %3735  ;;  %v2278_v41 = vpop.permute.xlu1 %2277 }
 0x320   : > { %v2154_v39 = vxor.u32 2147483648, %v3732_v26  ;;  %v1632_v4 = vsel %vm1630_vm8, %v3728_v49, %v1631_v47  ;;  %v1635_v15 = vsel %vm1633_vm14, %v1634_v20, %v3730_v51  ;;  %vm2253_vm4 = vcmp.lt.s32.totalorder %v2252_v11, 2  ;;  %v3738_v52 = vpop.eup %3737  ;;  %v2273_v51 = vpop.permute.xlu0 %2272 }
 0x321   : > { %v1940_v34 = vand.u32 3, %v1939_v33  ;;  %v1842_v43 = vxor.u32 2147483648, %v3736_v42  ;;  %v2260_v25 = vsel %vm2253_vm4, %v2256_v59, %v2259_v10  ;;  %v1943_v53 = vxor.u32 2147483648, %v5573_v14 }
 0x322   : > { %v1946_v17 = vxor.u32 2147483648, %v5564_v2  ;;  %v1839_v28 = vxor.u32 2147483648, %v3738_v52  ;;  %v2052_v45 = vsel %vm2045_vm9, %v2048_v3, %v2051_v56  ;;  %vm2150_vm7 = vcmp.eq.s32.totalorder %v2148_v9, 0 }
 0x323   : > { %vm2153_vm11 = vcmp.eq.s32.totalorder %v2148_v9, 2  ;;  %v1636_v29 = vsel %vm1629_vm13, %v1632_v4, %v1635_v15  ;;  %v1843_v5 = vsel %vm1841_vm1, %v1842_v43, %v3738_v52  ;;  %v2152_v58 = vsel %vm2150_vm7, %v3732_v26, %v2151_v38 }
 0x324   : > { %v2155_v37 = vsel %vm2153_vm11, %v2154_v39, %v3734_v31  ;;  %vm6631_vm8 = vcmp.eq.s32.totalorder %v5647_v61, 0  ;;  %v2261_v22 = vsel %vm2250_vm6, nan, %v2260_v25  ;;  %vm1942_vm14 = vcmp.eq.s32.totalorder %v1940_v34, 0 }
 0x325   : > { %v1840_v40 = vsel %vm6631_vm8, %v3736_v42, %v1839_v28  ;;  %vm1945_vm4 = vcmp.eq.s32.totalorder %v1940_v34, 2  ;;  %v1944_v62 = vsel %vm1942_vm14, %v5564_v2, %v1943_v53  ;;  %vm2149_vm13 = vcmp.lt.s32.totalorder %v2148_v9, 2 }
 0x326   : > { %v1844_v35 = vsel %vm1837_vm5, %v1840_v40, %v1843_v5  ;;  %v1947_v1 = vsel %vm1945_vm4, %v1946_v17, %v5573_v14  ;;  %v1637_v0 = vsel %vm1626_vm12, nan, %v1636_v29  ;;  %v2053_v32 = vsel %vm2042_vm15, nan, %v2052_v45 }
 0x327   : > { %v1845_v7 = vsel %vm1834_vm10, nan, %v1844_v35  ;;  %v2156_v63 = vsel %vm2149_vm13, %v2152_v58, %v2155_v37  ;;  %vm6632_vm1 = vweird.f32 %v6602_v60  ;;  %v3513_v50 = vpack.c.bf16 %v2261_v22, %v2053_v32  ;;  %v2262_v60 = vld [vmem:[%s6430_s5] sm:$0xff] }
 0x328   : > { %v3509_v49 = vpack.c.bf16 %v1845_v7, %v1637_v0  ;;  %v1533_v61 = vsel %vm6632_vm1, nan, %v5656_v44  ;;  %vm1941_vm6 = vcmp.lt.s32.totalorder %v1940_v34, 2  ;;  %vm2146_vm5 = vweird.f32 %v6611_v57  ;;  %v2263_v57 = vld [vmem:[%s6430_s5 + $0x8] sm:$0xff] }
 0x329   : > { %v3511_v2 = vpack.c.bf16 %v1741_v13, %v1533_v61  ;;  %v1948_v14 = vsel %vm1941_vm6, %v1944_v62, %v1947_v1  ;;  %v2157_v18 = vsel %vm2146_vm5, nan, %v2156_v63  ;;  %vm1938_vm9 = vweird.f32 %v6595_v19  ;;  %v2264_v19 = vld [vmem:[%s6430_s5 + $0x10] sm:$0xff] }
 0x32a   : > { %3510 = vmatprep.subr.bf16.mxu1 %v3509_v49  ;;  %v1949_v23 = vsel %vm1938_vm9, nan, %v1948_v14  ;;  %vm6633_vm12 = vcmask 261120   ;;  %v6634_v36 = vmov 0.0   ;;  %v6638_v63 = vmov 920167782  }
 0x32b   : > { %3512 = vmatpush1.bf16.msra.mxu1 %v3511_v2  ;;  %v3515_v16 = vpack.c.bf16 %v2157_v18, %v1949_v23  ;;  %vm6635_vm10 = vmmov %vm6633_vm12  ;;  %v6639_v23 = vmov 1326507024  }
 0x32c   : > { %3514 = vmatprep.subr.bf16.mxu1 %v3513_v50  ;;  %vm6636_vm15 = vmmov %vm6635_vm10 }
 0x32d   : > { %vm6637_vm0 = vmmov %vm6635_vm10 }
 0x32f   : > { %3516 = vmatpush1.bf16.msra.mxu1 %v3515_v16 }
 0x332   : > { %3458 = vmatmul.mubr.msk.f32.vlgmr.msra.gmra.mrb[0].mxu1 %vm6633_vm12, %v2262_v60 }
 0x333   : > { %2372 = vmatprep.mubr.f32.mxu1 %v6634_v36 }
 0x336   : > { %3459 = vmatmul.mubr.msk.f32.gmra.mrb[2].mxu1 %vm6635_vm10, %v2263_v57 }
 0x337   : > { %2378 = vmatprep.mubr.f32.mxu1 %v6634_v36 }
 0x33a   : > { %3460 = vmatmul.mubr.msk.f32.gmra.mrb[4].mxu1 %vm6636_vm15, %v2264_v19 }
 0x33b   : > { %2384 = vmatprep.mubr.f32.mxu1 %v6634_v36 }
 0x33e   : > { %3461 = vmatmul.mubr.msk.f32.gmra.mrb[6].mxu1 %vm6637_vm0, %v2265_v8 }
 0x405   : > { %v2368_v44 = vpop.f32.mrb[0].mxu1 }
 0x406   : > { %v5724_v12 = vadd.f32 %v2368_v44, %v2273_v51  ;;  %v2370_v11 = vpop.f32.mrb[1].mxu1 }
 0x407   : > { %v5726_v24 = vadd.f32 %v2370_v11, %v2273_v51 }
 0x408   : > { %v2391_v26 = vand.u32 2147483647, %v5724_v12  ;;  %v2394_v6 = vand.u32 2139095040, %v5724_v12 }
 0x409   : > { %v2495_v55 = vand.u32 2147483647, %v5726_v24  ;;  %v2498_v31 = vand.u32 2139095040, %v5726_v24  ;;  %v2374_v21 = vpop.f32.mrb[2].mxu1 }
 0x40a   : > { %v2395_v30 = vshrl.u32 %v2394_v6, 23  ;;  %v5732_v47 = vadd.f32 %v2374_v21, %v2278_v41  ;;  %v2376_v20 = vpop.f32.mrb[3].mxu1  ;;  %v2398_v33 = vand.u32 8388607, %v2391_v26 }
 0x40b   : > { %v2499_v13 = vshrl.u32 %v2498_v31, 23  ;;  %v2502_v59 = vand.u32 8388607, %v2495_v55  ;;  %v5745_v45 = vadd.f32 %v2376_v20, %v2278_v41 }
 0x40c   : > { %v3462_v10 = vadd.s32 4294967169, %v2395_v30  ;;  %v2602_v3 = vand.u32 2139095040, %v5732_v47  ;;  %v2399_v39 = vor.u32 8388608, %v2398_v33  ;;  %v6515_v40 = vand.u32 2147483647, %v5732_v47 }
 0x40d   : > { %v3466_v9 = vadd.s32 4294967169, %v2499_v13  ;;  %v5739_v56 = vpop.f32.mrb[4].mxu1  ;;  %v2503_v42 = vor.u32 8388608, %v2502_v59 }
 0x40e   : > { %v2401_v38 = vadd.s32 1, %v3462_v10  ;;  %v2603_v15 = vshrl.u32 %v2602_v3, 23  ;;  %v5741_v34 = vpop.f32.mrb[5].mxu1  ;;  %v5749_v5 = vshll.u32 %v2399_v39, 8 }
 0x40f   : > { %v2505_v4 = vadd.s32 1, %v3466_v9  ;;  %v5753_v37 = vshll.u32 %v2503_v42, 8 }
 0x410   : > { %vm2402_vm2 = vcmp.gt.s32.totalorder %v2401_v38, 0  ;;  %v3470_v43 = vadd.s32 4294967169, %v2603_v15 }
 0x411   : > { %v2403_v52 = vsel %vm2402_vm2, %v2401_v38, 0  ;;  %vm2506_vm3 = vcmp.gt.s32.totalorder %v2505_v4, 0  ;;  %v5743_v25 = vpop.f32.mrb[6].mxu1 }
 0x412   : > { %v2404_v53 = vshrl.u32 %v2403_v52, 5  ;;  %v2405_v17 = vand.u32 31, %v2403_v52  ;;  %v2507_v28 = vsel %vm2506_vm3, %v2505_v4, 0  ;;  %v5747_v29 = vpop.f32.mrb[7].mxu1  ;;  %v5757_v1 = vadd.s32 1, %v3470_v43 }
 0x413   : > { %v5751_v58 = vshrl.u32 %v2507_v28, 5  ;;  %v2509_v62 = vand.u32 31, %v2507_v28 }
 0x414   : > { %v2406_v22 = vsub.s32 32, %v2405_v17  ;;  %v2408_v35 = vshll.u32 %v6529_v27, %v2405_v17  ;;  %v2411_v0 = vshll.u32 %v6536_v46, %v2405_v17  ;;  %v2414_v7 = vshll.u32 %v6533_v48, %v2405_v17 }
 0x415   : > { %v2417_v32 = vshll.u32 %v6530_v54, %v2405_v17  ;;  %v2420_v49 = vshll.u32 %v6638_v63, %v2405_v17  ;;  %vm2423_vm7 = vcmp.lt.s32.totalorder %v2404_v53, 1  ;;  %vm2424_vm11 = vcmp.lt.s32.totalorder %v2404_v53, 2 }
 0x416   : > { %v2409_v61 = vshrl.u32 %v6536_v46, %v2406_v22  ;;  %v2412_v50 = vshrl.u32 %v6533_v48, %v2406_v22  ;;  %v2415_v2 = vshrl.u32 %v6530_v54, %v2406_v22  ;;  %v2407_v14 = vshrl.u32 %v6529_v27, %v2406_v22 }
 0x417   : > { %v2418_v18 = vshrl.u32 %v6638_v63, %v2406_v22  ;;  %v2421_v16 = vshrl.u32 %v6639_v23, %v2406_v22  ;;  %v2510_v19 = vsub.s32 32, %v2509_v62  ;;  %vm2425_vm8 = vcmp.lt.s32.totalorder %v2404_v53, 3 }
 0x418   : > { %v2410_v60 = vor.u32 %v2409_v61, %v2408_v35  ;;  %v2413_v36 = vor.u32 %v2412_v50, %v2411_v0  ;;  %v2416_v57 = vor.u32 %v2415_v2, %v2414_v7  ;;  %vm2426_vm14 = vcmp.lt.s32.totalorder %v2404_v53, 4 }
 0x419   : > { %v2419_v8 = vor.u32 %v2418_v18, %v2417_v32  ;;  %v2422_v51 = vor.u32 %v2421_v16, %v2420_v49  ;;  %v2512_v20 = vshll.u32 %v6529_v27, %v2509_v62  ;;  %v2513_v59 = vshrl.u32 %v6536_v46, %v2510_v19 }
 0x41a   : > { %v2427_v44 = vsel %vm2423_vm7, %v2407_v14, %v2410_v60  ;;  %v2428_v11 = vsel %vm2426_vm14, %v2416_v57, 2102212464  ;;  %v2431_v6 = vsel %vm2423_vm7, %v2410_v60, %v2413_v36  ;;  %v2435_v41 = vsel %vm2423_vm7, %v2413_v36, %v2416_v57 }
 0x41b   : > { %v2429_v31 = vsel %vm2425_vm8, %v2413_v36, %v2428_v11  ;;  %v2432_v21 = vsel %vm2426_vm14, %v2419_v8, 920167782  ;;  %v2436_v30 = vsel %vm2426_vm14, %v2422_v51, 1326507024  ;;  %v2515_v10 = vshll.u32 %v6536_v46, %v2509_v62 }
 0x41c   : > { %v2433_v33 = vsel %vm2425_vm8, %v2416_v57, %v2432_v21  ;;  %v2437_v13 = vsel %vm2425_vm8, %v2419_v8, %v2436_v30  ;;  %v2430_v9 = vsel %vm2424_vm11, %v2427_v44, %v2429_v31  ;;  %v2516_v39 = vshrl.u32 %v6533_v48, %v2510_v19 }
 0x41d   : > { %v2434_v3 = vsel %vm2424_vm11, %v2431_v6, %v2433_v33  ;;  %v2438_v38 = vsel %vm2424_vm11, %v2435_v41, %v2437_v13  ;;  %v2514_v43 = vor.u32 %v2513_v59, %v2512_v20  ;;  %v2518_v28 = vshll.u32 %v6533_v48, %v2509_v62 }
 0x41e   : > { %v5780_v42 = vmul.u32.u64.low %v5749_v5, %v2438_v38  ;;  %v5781_v4 = vmul.u32.u64.high %v5749_v5, %v2438_v38, %v5780_v42  ;;  %v5784_v15 = vmul.u32.u64.low %v5749_v5, %v2434_v3  ;;  %v5785_v52 = vmul.u32.u64.high %v5749_v5, %v2434_v3, %v5784_v15 }
 0x41f   : > { %v2517_v17 = vor.u32 %v2516_v39, %v2515_v10  ;;  %v2519_v22 = vshrl.u32 %v6530_v54, %v2510_v19  ;;  %v2511_v53 = vshrl.u32 %v6529_v27, %v2510_v19  ;;  %v2521_v35 = vshll.u32 %v6530_v54, %v2509_v62 }
 0x420   : > { %v2522_v0 = vshrl.u32 %v6638_v63, %v2510_v19  ;;  %v2525_v7 = vshrl.u32 %v6639_v23, %v2510_v19  ;;  %v2446_v32 = vmul.u32 %v5749_v5, %v2430_v9  ;;  %v2524_v61 = vshll.u32 %v6638_v63, %v2509_v62 }
 0x421   : > { %v2520_v49 = vor.u32 %v2519_v22, %v2518_v28  ;;  %vm2527_vm4 = vcmp.lt.s32.totalorder %v5751_v58, 1  ;;  %vm2448_vm13 = vc.u32 %v5781_v4, %v5784_v15  ;;  %v2449_v50 = vadd.s32 1, %v5785_v52 }
 0x422   : > { %v2523_v2 = vor.u32 %v2522_v0, %v2521_v35  ;;  %vm2528_vm1 = vcmp.lt.s32.totalorder %v5751_v58, 2  ;;  %v2526_v14 = vor.u32 %v2525_v7, %v2524_v61  ;;  %vm2529_vm6 = vcmp.lt.s32.totalorder %v5751_v58, 3 }
 0x423   : > { %vm2530_vm5 = vcmp.lt.s32.totalorder %v5751_v58, 4  ;;  %v2535_v18 = vsel %vm2527_vm4, %v2514_v43, %v2517_v17  ;;  %v2450_v5 = vsel %vm2448_vm13, %v2449_v50, %v5785_v52  ;;  %v2539_v60 = vsel %vm2527_vm4, %v2517_v17, %v2520_v49 }
 0x424   : > { %v2532_v16 = vsel %vm2530_vm5, %v2520_v49, 2102212464  ;;  %v2536_v62 = vsel %vm2530_vm5, %v2523_v2, 920167782  ;;  %v2451_v36 = vadd.s32 %v2450_v5, %v2446_v32  ;;  %v2531_v57 = vsel %vm2527_vm4, %v2511_v53, %v2514_v43 }
 0x425   : > { %v2537_v19 = vsel %vm2529_vm6, %v2520_v49, %v2536_v62  ;;  %v2540_v8 = vsel %vm2530_vm5, %v2526_v14, 1326507024  ;;  %v2533_v51 = vsel %vm2529_vm6, %v2517_v17, %v2532_v16  ;;  %vm2610_vm9 = vcmp.gt.s32.totalorder %v5757_v1, 0 }
 0x426   : > { %v2538_v44 = vsel %vm2528_vm1, %v2535_v18, %v2537_v19  ;;  %v2541_v11 = vsel %vm2529_vm6, %v2523_v2, %v2540_v8  ;;  %v2452_v6 = vadd.s32 536870912, %v2451_v36  ;;  %v2606_v33 = vand.u32 8388607, %v6515_v40 }
 0x427   : > { %v2542_v41 = vsel %vm2528_vm1, %v2539_v60, %v2541_v11  ;;  %v5810_v31 = vmul.u32.u64.low %v5753_v37, %v2538_v44  ;;  %v5811_v21 = vmul.u32.u64.high %v5753_v37, %v2538_v44, %v5810_v31  ;;  %v2611_v13 = vsel %vm2610_vm9, %v5757_v1, 0 }
 0x428   : > { %v5815_v30 = vmul.u32.u64.low %v5753_v37, %v2542_v41  ;;  %v5816_v20 = vmul.u32.u64.high %v5753_v37, %v2542_v41, %v5815_v30  ;;  %v5821_v59 = vshrl.u32 %v2452_v6, 30  ;;  %v2534_v10 = vsel %vm2528_vm1, %v2531_v57, %v2533_v51 }
 0x429   : > { %v2613_v9 = vand.u32 31, %v2611_v13  ;;  %v2706_v3 = vand.u32 2139095040, %v5745_v45  ;;  %v2553_v39 = vadd.s32 1, %v5811_v21  ;;  %v2550_v52 = vmul.u32 %v5753_v37, %v2534_v10 }
 0x42a   : > { %v2454_v38 = vshll.u32 %v5821_v59, 30  ;;  %vm2552_vm12 = vc.u32 %v5816_v20, %v5810_v31  ;;  %v2607_v43 = vor.u32 8388608, %v2606_v33  ;;  %v2612_v7 = vshrl.u32 %v2611_v13, 5 }
 0x42b   : > { %v2614_v42 = vsub.s32 32, %v2613_v9  ;;  %v2554_v17 = vsel %vm2552_vm12, %v2553_v39, %v5811_v21  ;;  %v2707_v58 = vshrl.u32 %v2706_v3, 23  ;;  %v2616_v22 = vshll.u32 %v6529_v27, %v2613_v9 }
 0x42c   : > { %v5831_v1 = vsub.s32 %v2451_v36, %v2454_v38  ;;  %v2555_v28 = vadd.s32 %v2554_v17, %v2550_v52  ;;  %v2619_v37 = vshll.u32 %v6536_v46, %v2613_v9  ;;  %v2622_v50 = vshll.u32 %v6533_v48, %v2613_v9 }
 0x42d   : > { %v2617_v53 = vshrl.u32 %v6536_v46, %v2614_v42  ;;  %v2620_v35 = vshrl.u32 %v6533_v48, %v2614_v42  ;;  %v2623_v32 = vshrl.u32 %v6530_v54, %v2614_v42  ;;  %v2647_v2 = vshll.u32 %v2607_v43, 8 }
 0x42e   : > { %v2457_v0 = vsub.s32 0, %v5831_v1  ;;  %v2556_v49 = vadd.s32 536870912, %v2555_v28  ;;  %v2625_v5 = vshll.u32 %v6530_v54, %v2613_v9  ;;  %v2626_v16 = vshrl.u32 %v6638_v63, %v2614_v42 }
 0x42f   : > { %v2618_v61 = vor.u32 %v2617_v53, %v2616_v22  ;;  %v2621_v18 = vor.u32 %v2620_v35, %v2619_v37  ;;  %v2624_v60 = vor.u32 %v2623_v32, %v2622_v50  ;;  %v2628_v36 = vshll.u32 %v6638_v63, %v2613_v9 }
 0x430   : > { %v3463_v14 = vmin.u32 %v2457_v0, %v5831_v1  ;;  %v5844_v62 = vshrl.u32 %v2556_v49, 30  ;;  %v2629_v57 = vshrl.u32 %v6639_v23, %v2614_v42  ;;  %v2627_v8 = vor.u32 %v2626_v16, %v2625_v5 }
 0x431   : > { %vm2631_vm10 = vcmp.lt.s32.totalorder %v2612_v7, 1  ;;  %v3474_v51 = vadd.s32 4294967169, %v2707_v58  ;;  %vm2632_vm15 = vcmp.lt.s32.totalorder %v2612_v7, 2  ;;  %vm2634_vm0 = vcmp.lt.s32.totalorder %v2612_v7, 4 }
 0x432   : > { %v2459_v19 = vclz %v3463_v14  ;;  %v2558_v44 = vshll.u32 %v5844_v62, 30  ;;  %v2630_v11 = vor.u32 %v2629_v57, %v2628_v36  ;;  %vm2633_vm2 = vcmp.lt.s32.totalorder %v2612_v7, 3 }
 0x433   : > { %v2639_v41 = vsel %vm2631_vm10, %v2618_v61, %v2621_v18  ;;  %v2640_v21 = vsel %vm2634_vm0, %v2627_v8, 920167782  ;;  %v2636_v33 = vsel %vm2634_vm0, %v2624_v60, 2102212464  ;;  %v2643_v10 = vsel %vm2631_vm10, %v2621_v18, %v2624_v60 }
 0x434   : > { %v3464_v6 = vadd.s32 4294967294, %v2459_v19  ;;  %v5850_v30 = vsub.s32 %v2555_v28, %v2558_v44  ;;  %v2641_v13 = vsel %vm2633_vm2, %v2624_v60, %v2640_v21  ;;  %v2615_v9 = vshrl.u32 %v6529_v27, %v2614_v42 }
 0x435   : > { %v2642_v3 = vsel %vm2632_vm15, %v2639_v41, %v2641_v13  ;;  %v2644_v38 = vsel %vm2634_vm0, %v2630_v11, 1326507024  ;;  %v2713_v17 = vadd.s32 1, %v3474_v51  ;;  %v2637_v22 = vsel %vm2633_vm2, %v2621_v18, %v2636_v33  ;;  %v2283_v41 = vpop.permute.xlu0 %2282 }
 0x436   : > { %vm3465_vm3 = vcmp.lt.s32.totalorder %v3464_v6, 0  ;;  %v2561_v52 = vsub.s32 0, %v5850_v30  ;;  %v2645_v43 = vsel %vm2633_vm2, %v2627_v8, %v2644_v38  ;;  %v2635_v28 = vsel %vm2631_vm10, %v2615_v9, %v2618_v61 }
 0x437   : > { %v2462_v39 = vsel %vm3465_vm3, 0, %v3464_v6  ;;  %v2646_v53 = vsel %vm2632_vm15, %v2643_v10, %v2645_v43  ;;  %vm2714_vm7 = vcmp.gt.s32.totalorder %v2713_v17, 0  ;;  %v6514_v50 = vand.u32 2147483647, %v5745_v45 }
 0x438   : > { %v2467_v58 = vsub.s32 4294967266, %v2462_v39  ;;  %v3467_v35 = vmin.u32 %v2561_v52, %v5850_v30  ;;  %v5862_v0 = vmul.u32.u64.low %v2647_v2, %v2646_v53  ;;  %v5863_v42 = vmul.u32.u64.high %v2647_v2, %v2646_v53, %v5862_v0 }
 0x439   : > { %v5865_v37 = vmul.u32.u64.low %v2647_v2, %v2642_v3  ;;  %v5866_v32 = vmul.u32.u64.high %v2647_v2, %v2642_v3, %v5865_v37  ;;  %v2715_v14 = vsel %vm2714_vm7, %v2713_v17, 0  ;;  %v2463_v5 = vsub.s32 32, %v2462_v39 }
 0x43a   : > { %v2563_v49 = vclz %v3467_v35  ;;  %v2468_v61 = vadd.s32 127, %v2467_v58  ;;  %v2638_v18 = vsel %vm2632_vm15, %v2635_v28, %v2637_v22  ;;  %v2717_v16 = vand.u32 31, %v2715_v14 }
 0x43b   : > { %vm2656_vm11 = vc.u32 %v5863_v42, %v5865_v37  ;;  %v2447_v36 = vadd.s32 %v5784_v15, %v5781_v4  ;;  %v2657_v57 = vadd.s32 1, %v5866_v32  ;;  %v2654_v19 = vmul.u32 %v2647_v2, %v2638_v18 }
 0x43c   : > { %v3468_v60 = vadd.s32 4294967294, %v2563_v49  ;;  %v2710_v8 = vand.u32 8388607, %v6514_v50  ;;  %v2469_v44 = vshll.u32 %v2468_v61, 23  ;;  %v2718_v11 = vsub.s32 32, %v2717_v16 }
 0x43d   : > { %v2465_v51 = vshrl.u32 %v2447_v36, %v2463_v5  ;;  %v2658_v7 = vsel %vm2656_vm11, %v2657_v57, %v5866_v32  ;;  %v2464_v21 = vshll.u32 %v5831_v1, %v2462_v39  ;;  %v5881_v4 = vadd.f32 %v5739_v56, %v2283_v41 }
 0x43e   : > { %vm3469_vm8 = vcmp.lt.s32.totalorder %v3468_v60, 0  ;;  %v2659_v6 = vadd.s32 %v2658_v7, %v2654_v19  ;;  %v2711_v10 = vor.u32 8388608, %v2710_v8  ;;  %v2470_v2 = vor.u32 4788187, %v2469_v44 }
 0x43f   : > { %v2566_v33 = vsel %vm3469_vm8, 0, %v3468_v60  ;;  %v2466_v15 = vor.u32 %v2465_v51, %v2464_v21  ;;  %v2721_v9 = vshrl.u32 %v6536_v46, %v2718_v11  ;;  %v2724_v3 = vshrl.u32 %v6533_v48, %v2718_v11 }
 0x440   : > { %v2660_v13 = vadd.s32 536870912, %v2659_v6  ;;  %v2571_v38 = vsub.s32 4294967266, %v2566_v33  ;;  %v2727_v43 = vshrl.u32 %v6530_v54, %v2718_v11  ;;  %v2730_v17 = vshrl.u32 %v6638_v63, %v2718_v11 }
 0x441   : > { %v2720_v1 = vshll.u32 %v6529_v27, %v2717_v16  ;;  %v2723_v39 = vshll.u32 %v6536_v46, %v2717_v16  ;;  %v2729_v56 = vshll.u32 %v6530_v54, %v2717_v16  ;;  %v2733_v58 = vshrl.u32 %v6639_v23, %v2718_v11 }
 0x442   : > { %v5885_v52 = vshrl.u32 %v2660_v13, 30  ;;  %v2716_v22 = vshrl.u32 %v2715_v14, 5  ;;  %v2726_v53 = vshll.u32 %v6533_v48, %v2717_v16  ;;  %v5896_v35 = vadd.f32 %v5741_v34, %v2283_v41 }
 0x443   : > { %v2722_v0 = vor.u32 %v2721_v9, %v2720_v1  ;;  %v2725_v32 = vor.u32 %v2724_v3, %v2723_v39  ;;  %v2731_v49 = vor.u32 %v2730_v17, %v2729_v56  ;;  %v2732_v5 = vshll.u32 %v6638_v63, %v2717_v16 }
 0x444   : > { %v2662_v28 = vshll.u32 %v5885_v52, 30  ;;  %v2551_v61 = vadd.s32 %v5810_v31, %v5816_v20  ;;  %v2572_v18 = vadd.s32 127, %v2571_v38  ;;  %v2728_v36 = vor.u32 %v2727_v43, %v2726_v53 }
 0x445   : > { %v2471_v57 = vand.u32 2147483647, %v2470_v2  ;;  %v2473_v19 = vcvt.s32.f32 %v2466_v15  ;;  %v2734_v14 = vor.u32 %v2733_v58, %v2732_v5  ;;  %v2751_v8 = vshll.u32 %v2711_v10, 8 }
 0x446   : > { %v5901_v60 = vsub.s32 %v2659_v6, %v2662_v28  ;;  %v2567_v51 = vsub.s32 32, %v2566_v33  ;;  %vm2735_vm14 = vcmp.lt.s32.totalorder %v2716_v22, 1  ;;  %vm2738_vm4 = vcmp.lt.s32.totalorder %v2716_v22, 4 }
 0x447   : > { %v2719_v44 = vshrl.u32 %v6529_v27, %v2718_v11  ;;  %vm2737_vm13 = vcmp.lt.s32.totalorder %v2716_v22, 3  ;;  %v2743_v16 = vsel %vm2735_vm14, %v2722_v0, %v2725_v32  ;;  %v2744_v7 = vsel %vm2738_vm4, %v2731_v49, 920167782 }
 0x448   : > { %v2665_v34 = vsub.s32 0, %v5901_v60  ;;  %v2573_v31 = vshll.u32 %v2572_v18, 23  ;;  %vm2736_vm1 = vcmp.lt.s32.totalorder %v2716_v22, 2  ;;  %v2740_v20 = vsel %vm2738_vm4, %v2728_v36, 2102212464 }
 0x449   : > { %v2745_v6 = vsel %vm2737_vm13, %v2728_v36, %v2744_v7  ;;  %v2747_v13 = vsel %vm2735_vm14, %v2725_v32, %v2728_v36  ;;  %v2748_v10 = vsel %vm2738_vm4, %v2734_v14, 1326507024  ;;  %v2568_v15 = vshll.u32 %v5850_v30, %v2566_v33 }
 0x44a   : > { %v3471_v41 = vmin.u32 %v2665_v34, %v5901_v60  ;;  %v2746_v21 = vsel %vm2736_vm1, %v2743_v16, %v2745_v6  ;;  %v2569_v2 = vshrl.u32 %v2551_v61, %v2567_v51  ;;  %v2739_v11 = vsel %vm2735_vm14, %v2719_v44, %v2722_v0  ;;  %v5936_v6 = vpop.permute.xlu1 %2287 }
 0x44b   : > { %v2749_v9 = vsel %vm2737_vm13, %v2731_v49, %v2748_v10  ;;  %v2741_v3 = vsel %vm2737_vm13, %v2725_v32, %v2740_v20  ;;  %v5912_v43 = vmul.u32.u64.low %v2751_v8, %v2746_v21  ;;  %v5913_v17 = vmul.u32.u64.high %v2751_v8, %v2746_v21, %v5912_v43 }
 0x44c   : > { %v2750_v38 = vsel %vm2736_vm1, %v2747_v13, %v2749_v9  ;;  %v2474_v1 = vmul.f32 %v2473_v19, %v2471_v57  ;;  %v2574_v39 = vor.u32 4788187, %v2573_v31  ;;  %v2667_v28 = vclz %v3471_v41 }
 0x44d   : > { %v5916_v56 = vmul.u32.u64.low %v2751_v8, %v2750_v38  ;;  %v5917_v58 = vmul.u32.u64.high %v2751_v8, %v2750_v38, %v5916_v56  ;;  %v2810_v53 = vand.u32 2139095040, %v5881_v4  ;;  %v2570_v30 = vor.u32 %v2569_v2, %v2568_v15 }
 0x44e   : > { %v2742_v33 = vsel %vm2736_vm1, %v2739_v11, %v2741_v3  ;;  %v2914_v0 = vand.u32 2139095040, %v5896_v35  ;;  %v2761_v32 = vadd.s32 1, %v5913_v17  ;;  %v2475_v5 = vxor.u32 2147483648, %v2474_v1 }
 0x44f   : > { %v2811_v49 = vshrl.u32 %v2810_v53, 23  ;;  %v2477_v61 = vsub.s32 4, %v5821_v59  ;;  %v2575_v18 = vand.u32 2147483647, %v2574_v39  ;;  %v6513_v36 = vand.u32 2147483647, %v5881_v4 }
 0x450   : > { %v3472_v57 = vadd.s32 4294967294, %v2667_v28  ;;  %v2758_v19 = vmul.u32 %v2751_v8, %v2742_v33  ;;  %vm2760_vm6 = vc.u32 %v5917_v58, %v5912_v43  ;;  %v2577_v51 = vcvt.s32.f32 %v2570_v30 }
 0x451   : > { %v3478_v14 = vadd.s32 4294967169, %v2811_v49  ;;  %v2762_v22 = vsel %vm2760_vm6, %v2761_v32, %v5913_v17  ;;  %v2915_v34 = vshrl.u32 %v2914_v0, 23  ;;  %vm2393_vm5 = vcmp.lt.s32.totalorder %v5724_v12, 0 }
 0x452   : > { %v2763_v44 = vadd.s32 %v2762_v22, %v2758_v19  ;;  %v2476_v7 = vsel %vm2393_vm5, %v2475_v5, %v2474_v1  ;;  %v5930_v31 = vsel %vm2393_vm5, %v2477_v61, %v5821_v59  ;;  %v5932_v20 = vmul.f32 %v2577_v51, %v2575_v18 }
 0x453   : > { %v2817_v16 = vadd.s32 1, %v3478_v14  ;;  %v2814_v8 = vand.u32 8388607, %v6513_v36  ;;  %vm3473_vm9 = vcmp.lt.s32.totalorder %v3472_v57, 0  ;;  %v3482_v21 = vadd.s32 4294967169, %v2915_v34 }
 0x454   : > { %v2764_v41 = vadd.s32 536870912, %v2763_v44  ;;  %vm5940_vm10 = vcmp.le.f32.partialorder %v2391_v26, 0.7853982  ;;  %v5946_v59 = vadd.f32 %v5743_v25, %v5936_v6  ;;  %v5953_v2 = vadd.s32 %v5865_v37, %v5863_v42 }
 0x455   : > { %vm2818_vm12 = vcmp.gt.s32.totalorder %v2817_v16, 0  ;;  %v5960_v26 = vsel %vm5940_vm10, %v5724_v12, %v2476_v7  ;;  %v2579_v3 = vxor.u32 2147483648, %v5932_v20  ;;  %v5963_v25 = vsel %vm3473_vm9, 0, %v3472_v57 }
 0x456   : > { %v2819_v10 = vsel %vm2818_vm12, %v2817_v16, 0  ;;  %v5955_v11 = vshrl.u32 %v2764_v41, 30  ;;  %v2815_v1 = vor.u32 8388608, %v2814_v8  ;;  %v2921_v42 = vadd.s32 1, %v3482_v21 }
 0x457   : > { %v2821_v9 = vand.u32 31, %v2819_v10  ;;  %v2820_v37 = vshrl.u32 %v2819_v10, 5  ;;  %v6512_v51 = vand.u32 2147483647, %v5896_v35  ;;  %vm2497_vm15 = vcmp.lt.s32.totalorder %v5726_v24, 0 }
 0x458   : > { %v2766_v17 = vshll.u32 %v5955_v11, 30  ;;  %v2675_v22 = vsub.s32 4294967266, %v5963_v25  ;;  %v2855_v8 = vshll.u32 %v2815_v1, 8  ;;  %vm2922_vm2 = vcmp.gt.s32.totalorder %v2921_v42, 0 }
 0x459   : > { %v2822_v39 = vsub.s32 32, %v2821_v9  ;;  %v2824_v56 = vshll.u32 %v6529_v27, %v2821_v9  ;;  %v2827_v28 = vshll.u32 %v6536_v46, %v2821_v9  ;;  %v2830_v53 = vshll.u32 %v6533_v48, %v2821_v9 }
 0x45a   : > { %v5970_v30 = vsub.s32 %v2763_v44, %v2766_v17  ;;  %v2833_v32 = vshll.u32 %v6530_v54, %v2821_v9  ;;  %v2836_v61 = vshll.u32 %v6638_v63, %v2821_v9  ;;  %vm2839_vm0 = vcmp.lt.s32.totalorder %v2820_v37, 1 }
 0x45b   : > { %v2825_v33 = vshrl.u32 %v6536_v46, %v2822_v39  ;;  %v2828_v0 = vshrl.u32 %v6533_v48, %v2822_v39  ;;  %v2831_v49 = vshrl.u32 %v6530_v54, %v2822_v39  ;;  %v2834_v5 = vshrl.u32 %v6638_v63, %v2822_v39 }
 0x45c   : > { %v2837_v18 = vshrl.u32 %v6639_v23, %v2822_v39  ;;  %v2769_v57 = vsub.s32 0, %v5970_v30  ;;  %v2823_v41 = vshrl.u32 %v6529_v27, %v2822_v39  ;;  %vm2840_vm3 = vcmp.lt.s32.totalorder %v2820_v37, 2 }
 0x45d   : > { %v2826_v19 = vor.u32 %v2825_v33, %v2824_v56  ;;  %v2829_v14 = vor.u32 %v2828_v0, %v2827_v28  ;;  %v2832_v34 = vor.u32 %v2831_v49, %v2830_v53  ;;  %v2835_v44 = vor.u32 %v2834_v5, %v2833_v32 }
 0x45e   : > { %v2838_v16 = vor.u32 %v2837_v18, %v2836_v61  ;;  %v3475_v7 = vmin.u32 %v2769_v57, %v5970_v30  ;;  %vm2842_vm7 = vcmp.lt.s32.totalorder %v2820_v37, 4  ;;  %vm2841_vm11 = vcmp.lt.s32.totalorder %v2820_v37, 3 }
 0x45f   : > { %v2847_v21 = vsel %vm2839_vm0, %v2826_v19, %v2829_v14  ;;  %v2844_v9 = vsel %vm2842_vm7, %v2832_v34, 2102212464  ;;  %v2848_v17 = vsel %vm2842_vm7, %v2835_v44, 920167782  ;;  %v2843_v56 = vsel %vm2839_vm0, %v2823_v41, %v2826_v19 }
 0x460   : > { %v2771_v10 = vclz %v3475_v7  ;;  %v2849_v28 = vsel %vm2841_vm11, %v2832_v34, %v2848_v17  ;;  %v2851_v33 = vsel %vm2839_vm0, %v2829_v14, %v2832_v34  ;;  %v2852_v53 = vsel %vm2842_vm7, %v2838_v16, 1326507024 }
 0x461   : > { %v2845_v32 = vsel %vm2841_vm11, %v2829_v14, %v2844_v9  ;;  %v2850_v49 = vsel %vm2840_vm3, %v2847_v21, %v2849_v28  ;;  %v2853_v5 = vsel %vm2841_vm11, %v2835_v44, %v2852_v53  ;;  %v2676_v1 = vadd.s32 127, %v2675_v22 }
 0x462   : > { %v3476_v0 = vadd.s32 4294967294, %v2771_v10  ;;  %v2854_v61 = vsel %vm2840_vm3, %v2851_v33, %v2853_v5  ;;  %v5987_v39 = vmul.u32.u64.low %v2855_v8, %v2850_v49  ;;  %v5988_v18 = vmul.u32.u64.high %v2855_v8, %v2850_v49, %v5987_v39 }
 0x463   : > { %v5991_v57 = vmul.u32.u64.low %v2855_v8, %v2854_v61  ;;  %v5992_v7 = vmul.u32.u64.high %v2855_v8, %v2854_v61, %v5991_v57  ;;  %v2923_v19 = vsel %vm2922_vm2, %v2921_v42, 0  ;;  %v2846_v14 = vsel %vm2840_vm3, %v2843_v56, %v2845_v32 }
 0x464   : > { %vm3477_vm8 = vcmp.lt.s32.totalorder %v3476_v0, 0  ;;  %v2918_v44 = vand.u32 8388607, %v6512_v51  ;;  %v2925_v22 = vand.u32 31, %v2923_v19  ;;  %v6003_v16 = vsel %vm2497_vm15, %v2579_v3, %v5932_v20 }
 0x465   : > { %v5995_v34 = vsel %vm3477_vm8, 0, %v3476_v0  ;;  %v2671_v41 = vsub.s32 32, %v5963_v25  ;;  %v3018_v10 = vand.u32 2139095040, %v5946_v59  ;;  %v2865_v9 = vadd.s32 1, %v5988_v18 }
 0x466   : > { %v2779_v37 = vsub.s32 4294967266, %v5995_v34  ;;  %v2926_v17 = vsub.s32 32, %v2925_v22  ;;  %v2677_v56 = vshll.u32 %v2676_v1, 23  ;;  %v2759_v28 = vadd.s32 %v5912_v43, %v5917_v58 }
 0x467   : > { %v2862_v20 = vmul.u32 %v2855_v8, %v2846_v14  ;;  %vm2864_vm14 = vc.u32 %v5992_v7, %v5987_v39  ;;  %v2919_v33 = vor.u32 8388608, %v2918_v44  ;;  %v2775_v32 = vsub.s32 32, %v5995_v34 }
 0x468   : > { %v2866_v3 = vsel %vm2864_vm14, %v2865_v9, %v5988_v18  ;;  %v2929_v53 = vshrl.u32 %v6536_v46, %v2926_v17  ;;  %v2932_v0 = vshrl.u32 %v6533_v48, %v2926_v17  ;;  %v2924_v5 = vshrl.u32 %v2923_v19, 5 }
 0x469   : > { %v2867_v49 = vadd.s32 %v2866_v3, %v2862_v20  ;;  %v3019_v61 = vshrl.u32 %v3018_v10, 23  ;;  %v2780_v1 = vadd.s32 127, %v2779_v37  ;;  %v2928_v57 = vshll.u32 %v6529_v27, %v2925_v22 }
 0x46a   : > { %v2931_v43 = vshll.u32 %v6536_v46, %v2925_v22  ;;  %v2935_v58 = vshrl.u32 %v6530_v54, %v2926_v17  ;;  %v2934_v18 = vshll.u32 %v6533_v48, %v2925_v22  ;;  %v2937_v14 = vshll.u32 %v6530_v54, %v2925_v22 }
 0x46b   : > { %v2868_v8 = vadd.s32 536870912, %v2867_v49  ;;  %v2938_v44 = vshrl.u32 %v6638_v63, %v2926_v17  ;;  %vm6028_vm4 = vcmp.le.f32.partialorder %v2495_v55, 0.7853982  ;;  %v2930_v19 = vor.u32 %v2929_v53, %v2928_v57 }
 0x46c   : > { %v2933_v10 = vor.u32 %v2932_v0, %v2931_v43  ;;  %v2940_v37 = vshll.u32 %v6638_v63, %v2925_v22  ;;  %v2941_v20 = vshrl.u32 %v6639_v23, %v2926_v17  ;;  %v2673_v3 = vshrl.u32 %v5953_v2, %v2671_v41 }
 0x46d   : > { %v6035_v51 = vshrl.u32 %v2868_v8, 30  ;;  %v2936_v36 = vor.u32 %v2935_v58, %v2934_v18  ;;  %v2939_v15 = vor.u32 %v2938_v44, %v2937_v14  ;;  %v2678_v50 = vor.u32 4788187, %v2677_v56 }
 0x46e   : > { %v2942_v40 = vor.u32 %v2941_v20, %v2940_v37  ;;  %v2959_v38 = vshll.u32 %v2919_v33, 8  ;;  %v3486_v21 = vadd.s32 4294967169, %v3019_v61  ;;  %v2781_v55 = vshll.u32 %v2780_v1, 23 }
 0x46f   : > { %v2870_v42 = vshll.u32 %v6035_v51, 30  ;;  %vm2943_vm13 = vcmp.lt.s32.totalorder %v2924_v5, 1  ;;  %vm2946_vm1 = vcmp.lt.s32.totalorder %v2924_v5, 4  ;;  %vm2601_vm6 = vcmp.lt.s32.totalorder %v5732_v47, 0 }
 0x470   : > { %v2776_v22 = vshll.u32 %v5970_v30, %v5995_v34  ;;  %v2777_v53 = vshrl.u32 %v2759_v28, %v2775_v32  ;;  %v2951_v2 = vsel %vm2943_vm13, %v2930_v19, %v2933_v10  ;;  %v2952_v41 = vsel %vm2946_vm1, %v2939_v15, 920167782 }
 0x471   : > { %v6042_v0 = vsub.s32 %v2867_v49, %v2870_v42  ;;  %v2927_v56 = vshrl.u32 %v6529_v27, %v2926_v17  ;;  %vm2945_vm5 = vcmp.lt.s32.totalorder %v2924_v5, 3  ;;  %v2948_v33 = vsel %vm2946_vm1, %v2936_v36, 2102212464 }
 0x472   : > { %vm2944_vm9 = vcmp.lt.s32.totalorder %v2924_v5, 2  ;;  %v2953_v61 = vsel %vm2945_vm5, %v2936_v36, %v2952_v41  ;;  %v2955_v1 = vsel %vm2943_vm13, %v2933_v10, %v2936_v36  ;;  %v2956_v57 = vsel %vm2946_vm1, %v2942_v40, 1326507024 }
 0x473   : > { %v2782_v43 = vor.u32 4788187, %v2781_v55  ;;  %v2873_v58 = vsub.s32 0, %v6042_v0  ;;  %v2947_v30 = vsel %vm2943_vm13, %v2927_v56, %v2930_v19  ;;  %v2954_v34 = vsel %vm2944_vm9, %v2951_v2, %v2953_v61 }
 0x474   : > { %v2949_v28 = vsel %vm2945_vm5, %v2933_v10, %v2948_v33  ;;  %v2957_v32 = vsel %vm2945_vm5, %v2939_v15, %v2956_v57  ;;  %v6049_v42 = vmul.u32.u64.low %v2959_v38, %v2954_v34  ;;  %v6050_v49 = vmul.u32.u64.high %v2959_v38, %v2954_v34, %v6049_v42 }
 0x475   : > { %v2583_v17 = vsel %vm6028_vm4, %v5726_v24, %v6003_v16  ;;  %v3479_v40 = vmin.u32 %v2873_v58, %v6042_v0  ;;  %v2958_v36 = vsel %vm2944_vm9, %v2955_v1, %v2957_v32  ;;  %v3025_v8 = vadd.s32 1, %v3486_v21 }
 0x476   : > { %v6644_v18 = vshll.u32 %v5901_v60, %v5963_v25  ;;  %v2778_v44 = vor.u32 %v2777_v53, %v2776_v22  ;;  %v6062_v15 = vmul.u32.u64.low %v2959_v38, %v2958_v36  ;;  %v6063_v19 = vmul.u32.u64.high %v2959_v38, %v2958_v36, %v6062_v15 }
 0x477   : > { %v2679_v10 = vand.u32 2147483647, %v2678_v50  ;;  %v2875_v37 = vclz %v3479_v40  ;;  %v2950_v20 = vsel %vm2944_vm9, %v2947_v30, %v2949_v28  ;;  %vm3026_vm12 = vcmp.gt.s32.totalorder %v3025_v8, 0 }
 0x478   : > { %v2674_v14 = vor.u32 %v2673_v3, %v6644_v18  ;;  %v2783_v55 = vand.u32 2147483647, %v2782_v43  ;;  %v2969_v16 = vadd.s32 1, %v6050_v49  ;;  %v6645_v2 = vand.u32 2147483647, %v5946_v59 }
 0x479   : > { %v3027_v21 = vsel %vm3026_vm12, %v3025_v8, 0  ;;  %3739 = vcosq.f32 %v2583_v17  ;;  %v6646_v60 = vsub.s32 4, %v5885_v52  ;;  %v3480_v50 = vadd.s32 4294967294, %v2875_v37 }
 0x47a   : > { %v3022_v41 = vand.u32 8388607, %v6645_v2  ;;  %v3029_v3 = vand.u32 31, %v3027_v21  ;;  %v2681_v5 = vcvt.s32.f32 %v2674_v14  ;;  %v2785_v22 = vcvt.s32.f32 %v2778_v44 }
 0x47b   : > { %v6074_v25 = vsel %vm2601_vm6, %v6646_v60, %v5885_v52  ;;  %v2966_v53 = vmul.u32 %v2959_v38, %v2950_v20  ;;  %vm2968_vm0 = vc.u32 %v6063_v19, %v6049_v42  ;;  %3741 = vsinq.f32 %v2583_v17 }
 0x47c   : > { %vm3481_vm2 = vcmp.lt.s32.totalorder %v3480_v50, 0  ;;  %v2970_v56 = vsel %vm2968_vm0, %v2969_v16, %v6050_v49  ;;  %v3030_v33 = vsub.s32 32, %v3029_v3  ;;  %v2682_v61 = vmul.f32 %v2681_v5, %v2679_v10 }
 0x47d   : > { %v6079_v1 = vmul.f32 %v2785_v22, %v2783_v55  ;;  %v2971_v57 = vadd.s32 %v2970_v56, %v2966_v53  ;;  %v3023_v43 = vor.u32 8388608, %v3022_v41  ;;  %v6081_v52 = vsel %vm3481_vm2, 0, %v3480_v50 }
 0x47e   : > { %v6083_v58 = vshrl.u32 %v3027_v21, 5  ;;  %v3038_v30 = vshll.u32 %v6533_v48, %v3029_v3  ;;  %v6088_v38 = vadd.f32 %v5747_v29, %v5936_v6  ;;  %v3033_v28 = vshrl.u32 %v6536_v46, %v3030_v33 }
 0x47f   : > { %v2972_v34 = vadd.s32 536870912, %v2971_v57  ;;  %v3036_v32 = vshrl.u32 %v6533_v48, %v3030_v33  ;;  %v3039_v49 = vshrl.u32 %v6530_v54, %v3030_v33  ;;  %v3032_v17 = vshll.u32 %v6529_v27, %v3029_v3 }
 0x480   : > { %v3035_v40 = vshll.u32 %v6536_v46, %v3029_v3  ;;  %v3041_v36 = vshll.u32 %v6530_v54, %v3029_v3  ;;  %v3042_v8 = vshrl.u32 %v6638_v63, %v3030_v33  ;;  %v2683_v18 = vxor.u32 2147483648, %v2682_v61 }
 0x481   : > { %v2787_v14 = vxor.u32 2147483648, %v6079_v1  ;;  %v6098_v29 = vshrl.u32 %v2972_v34, 30  ;;  %v3040_v6 = vor.u32 %v3039_v49, %v3038_v30  ;;  %v2883_v44 = vsub.s32 4294967266, %v6081_v52 }
 0x482   : > { %v3034_v15 = vor.u32 %v3033_v28, %v3032_v17  ;;  %v3037_v10 = vor.u32 %v3036_v32, %v3035_v40  ;;  %v3043_v37 = vor.u32 %v3042_v8, %v3041_v36  ;;  %v6647_v20 = vand.u32 2147483647, %v5732_v47 }
 0x483   : > { %v2974_v16 = vshll.u32 %v6098_v29, 30  ;;  %v3044_v2 = vshll.u32 %v6638_v63, %v3029_v3  ;;  %v3045_v41 = vshrl.u32 %v6639_v23, %v3030_v33  ;;  %v3063_v21 = vshll.u32 %v3023_v43, 8  ;;  %v6110_v60 = vpop.eup %3739 }
 0x484   : > { %vm6103_vm3 = vcmp.le.f32.partialorder %v6647_v20, 0.7853982  ;;  %vm2705_vm7 = vcmp.lt.s32.totalorder %v5745_v45, 0  ;;  %v2879_v50 = vsub.s32 32, %v6081_v52  ;;  %v3031_v5 = vshrl.u32 %v6529_v27, %v3030_v33 }
 0x485   : > { %vm3050_vm11 = vcmp.lt.s32.totalorder %v6083_v58, 4  ;;  %v3122_v22 = vand.u32 2139095040, %v6088_v38  ;;  %v6117_v53 = vsub.s32 %v2971_v57, %v2974_v16  ;;  %v3046_v56 = vor.u32 %v3045_v41, %v3044_v2  ;;  %v6122_v43 = vpop.eup %3741 }
 0x486   : > { %vm3047_vm8 = vcmp.lt.s32.totalorder %v6083_v58, 1  ;;  %v3052_v3 = vsel %vm3050_vm11, %v3040_v6, 2102212464  ;;  %v2884_v30 = vadd.s32 127, %v2883_v44  ;;  %vm3049_vm14 = vcmp.lt.s32.totalorder %v6083_v58, 3 }
 0x487   : > { %v3055_v34 = vsel %vm3047_vm8, %v3034_v15, %v3037_v10  ;;  %v3056_v33 = vsel %vm3050_vm11, %v3043_v37, 920167782  ;;  %v6650_v28 = vand.u32 2147483647, %v5745_v45  ;;  %v2977_v32 = vsub.s32 0, %v6117_v53 }
 0x488   : > { %vm3048_vm1 = vcmp.lt.s32.totalorder %v6083_v58, 2  ;;  %v3057_v49 = vsel %vm3049_vm14, %v3040_v6, %v3056_v33  ;;  %v3059_v17 = vsel %vm3047_vm8, %v3037_v10, %v3040_v6  ;;  %v3051_v40 = vsel %vm3047_vm8, %v3031_v5, %v3034_v15 }
 0x489   : > { %vm6129_vm13 = vcmp.le.f32.partialorder %v6650_v28, 0.7853982  ;;  %v3053_v36 = vsel %vm3049_vm14, %v3037_v10, %v3052_v3  ;;  %v3058_v8 = vsel %vm3048_vm1, %v3055_v34, %v3057_v49  ;;  %v3060_v44 = vsel %vm3050_vm11, %v3046_v56, 1326507024 }
 0x48a   : > { %v3483_v20 = vmin.u32 %v2977_v32, %v6117_v53  ;;  %v3061_v16 = vsel %vm3049_vm14, %v3043_v37, %v3060_v44  ;;  %v6140_v2 = vmul.u32.u64.low %v3063_v21, %v3058_v8  ;;  %v6141_v41 = vmul.u32.u64.high %v3063_v21, %v3058_v8, %v6140_v2 }
 0x48b   : > { %v6653_v28 = vsel %vm5940_vm10, 0, %v5930_v31  ;;  %v2684_v6 = vsel %vm2601_vm6, %v2683_v18, %v2682_v61  ;;  %v3062_v15 = vsel %vm3048_vm1, %v3059_v17, %v3061_v16  ;;  %v3123_v10 = vshrl.u32 %v3122_v22, 23 }
 0x48c   : > { %v6147_v33 = vadd.s32 3, %v6653_v28  ;;  %v2863_v5 = vadd.s32 %v5987_v39, %v5992_v7  ;;  %v2979_v37 = vclz %v3483_v20  ;;  %3743 = vcosq.f32 %v5960_v26 }
 0x48d   : > { %v6155_v56 = vmul.u32.u64.low %v3063_v21, %v3062_v15  ;;  %v6156_v3 = vmul.u32.u64.high %v3063_v21, %v3062_v15, %v6155_v56  ;;  %v2688_v31 = vsel %vm6103_vm3, 0, %v6074_v25  ;;  %v3054_v13 = vsel %vm3048_vm1, %v3051_v40, %v3053_v36 }
 0x48e   : > { %v3490_v61 = vadd.s32 4294967169, %v3123_v10  ;;  %v2788_v18 = vsel %vm2705_vm7, %v2787_v14, %v6079_v1  ;;  %v2881_v22 = vshrl.u32 %v2863_v5, %v2879_v50  ;;  %v2885_v39 = vshll.u32 %v2884_v30, 23 }
 0x48f   : > { %v3073_v7 = vadd.s32 1, %v6141_v41  ;;  %v2687_v34 = vsel %vm6103_vm3, %v5732_v47, %v2684_v6  ;;  %v3119_v32 = vand.u32 2147483647, %v6088_v38  ;;  %v2581_v25 = vsub.s32 4, %v5844_v62 }
 0x490   : > { %v3129_v49 = vadd.s32 1, %v3490_v61  ;;  %v2880_v58 = vshll.u32 %v6042_v0, %v6081_v52  ;;  %v3484_v17 = vadd.s32 4294967294, %v2979_v37  ;;  %v3070_v40 = vmul.u32 %v3063_v21, %v3054_v13 }
 0x491   : > { %vm3072_vm10 = vc.u32 %v6156_v3, %v6140_v2  ;;  %3745 = vsinq.f32 %v5960_v26  ;;  %v2791_v1 = vsel %vm6129_vm13, %v5745_v45, %v2788_v18  ;;  %v6183_v50 = vor.u32 4788187, %v2885_v39 }
 0x492   : > { %v3074_v14 = vsel %vm3072_vm10, %v3073_v7, %v6141_v41  ;;  %vm3130_vm6 = vcmp.gt.s32.totalorder %v3129_v49, 0  ;;  %3747 = vcosq.f32 %v2687_v34  ;;  %v6181_v55 = vor.u32 %v2881_v22, %v2880_v58 }
 0x493   : > { %v3075_v30 = vadd.s32 %v3074_v14, %v3070_v40  ;;  %3749 = vsinq.f32 %v2687_v34  ;;  %v6185_v0 = vadd.s32 3, %v2688_v31  ;;  %v3126_v52 = vand.u32 8388607, %v3119_v32 }
 0x494   : > { %v3131_v26 = vsel %vm3130_vm6, %v3129_v49, 0  ;;  %3751 = vcosq.f32 %v2791_v1  ;;  %vm3485_vm5 = vcmp.lt.s32.totalorder %v3484_v17, 0  ;;  %v2582_v36 = vsel %vm2497_vm15, %v2581_v25, %v5844_v62 }
 0x495   : > { %v3076_v21 = vadd.s32 536870912, %v3075_v30  ;;  %3753 = vsinq.f32 %v2791_v1  ;;  %v6194_v8 = vadd.s32 %v6049_v42, %v6063_v19  ;;  %v3133_v44 = vand.u32 31, %v3131_v26 }
 0x496   : > { %v2592_v20 = vxor.u32 2147483648, %v6122_v43  ;;  %v2887_v16 = vand.u32 2147483647, %v6183_v50  ;;  %v2889_v41 = vcvt.s32.f32 %v6181_v55  ;;  %v2595_v6 = vxor.u32 2147483648, %v6110_v60  ;;  %v6202_v15 = vpop.eup %3743 }
 0x497   : > { %v6199_v28 = vshrl.u32 %v3076_v21, 30  ;;  %v6204_v10 = vsel %vm3485_vm5, 0, %v3484_v17  ;;  %v3127_v62 = vor.u32 8388608, %v3126_v52  ;;  %v3134_v5 = vsub.s32 32, %v3133_v44 }
 0x498   : > { %v2584_v42 = vsel %vm6028_vm4, 0, %v2582_v36  ;;  %v6209_v19 = vadd.s32 %v6140_v2, %v6156_v3  ;;  %v3136_v56 = vshll.u32 %v6529_v27, %v3133_v44  ;;  %v2789_v31 = vsub.s32 4, %v5955_v11 }
 0x499   : > { %v3078_v37 = vshll.u32 %v6199_v28, 30  ;;  %v3137_v13 = vshrl.u32 %v6536_v46, %v3134_v5  ;;  %v3139_v61 = vshll.u32 %v6536_v46, %v3133_v44  ;;  %v3140_v18 = vshrl.u32 %v6533_v48, %v3134_v5 }
 0x49a   : > { %v3143_v22 = vshrl.u32 %v6530_v54, %v3134_v5  ;;  %v2987_v9 = vsub.s32 4294967266, %v6204_v10  ;;  %v3132_v2 = vshrl.u32 %v3131_v26, 5  ;;  %v3142_v3 = vshll.u32 %v6533_v48, %v3133_v44 }
 0x49b   : > { %v6219_v39 = vsub.s32 %v3075_v30, %v3078_v37  ;;  %v6222_v7 = vpop.eup %3745  ;;  %v2983_v34 = vsub.s32 32, %v6204_v10  ;;  %v3138_v49 = vor.u32 %v3137_v13, %v3136_v56  ;;  %v3141_v25 = vor.u32 %v3140_v18, %v3139_v61 }
 0x49c   : > { %v6225_v58 = vshll.u32 %v3127_v62, 8  ;;  %v6227_v46 = vpop.eup %3747  ;;  %v3144_v40 = vor.u32 %v3143_v22, %v3142_v3  ;;  %v3145_v1 = vshll.u32 %v6530_v54, %v3133_v44  ;;  %v3146_v14 = vshrl.u32 %v6638_v63, %v3134_v5 }
 0x49d   : > { %v3081_v17 = vsub.s32 0, %v6219_v39  ;;  %v6232_v30 = vpop.eup %3749  ;;  %v3148_v48 = vshll.u32 %v6638_v63, %v3133_v44  ;;  %v3149_v52 = vshrl.u32 %v6639_v23, %v3134_v5  ;;  %v2588_v26 = vadd.s32 3, %v2584_v42 }
 0x49e   : > { %v2790_v21 = vsel %vm2705_vm7, %v2789_v31, %v5955_v11  ;;  %v6239_v36 = vpop.eup %3751  ;;  %v2988_v62 = vadd.s32 127, %v2987_v9  ;;  %v3147_v56 = vor.u32 %v3146_v14, %v3145_v1  ;;  %vm3151_vm15 = vcmp.lt.s32.totalorder %v3132_v2, 1 }
 0x49f   : > { %v3487_v37 = vmin.u32 %v3081_v17, %v6219_v39  ;;  %v3754_v54 = vpop.eup %3753  ;;  %v3135_v13 = vshrl.u32 %v6529_v27, %v3134_v5  ;;  %v3150_v61 = vor.u32 %v3149_v52, %v3148_v48  ;;  %vm3154_vm4 = vcmp.lt.s32.totalorder %v3132_v2, 4 }
 0x4a0   : > { %v3159_v63 = vsel %vm3151_vm15, %v3138_v49, %v3141_v25  ;;  %vm3153_vm9 = vcmp.lt.s32.totalorder %v3132_v2, 3  ;;  %v3156_v23 = vsel %vm3154_vm4, %v3144_v40, 2102212464  ;;  %v3160_v42 = vsel %vm3154_vm4, %v3147_v56, 920167782 }
 0x4a1   : > { %v3083_v44 = vclz %v3487_v37  ;;  %vm3152_vm12 = vcmp.lt.s32.totalorder %v3132_v2, 2  ;;  %v3161_v18 = vsel %vm3153_vm9, %v3144_v40, %v3160_v42  ;;  %v3163_v11 = vsel %vm3151_vm15, %v3141_v25, %v3144_v40 }
 0x4a2   : > { %v2589_v31 = vand.u32 3, %v2588_v26  ;;  %v3155_v9 = vsel %vm3151_vm15, %v3135_v13, %v3138_v49  ;;  %v3162_v3 = vsel %vm3152_vm12, %v3159_v63, %v3161_v18  ;;  %v3164_v17 = vsel %vm3154_vm4, %v3150_v61, 1326507024 }
 0x4a3   : > { %v3488_v22 = vadd.s32 4294967294, %v3083_v44  ;;  %v3157_v1 = vsel %vm3153_vm9, %v3141_v25, %v3156_v23  ;;  %v3165_v14 = vsel %vm3153_vm9, %v3147_v56, %v3164_v17  ;;  %v2984_v48 = vshll.u32 %v6117_v53, %v6204_v10 }
 0x4a4   : > { %v6245_v27 = vmul.u32.u64.low %v6225_v58, %v3162_v3  ;;  %v6246_v5 = vmul.u32.u64.high %v6225_v58, %v3162_v3, %v6245_v27  ;;  %v3166_v52 = vsel %vm3152_vm12, %v3163_v11, %v3165_v14  ;;  %v2792_v40 = vsel %vm6129_vm13, 0, %v2790_v21 }
 0x4a5   : > { %vm3489_vm0 = vcmp.lt.s32.totalorder %v3488_v22, 0  ;;  %v2985_v49 = vshrl.u32 %v6194_v8, %v2983_v34  ;;  %v6256_v25 = vmul.u32.u64.low %v6225_v58, %v3166_v52  ;;  %v6257_v37 = vmul.u32.u64.high %v6225_v58, %v3166_v52, %v6256_v25 }
 0x4a6   : > { %v3086_v26 = vsel %vm3489_vm0, 0, %v3488_v22  ;;  %vm2587_vm2 = vweird.f32 %v5726_v24  ;;  %vm2795_vm3 = vweird.f32 %v5745_v45  ;;  %v2989_v56 = vshll.u32 %v2988_v62, 23 }
 0x4a7   : > { %v3091_v13 = vsub.s32 4294967266, %v3086_v26  ;;  %v3158_v53 = vsel %vm3152_vm12, %v3155_v9, %v3157_v1  ;;  %v2800_v10 = vxor.u32 2147483648, %v3754_v54  ;;  %v3177_v61 = vadd.s32 1, %v6246_v5 }
 0x4a8   : > { %vm2591_vm7 = vcmp.eq.s32.totalorder %v2589_v31, 0  ;;  %vm2594_vm11 = vcmp.eq.s32.totalorder %v2589_v31, 2  ;;  %v2796_v57 = vadd.s32 3, %v2792_v40  ;;  %v2803_v62 = vxor.u32 2147483648, %v6239_v36 }
 0x4a9   : > { %v3092_v8 = vadd.s32 127, %v3091_v13  ;;  %v2593_v34 = vsel %vm2591_vm7, %v6110_v60, %v2592_v20  ;;  %v2596_v21 = vsel %vm2594_vm11, %v2595_v6, %v6122_v43  ;;  %v2986_v63 = vor.u32 %v2985_v49, %v2984_v48 }
 0x4aa   : > { %v3174_v2 = vmul.u32 %v6225_v58, %v3158_v53  ;;  %vm3176_vm8 = vc.u32 %v6257_v37, %v6245_v27  ;;  %v2797_v44 = vand.u32 3, %v2796_v57  ;;  %v2990_v23 = vor.u32 4788187, %v2989_v56 }
 0x4ab   : > { %v3087_v42 = vsub.s32 32, %v3086_v26  ;;  %v3178_v18 = vsel %vm3176_vm8, %v3177_v61, %v6246_v5  ;;  %vm2590_vm14 = vcmp.lt.s32.totalorder %v2589_v31, 2  ;;  %v3093_v60 = vshll.u32 %v3092_v8, 23 }
 0x4ac   : > { %v3179_v11 = vadd.s32 %v3178_v18, %v3174_v2  ;;  %v2597_v20 = vsel %vm2590_vm14, %v2593_v34, %v2596_v21  ;;  %vm2799_vm13 = vcmp.eq.s32.totalorder %v2797_v44, 0  ;;  %vm2802_vm1 = vcmp.eq.s32.totalorder %v2797_v44, 2 }
 0x4ad   : > { %vm2798_vm10 = vcmp.lt.s32.totalorder %v2797_v44, 2  ;;  %v2801_v43 = vsel %vm2799_vm13, %v6239_v36, %v2800_v10  ;;  %v2804_v6 = vsel %vm2802_vm1, %v2803_v62, %v3754_v54  ;;  %v2485_v9 = vand.u32 3, %v6147_v33 }
 0x4ae   : > { %v3180_v22 = vadd.s32 536870912, %v3179_v11  ;;  %v2805_v58 = vsel %vm2798_vm10, %v2801_v43, %v2804_v6  ;;  %v2488_v3 = vxor.u32 2147483648, %v6222_v7  ;;  %v3089_v17 = vshrl.u32 %v6209_v19, %v3087_v42 }
 0x4af   : > { %v2598_v31 = vsel %vm2587_vm2, nan, %v2597_v20  ;;  %v2806_v1 = vsel %vm2795_vm3, nan, %v2805_v58  ;;  %v2491_v14 = vxor.u32 2147483648, %v6202_v15  ;;  %v3088_v5 = vshll.u32 %v6219_v39, %v3086_v26 }
 0x4b0   : > { %v6284_v36 = vshrl.u32 %v3180_v22, 30  ;;  %v3517_v54 = vpack.c.bf16 %v2806_v1, %v2598_v31  ;;  %vm2487_vm6 = vcmp.eq.s32.totalorder %v2485_v9, 0  ;;  %v3094_v48 = vor.u32 4788187, %v3093_v60 }
 0x4b1   : > { %v2489_v33 = vsel %vm2487_vm6, %v6202_v15, %v2488_v3  ;;  %vm2490_vm5 = vcmp.eq.s32.totalorder %v2485_v9, 2  ;;  %v2693_v19 = vand.u32 3, %v6185_v0  ;;  %v2696_v52 = vxor.u32 2147483648, %v6232_v30 }
 0x4b2   : > { %v3182_v24 = vshll.u32 %v6284_v36, 30  ;;  %3518 = vmatprep.subr.bf16.mxu0 %v3517_v54  ;;  %v2492_v45 = vsel %vm2490_vm5, %v2491_v14, %v6222_v7  ;;  %v2699_v40 = vxor.u32 2147483648, %v6227_v46  ;;  %v2991_v39 = vand.u32 2147483647, %v2990_v23 }
 0x4b3   : > { %v3090_v49 = vor.u32 %v3089_v17, %v3088_v5  ;;  %vm2486_vm15 = vcmp.lt.s32.totalorder %v2485_v9, 2  ;;  %vm2695_vm4 = vcmp.eq.s32.totalorder %v2693_v19, 0  ;;  %vm2698_vm9 = vcmp.eq.s32.totalorder %v2693_v19, 2 }
 0x4b4   : > { %v3183_v26 = vsub.s32 %v3179_v11, %v3182_v24  ;;  %v2493_v25 = vsel %vm2486_vm15, %v2489_v33, %v2492_v45  ;;  %v2697_v15 = vsel %vm2695_vm4, %v6227_v46, %v2696_v52  ;;  %v2993_v56 = vcvt.s32.f32 %v2986_v63 }
 0x4b5   : > { %v3095_v0 = vand.u32 2147483647, %v3094_v48  ;;  %vm2694_vm12 = vcmp.lt.s32.totalorder %v2693_v19, 2  ;;  %v2700_v13 = vsel %vm2698_vm9, %v2699_v40, %v6232_v30  ;;  %vm2483_vm0 = vweird.f32 %v5724_v12 }
 0x4b6   : > { %v3185_v53 = vsub.s32 0, %v3183_v26  ;;  %vm2691_vm2 = vweird.f32 %v5732_v47  ;;  %v2701_v7 = vsel %vm2694_vm12, %v2697_v15, %v2700_v13  ;;  %v2890_v10 = vmul.f32 %v2889_v41, %v2887_v16 }
 0x4b7   : > { %v3097_v61 = vcvt.s32.f32 %v3090_v49  ;;  %v2494_v57 = vsel %vm2483_vm0, nan, %v2493_v25  ;;  %v2702_v46 = vsel %vm2691_vm2, nan, %v2701_v7  ;;  %v2994_v8 = vmul.f32 %v2993_v56, %v2991_v39 }
 0x4b8   : > { %v3491_v34 = vmin.u32 %v3185_v53, %v3183_v26  ;;  %v3519_v21 = vpack.c.bf16 %v2702_v46, %v2494_v57  ;;  %v2891_v30 = vxor.u32 2147483648, %v2890_v10  ;;  %vm2809_vm3 = vcmp.lt.s32.totalorder %v5881_v4, 0 }
 0x4b9   : > { %v3098_v62 = vmul.f32 %v3097_v61, %v3095_v0  ;;  %v2995_v2 = vxor.u32 2147483648, %v2994_v8  ;;  %vm2913_vm11 = vcmp.lt.s32.totalorder %v5896_v35, 0  ;;  %vm3017_vm8 = vcmp.lt.s32.totalorder %v5946_v59, 0 }
 0x4ba   : > { %v3187_v63 = vclz %v3491_v34  ;;  %3520 = vmatpush1.bf16.msra.mxu0 %v3519_v21  ;;  %v2892_v47 = vsel %vm2809_vm3, %v2891_v30, %v2890_v10  ;;  %v3175_v16 = vadd.s32 %v6245_v27, %v6257_v37  ;;  %v6654_v42 = vand.u32 2147483647, %v5881_v4 }
 0x4bb   : > { %v3099_v44 = vxor.u32 2147483648, %v3098_v62  ;;  %v2996_v50 = vsel %vm2913_vm11, %v2995_v2, %v2994_v8  ;;  %v6657_v11 = vand.u32 2147483647, %v5896_v35  ;;  %v6660_v58 = vand.u32 2147483647, %v5946_v59 }
 0x4bc   : > { %v3492_v12 = vadd.s32 4294967294, %v3187_v63  ;;  %vm6311_vm14 = vcmp.le.f32.partialorder %v6654_v42, 0.7853982  ;;  %v3101_v1 = vsub.s32 4, %v6199_v28  ;;  %v2997_v5 = vsub.s32 4, %v6098_v29 }
 0x4bd   : > { %vm6317_vm13 = vcmp.le.f32.partialorder %v6657_v11, 0.7853982  ;;  %v3100_v60 = vsel %vm3017_vm8, %v3099_v44, %v3098_v62  ;;  %v2895_v27 = vsel %vm6311_vm14, %v5881_v4, %v2892_v47  ;;  %vm6331_vm1 = vcmp.le.f32.partialorder %v6660_v58, 0.7853982 }
 0x4be   : > { %vm3493_vm7 = vcmp.lt.s32.totalorder %v3492_v12, 0  ;;  %v2999_v22 = vsel %vm6317_vm13, %v5896_v35, %v2996_v50  ;;  %v3103_v3 = vsel %vm6331_vm1, %v5946_v59, %v3100_v60  ;;  %3755 = vcosq.f32 %v2895_v27 }
 0x4bf   : > { %v3190_v55 = vsel %vm3493_vm7, 0, %v3492_v12  ;;  %3757 = vcosq.f32 %v2999_v22  ;;  %v2893_v54 = vsub.s32 4, %v6035_v51  ;;  %v3102_v19 = vsel %vm3017_vm8, %v3101_v1, %v6199_v28 }
 0x4c0   : > { %v3191_v41 = vsub.s32 32, %v3190_v55  ;;  %v3195_v23 = vsub.s32 4294967266, %v3190_v55  ;;  %v3192_v37 = vshll.u32 %v3183_v26, %v3190_v55  ;;  %3759 = vcosq.f32 %v3103_v3 }
 0x4c1   : > { %3761 = vsinq.f32 %v3103_v3  ;;  %v3205_v45 = vsub.s32 4, %v6284_v36  ;;  %v2998_v52 = vsel %vm2913_vm11, %v2997_v5, %v6098_v29  ;;  %v2894_v40 = vsel %vm2809_vm3, %v2893_v54, %v6035_v51 }
 0x4c2   : > { %v3193_v43 = vshrl.u32 %v3175_v16, %v3191_v41  ;;  %v3196_v6 = vadd.s32 127, %v3195_v23  ;;  %3763 = vsinq.f32 %v2999_v22  ;;  %v3104_v49 = vsel %vm6331_vm1, 0, %v3102_v19 }
 0x4c3   : > { %3765 = vsinq.f32 %v2895_v27  ;;  %vm3121_vm10 = vcmp.lt.s32.totalorder %v6088_v38, 0  ;;  %vm6356_vm6 = vcmp.le.f32.partialorder %v3119_v32, 0.7853982  ;;  %v3000_v29 = vsel %vm6317_vm13, 0, %v2998_v52 }
 0x4c4   : > { %v3194_v17 = vor.u32 %v3193_v43, %v3192_v37  ;;  %v3197_v31 = vshll.u32 %v3196_v6, 23  ;;  %v3206_v25 = vsel %vm3121_vm10, %v3205_v45, %v6284_v36  ;;  %v2896_v51 = vsel %vm6311_vm14, 0, %v2894_v40 }
 0x4c5   : > { %v3108_v13 = vadd.s32 3, %v3104_v49  ;;  %v3004_v53 = vadd.s32 3, %v3000_v29  ;;  %v3208_v7 = vsel %vm6356_vm6, 0, %v3206_v25  ;;  %v2900_v61 = vadd.s32 3, %v2896_v51 }
 0x4c6   : > { %v3198_v14 = vor.u32 4788187, %v3197_v31  ;;  %v3201_v33 = vcvt.s32.f32 %v3194_v17  ;;  %v3212_v46 = vadd.s32 3, %v3208_v7  ;;  %vm3107_vm13 = vweird.f32 %v5946_v59  ;;  %v3223_v59 = vld [vmem:[%s6432_s7] sm:$0x7] }
 0x4c7   : > { %v3109_v8 = vand.u32 3, %v3108_v13  ;;  %v3005_v34 = vand.u32 3, %v3004_v53  ;;  %v2901_v2 = vand.u32 3, %v2900_v61  ;;  %vm3003_vm1 = vweird.f32 %v5896_v35  ;;  %v3228_v35 = vpop.permute.xlu0 %3227 }
 0x4c8   : > { %v3199_v48 = vand.u32 2147483647, %v3198_v14  ;;  %v3756_v15 = vpop.eup %3755  ;;  %v3213_v47 = vand.u32 3, %v3212_v46 }
 0x4c9   : > { %v3758_v0 = vpop.eup %3757  ;;  %v2907_v44 = vxor.u32 2147483648, %v3756_v15  ;;  %vm3111_vm5 = vcmp.eq.s32.totalorder %v3109_v8, 0  ;;  %vm3114_vm15 = vcmp.eq.s32.totalorder %v3109_v8, 2  ;;  %vm3007_vm4 = vcmp.eq.s32.totalorder %v3005_v34, 0 }
 0x4ca   : > { %v3202_v24 = vmul.f32 %v3201_v33, %v3199_v48  ;;  %v3760_v32 = vpop.eup %3759  ;;  %v3011_v30 = vxor.u32 2147483648, %v3758_v0  ;;  %vm3010_vm9 = vcmp.eq.s32.totalorder %v3005_v34, 2  ;;  %vm2903_vm12 = vcmp.eq.s32.totalorder %v2901_v2, 0 }
 0x4cb   : > { %v3762_v10 = vpop.eup %3761  ;;  %v3115_v62 = vxor.u32 2147483648, %v3760_v32  ;;  %vm2906_vm0 = vcmp.eq.s32.totalorder %v2901_v2, 2  ;;  %vm3110_vm2 = vcmp.lt.s32.totalorder %v3109_v8, 2  ;;  %vm3006_vm3 = vcmp.lt.s32.totalorder %v3005_v34, 2 }
 0x4cc   : > { %v3203_v39 = vxor.u32 2147483648, %v3202_v24  ;;  %v3764_v36 = vpop.eup %3763  ;;  %v3112_v21 = vxor.u32 2147483648, %v3762_v10  ;;  %vm3218_vm7 = vcmp.eq.s32.totalorder %v3213_v47, 2  ;;  %vm3215_vm11 = vcmp.eq.s32.totalorder %v3213_v47, 0 }
 0x4cd   : > { %v3766_v57 = vpop.eup %3765  ;;  %v3008_v63 = vxor.u32 2147483648, %v3764_v36  ;;  %v3116_v50 = vsel %vm3114_vm15, %v3115_v62, %v3762_v10  ;;  %v3012_v23 = vsel %vm3010_vm9, %v3011_v30, %v3764_v36  ;;  %vm2902_vm8 = vcmp.lt.s32.totalorder %v2901_v2, 2 }
 0x4ce   : > { %v3204_v26 = vsel %vm3121_vm10, %v3203_v39, %v3202_v24  ;;  %v2904_v12 = vxor.u32 2147483648, %v3766_v57  ;;  %v3113_v55 = vsel %vm3111_vm5, %v3760_v32, %v3112_v21  ;;  %v2908_v20 = vsel %vm2906_vm0, %v2907_v44, %v3766_v57 }
 0x4cf   : > { %v3207_v56 = vsel %vm6356_vm6, %v6088_v38, %v3204_v26  ;;  %v3009_v41 = vsel %vm3007_vm4, %v3758_v0, %v3008_v63  ;;  %v3117_v27 = vsel %vm3110_vm2, %v3113_v55, %v3116_v50  ;;  %vm3214_vm14 = vcmp.lt.s32.totalorder %v3213_v47, 2 }
 0x4d0   : > { %3767 = vcosq.f32 %v3207_v56  ;;  %v2905_v11 = vsel %vm2903_vm12, %v3756_v15, %v2904_v12  ;;  %v3013_v37 = vsel %vm3006_vm3, %v3009_v41, %v3012_v23  ;;  %vm3211_vm10 = vweird.f32 %v6088_v38 }
 0x4d1   : > { %3769 = vsinq.f32 %v3207_v56  ;;  %v2909_v22 = vsel %vm2902_vm8, %v2905_v11, %v2908_v20  ;;  %v3118_v9 = vsel %vm3107_vm13, nan, %v3117_v27  ;;  %v3014_v3 = vsel %vm3003_vm1, nan, %v3013_v37 }
 0x4d2   : > { %vm2899_vm6 = vweird.f32 %v5881_v4  ;;  %vm6665_vm5 = vcmask 261120  }
 0x4d3   : > { %v2910_v1 = vsel %vm2899_vm6, nan, %v2909_v22 }
 0x4d4   : > { %v3523_v14 = vpack.c.bf16 %v3118_v9, %v2910_v1 }
 0x4da   : > { %v3768_v16 = vpop.eup %3767 }
 0x4db   : > { %v3770_v42 = vpop.eup %3769  ;;  %v3219_v18 = vxor.u32 2147483648, %v3768_v16 }
 0x4dc   : > { %v3216_v60 = vxor.u32 2147483648, %v3770_v42 }
 0x4dd   : > { %v3220_v43 = vsel %vm3218_vm7, %v3219_v18, %v3770_v42 }
 0x4de   : > { %v3217_v6 = vsel %vm3215_vm11, %v3768_v16, %v3216_v60 }
 0x4df   : > { %v3221_v58 = vsel %vm3214_vm14, %v3217_v6, %v3220_v43 }
 0x4e0   : > { %v3222_v17 = vsel %vm3211_vm10, nan, %v3221_v58 }
 0x4e1   : > { %v3521_v31 = vpack.c.bf16 %v3222_v17, %v3014_v3 }
 0x4e3   : > { %3522 = vmatprep.subr.bf16.mxu0 %v3521_v31 }
 0x4e4   : > { %3524 = vmatpush1.bf16.msra.mxu0 %v3523_v14 }
 0x4e7   : > { %3494 = vmatmul.mubr.msk.f32.vlgmr.msra.gmra.mrb[8].mxu0 %vm6665_vm5, %v3223_v59 }
 0x5ba   : > { %v3299_v38 = vpop.f32.mrb[8].mxu0 }
 0x5bb   : > { %v3300_v5 = vadd.f32 %v3299_v38, %v3228_v35  ;;  %v3301_v54 = vpop.f32.mrb[9].mxu0 }
 0x5bc   : > { %v3302_v4 = vadd.f32 %v3301_v54, %v3228_v35 }
 0x5be   : > { %v3306_v48 = vcombine.low %v3300_v5, %v3302_v4 }
 0x5c0   : > { %3308 = vst [vmem:[%s326_s21] sm:$0x77] %v3306_v48 }
 0x5c1   : > { %3784 = shalt.err (!%p3781_p3)
}
 0x5c2   : > { %s3785_s14 = scalar_lea.hbm %s6383_s25, 128  ;;  %s3789_s21 = scalar_lea.hbm %s6434_s9, 256 }
 0x5c3   : > { %p3786_p4 = scmp.ne.s32.totalorder %s6383_s25, %s3785_s14  ;;  %p3790_p9 = scmp.lt.u32.totalorder %s6383_s25, %s6434_s9 }
 0x5c4   : > { %p3791_p10 = scmp.lt.u32.totalorder %s3789_s21, %s3785_s14  ;;  %p3793_p12 = scmp.lt.u32.totalorder %s3785_s14, %s6383_s25 }
 0x5c5   : > { %p3787_p7 = pnand %p3786_p4, %p3933_p5 }
 0x5c6   : > { %p3792_p11 = por %p3791_p10, %p3790_p9 }
 0x5c7   : > { %p3788_p8 = pneg %p3787_p7 }
 0x5c8   : > { %p3794_p13 = por %p3793_p12, %p3792_p11 }
 0x5ca   : > { %p3795_p0 = pnand %p3794_p13, %p3788_p8 }
 0x5cc   : > { %3798 = shalt.err (!%p3795_p0)
}
 0x5cd   : > { %3621 = dma.vmem_to_hbm [thread:$0]  (%p3933_p5), %s6385_s22, 128, %s6383_s25, %s3310_s26  }
 0x5ce PF: > { %p3627_p1 = scmp.ge.s32.totalorder %s3833_s12, 2  ;;  %s3336_s27 = sand.u32 1, %s3821_s30  }
 0x5cf   : > { %s3337_s13 = scalar_lea.sflag [#allocation3], %s3336_s27 }
 0x5d0   : > { %p3624_p2 = pnand %p3627_p1, %p3937_p6 }
 0x5d2   : > { %3816 = dma.done.wait (!%p3624_p2), %s3337_s13, 128  }
 0x5d3   : > { %3818 = vsyncadd (!%p3624_p2), %s3337_s13, 4294967168  ;;  %p19_p3 = scmp.ge.s32.totalorder %s3920_s15, 4   ;;  %s6666_s30 = smov %s3825_s10 }
 0x5d4   : > { %s6667_s10 = smov %s3829_s11  ;;  %s6668_s11 = smov %s3931_s18 }
 0x5d5   : > { %s6669_s12 = smov %s3920_s15  ;;  %21 = sbr.rel (!%p19_p3) target bundleno = 3 (0x3), region = 91 }
 0x5dc   :  { %3342 = vsyncpa [#allocation3], 1 }
 0x5dd   :  { %3344 = vsyncpa [#allocation3 + $0x1], 1 }

</bundles_post_ra>
